<compile_context>
chip_gen: v7x
topology: tpu7x:2x2x1
jax: 0.10.0
libtpu: 0.0.40
codegen_flags: <defaults>
</compile_context>

<pallas_src>
import functools

import jax
import jax.numpy as jnp
from jax import lax
from jax.experimental import pallas as pl
from jax.experimental.pallas import tpu as pltpu

EPS = 1e-5
TM = 512       # row tile (review: 512-1024; 512 keeps v5e scoped VMEM / v7x 64MiB happy)
LANE = 128
VMEM_LIMIT = 32 * 1024 * 1024


def _round_up(x, m):
    return ((x + m - 1) // m) * m


# ----------------------------- Pallas kernels ------------------------------ #
def _bn_relu_matmul_kernel(p_ref, s_ref, b_ref, w_ref, o_ref):
    # y = relu(p * scale + shift) @ W   (BN folded; f32 elementwise + f32 accumulation)
    a = jnp.maximum(p_ref[...].astype(jnp.float32) * s_ref[...] + b_ref[...], 0.0)
    o_ref[...] = jnp.dot(a.astype(w_ref.dtype), w_ref[...],
                         preferred_element_type=jnp.float32)


def _bn_relu_matmul_stats_kernel(p_ref, s_ref, b_ref, w_ref, o_ref, st_ref,
                                 *, tm, n_valid):
    # Same as above, plus per-block column sum / sum-of-squares of the VALID output
    # rows (feeds the next layer's BatchNorm fold without an extra HBM pass).
    a = jnp.maximum(p_ref[...].astype(jnp.float32) * s_ref[...] + b_ref[...], 0.0)
    y = jnp.dot(a.astype(w_ref.dtype), w_ref[...], preferred_element_type=jnp.float32)
    o_ref[...] = y
    row = lax.broadcasted_iota(jnp.int32, (tm, 1), 0) + pl.program_id(0) * tm
    ym = jnp.where(row < n_valid, y, 0.0)          # mask ragged boundary rows
    s0 = jnp.sum(ym, axis=0, keepdims=True)        # (1, CP)
    s1 = jnp.sum(ym * ym, axis=0, keepdims=True)   # (1, CP)
    st_ref[0] = jnp.concatenate(
        [s0, s1, jnp.zeros((6, y.shape[1]), jnp.float32)], axis=0)   # (8, CP) aligned


# ------------------------------ kernel wrapper ------------------------------ #
def bn_relu_conv_matmul(patches, scale, shift, w, *, with_stats=False, tm=TM):
    """patches: (P, K); scale/shift: (K,) f32; w: (K, CP).

    Returns (out, stats): out is (P, CP) f32; stats (if requested) is (G, 8, CP)
    where rows 0/1 of each block hold the column sum / sum-of-squares of valid rows.
    K and CP are expected to be multiples of 128 (lane-dense)."""
    P, K = patches.shape
    CP = w.shape[1]
    grid = pl.cdiv(P, tm)

    in_specs = [
        pl.BlockSpec((tm, K), lambda i: (i, 0)),
        pl.BlockSpec((1, K), lambda i: (0, 0)),
        pl.BlockSpec((1, K), lambda i: (0, 0)),
        pl.BlockSpec((K, CP), lambda i: (0, 0)),
    ]
    out_block = pl.BlockSpec((tm, CP), lambda i: (i, 0))
    cparams = pltpu.CompilerParams(dimension_semantics=("parallel",),
                                   vmem_limit_bytes=VMEM_LIMIT)
    args = (patches,
            scale.reshape(1, K).astype(jnp.float32),
            shift.reshape(1, K).astype(jnp.float32),
            w)

    if not with_stats:
        out = pl.pallas_call(
            _bn_relu_matmul_kernel,
            out_shape=jax.ShapeDtypeStruct((P, CP), jnp.float32),
            grid_spec=pltpu.PrefetchScalarGridSpec(
                num_scalar_prefetch=0, grid=(grid,),
                in_specs=in_specs, out_specs=out_block),
            compiler_params=cparams,
        )(*args)
        return out, None

    kernel = functools.partial(_bn_relu_matmul_stats_kernel, tm=tm, n_valid=P)
    out, stats = pl.pallas_call(
        kernel,
        out_shape=(jax.ShapeDtypeStruct((P, CP), jnp.float32),
                   jax.ShapeDtypeStruct((grid, 8, CP), jnp.float32)),
        grid_spec=pltpu.PrefetchScalarGridSpec(
            num_scalar_prefetch=0, grid=(grid,),
            in_specs=in_specs,
            out_specs=(out_block,
                       pl.BlockSpec((1, 8, CP), lambda i: (i, 0, 0)))),
        compiler_params=cparams,
    )(*args)
    return out, stats


# ------------------------------- JAX glue ---------------------------------- #
def im2col3d(x):
    """x: (N, D, H, W, C) -> (N*Do*Ho*Wo, 27*C), tap-major / channel-minor."""
    N, D, H, W, C = x.shape
    Do, Ho, Wo = D - 2, H - 2, W - 2
    taps = []
    for kd in range(3):
        for kh in range(3):
            for kw in range(3):
                taps.append(x[:, kd:kd + Do, kh:kh + Ho, kw:kw + Wo, :])
    p = jnp.stack(taps, axis=4)  # (N, Do, Ho, Wo, 27, C)
    return p.reshape(N * Do * Ho * Wo, 27 * C)


def _pad_cols(a, k):
    return a if a.shape[1] == k else jnp.pad(a, ((0, 0), (0, k - a.shape[1])))


def _pad_vec(v, k):
    return v if v.shape[0] == k else jnp.pad(v, (0, k - v.shape[0]))


def _pad_weight(w, rows, cols):
    return jnp.pad(w, ((0, rows - w.shape[0]), (0, cols - w.shape[1])))


def _fold_bn(mean, var, gamma, beta):
    scale = gamma / jnp.sqrt(var + EPS)
    return scale, beta - mean * scale


def block_forward(x_ncdhw, params, matmul_dtype=jnp.float32):
    # TODO(synk): pad=1 branch and drop_rate>0 dropout are not implemented (module defaults).
    # TODO(synk): at production channel counts, replace the HBM im2col with in-kernel tap
    #             construction over halo'd depth slabs (cuts HBM traffic ~27x) and fuse
    #             layer1/layer2 over spatial tiles keeping y1 in VMEM.
    x = jnp.transpose(x_ncdhw, (0, 2, 3, 4, 1)).astype(jnp.float32)  # NDHWC
    N, D, H, W, Cin = x.shape
    Cout = params["w1"].shape[0]
    Do1, Ho1, Wo1 = D - 2, H - 2, W - 2
    Do2, Ho2, Wo2 = D - 4, H - 4, W - 4
    P1 = N * Do1 * Ho1 * Wo1
    P2 = N * Do2 * Ho2 * Wo2
    CP = _round_up(Cout, LANE)          # lane-dense output channels (crop afterwards)
    K1 = 27 * Cin
    K1P = _round_up(K1, LANE)
    K2 = 27 * Cout + Cin                # layer2 patches + 1x1 projection input, merged
    K2P = _round_up(K2, LANE)

    # ---- batch statistics of x: computed ONCE, reused for layer1 and projection ----
    xf = x.reshape(-1, Cin)
    x_mean = xf.mean(axis=0)
    x_var = xf.var(axis=0)              # biased, matches PyTorch training normalization
    s1, b1 = _fold_bn(x_mean, x_var, params["g1"], params["b1"])
    sp, bp = _fold_bn(x_mean, x_var, params["gp"], params["bp"])

    # ---- weights: PyTorch OIDHW -> (kD,kH,kW,Cin,Cout) -> flat, zero-padded ----
    w1 = jnp.transpose(params["w1"], (2, 3, 4, 1, 0)).reshape(K1, Cout)
    w2 = jnp.transpose(params["w2"], (2, 3, 4, 1, 0)).reshape(27 * Cout, Cout)
    wp = params["wp"].reshape(Cout, Cin).T                         # (Cin, Cout)
    w1p = _pad_weight(w1, K1P, CP).astype(matmul_dtype)
    wc = _pad_weight(jnp.concatenate([w2, wp], axis=0), K2P, CP).astype(matmul_dtype)

    # ---- layer1: BN + ReLU + conv3x3x3 (valid); y1 stats as a kernel side output ----
    p1 = _pad_cols(im2col3d(x), K1P).astype(matmul_dtype)          # (P1, K1P)
    s1v = _pad_vec(jnp.tile(s1, 27), K1P)
    b1v = _pad_vec(jnp.tile(b1, 27), K1P)
    y1_rows, st = bn_relu_conv_matmul(p1, s1v, b1v, w1p, with_stats=True)
    y1 = y1_rows[:, :Cout].reshape(N, Do1, Ho1, Wo1, Cout)

    y1_mean = st[:, 0, :Cout].sum(axis=0) / P1
    y1_var = st[:, 1, :Cout].sum(axis=0) / P1 - y1_mean * y1_mean  # biased variance
    s2, b2 = _fold_bn(y1_mean, y1_var, params["g2"], params["b2"])

    # ---- layer2 conv + 1x1 projection + residual add, merged into ONE matmul ----
    p2 = im2col3d(y1)                                              # (P2, 27*Cout)
    xcrop = x[:, 2:-2, 2:-2, 2:-2, :].reshape(P2, Cin)             # F.pad(..., -2) == crop
    pc = _pad_cols(jnp.concatenate([p2, xcrop], axis=1), K2P).astype(matmul_dtype)
    sc = _pad_vec(jnp.concatenate([jnp.tile(s2, 27), sp]), K2P)
    bc = _pad_vec(jnp.concatenate([jnp.tile(b2, 27), bp]), K2P)
    y_rows, _ = bn_relu_conv_matmul(pc, sc, bc, wc, with_stats=False)
    y = y_rows[:, :Cout].reshape(N, Do2, Ho2, Wo2, Cout)
    return jnp.transpose(y, (0, 4, 1, 2, 3))                       # back to NCDHW


# --------------------------- pure-JAX reference ----------------------------- #
def ref_block_forward(x, params):
    def bn_relu(v, gamma, beta):
        mean = v.mean(axis=(0, 2, 3, 4), keepdims=True)
        var = v.var(axis=(0, 2, 3, 4), keepdims=True)
        vhat = (v - mean) / jnp.sqrt(var + EPS)
        return jnp.maximum(vhat * gamma.reshape(1, -1, 1, 1, 1)
                           + beta.reshape(1, -1, 1, 1, 1), 0.0)

    dn = ("NCDHW", "OIDHW", "NCDHW")
    a1 = bn_relu(x, params["g1"], params["b1"])
    y1 = lax.conv_general_dilated(a1, params["w1"], (1, 1, 1), "VALID",
                                  dimension_numbers=dn)
    a2 = bn_relu(y1, params["g2"], params["b2"])
    y2 = lax.conv_general_dilated(a2, params["w2"], (1, 1, 1), "VALID",
                                  dimension_numbers=dn)
    ap = bn_relu(x, params["gp"], params["bp"])
    yp = lax.conv_general_dilated(ap, params["wp"], (1, 1, 1), "VALID",
                                  dimension_numbers=dn)
    yp = yp[:, :, 2:-2, 2:-2, 2:-2]
    return y2 + yp


# ---------------------------------- main ------------------------------------ #
if __name__ == "__main__":
    Cin, Cout = 4, 8
    N, D, H, W = 2, 16, 16, 16

    key = jax.random.PRNGKey(0)
    ks = jax.random.split(key, 10)
    params = {
        # Conv3d weights, PyTorch layout (Cout, Cin, kD, kH, kW), bias=False
        "w1": 0.1 * jax.random.normal(ks[0], (Cout, Cin, 3, 3, 3), jnp.float32),
        "w2": 0.1 * jax.random.normal(ks[1], (Cout, Cout, 3, 3, 3), jnp.float32),
        "wp": 0.1 * jax.random.normal(ks[2], (Cout, Cin, 1, 1, 1), jnp.float32),
        # BatchNorm3d affine params
        "g1": 1.0 + 0.1 * jax.random.normal(ks[3], (Cin,), jnp.float32),
        "b1": 0.1 * jax.random.normal(ks[4], (Cin,), jnp.float32),
        "g2": 1.0 + 0.1 * jax.random.normal(ks[5], (Cout,), jnp.float32),
        "b2": 0.1 * jax.random.normal(ks[6], (Cout,), jnp.float32),
        "gp": 1.0 + 0.1 * jax.random.normal(ks[7], (Cin,), jnp.float32),
        "bp": 0.1 * jax.random.normal(ks[8], (Cin,), jnp.float32),
    }
    x = jax.random.normal(ks[9], (N, Cin, D, H, W), jnp.float32)

    ref = ref_block_forward(x, params)

    # f32 path (default everywhere)
    out = jax.jit(block_forward)(x, params)
    out = jax.block_until_ready(out)
    assert out.shape == (N, Cout, D - 4, H - 4, W - 4), out.shape
    err = float(jnp.max(jnp.abs(out - ref)))
    assert err < 1e-3, f"f32 path: max abs error {err}"

    # bf16 matmul-operand path (v6e/v7x bandwidth option); BN/ReLU + accumulation stay f32.
    out_bf16 = jax.jit(functools.partial(block_forward, matmul_dtype=jnp.bfloat16))(x, params)
    out_bf16 = jax.block_until_ready(out_bf16)
    err_bf16 = float(jnp.max(jnp.abs(out_bf16 - ref)))
    assert err_bf16 < 1e-1, f"bf16 path: max abs error {err_bf16}"

    print("KERNEL_OK")
</pallas_src>

<mosaic_0001>
module attributes {stable_mosaic.version = 11 : i64} {
  func.func @_bn_relu_matmul_stats_kernel(%arg0: i32, %arg1: memref<512x128xf32, #tpu.memory_space<vmem>>, %arg2: memref<1x128xf32, #tpu.memory_space<vmem>>, %arg3: memref<1x128xf32, #tpu.memory_space<vmem>>, %arg4: memref<128x128xf32, #tpu.memory_space<vmem>>, %arg5: memref<512x128xf32, #tpu.memory_space<vmem>>, %arg6: memref<1x8x128xf32, #tpu.memory_space<vmem>>) attributes {dimension_semantics = [#tpu.dimension_semantics<parallel>], iteration_bounds = array<i64: 11>, scalar_prefetch = 0 : i64, scratch_operands = 0 : i64, tpu.core_type = #tpu.core_type<tc>, window_params = [{transform_indices = @transform_0, window_bounds = array<i64: 512, 128>}, {pipeline_mode = #tpu.pipeline_mode<synchronous>, transform_indices = @transform_1, window_bounds = array<i64: 1, 128>}, {pipeline_mode = #tpu.pipeline_mode<synchronous>, transform_indices = @transform_2, window_bounds = array<i64: 1, 128>}, {pipeline_mode = #tpu.pipeline_mode<synchronous>, transform_indices = @transform_3, window_bounds = array<i64: 128, 128>}, {transform_indices = @transform_4, window_bounds = array<i64: 512, 128>}, {transform_indices = @transform_5, window_bounds = array<i64: 1, 8, 128>}]} {
    %c0 = arith.constant 0 : index
    %c0_0 = arith.constant 0 : index
    %0 = vector.load %arg1[%c0, %c0_0] : memref<512x128xf32, #tpu.memory_space<vmem>>, vector<512x128xf32>
    %c0_1 = arith.constant 0 : index
    %c0_2 = arith.constant 0 : index
    %1 = vector.load %arg2[%c0_1, %c0_2] : memref<1x128xf32, #tpu.memory_space<vmem>>, vector<1x128xf32>
    %2 = vector.broadcast %1 : vector<1x128xf32> to vector<512x128xf32>
    %3 = arith.mulf %0, %2 : vector<512x128xf32>
    %c0_3 = arith.constant 0 : index
    %c0_4 = arith.constant 0 : index
    %4 = vector.load %arg3[%c0_3, %c0_4] : memref<1x128xf32, #tpu.memory_space<vmem>>, vector<1x128xf32>
    %5 = vector.broadcast %4 : vector<1x128xf32> to vector<512x128xf32>
    %6 = arith.addf %3, %5 : vector<512x128xf32>
    %cst = arith.constant 0.000000e+00 : f32
    %7 = vector.broadcast %cst : f32 to vector<512x128xf32>
    %8 = arith.maximumf %6, %7 : vector<512x128xf32>
    %c0_5 = arith.constant 0 : index
    %c0_6 = arith.constant 0 : index
    %9 = vector.load %arg4[%c0_5, %c0_6] : memref<128x128xf32, #tpu.memory_space<vmem>>, vector<128x128xf32>
    %cst_7 = arith.constant dense<0.000000e+00> : vector<512x128xf32>
    %10 = tpu.matmul %8, %9, %cst_7 {dimension_numbers = #tpu.dot_dimension_numbers<[1], [0], [0], [1], [0, 0, 1, 1], [], []>} : vector<512x128xf32>, vector<128x128xf32>, vector<512x128xf32> -> vector<512x128xf32>
    %c0_8 = arith.constant 0 : index
    %c0_9 = arith.constant 0 : index
    %11 = vector.load %arg5[%c0_8, %c0_9] : memref<512x128xf32, #tpu.memory_space<vmem>>, vector<512x128xf32>
    tpu.vector_store %arg5[%c0_8, %c0_9], %10 {strides = array<i32>} : memref<512x128xf32, #tpu.memory_space<vmem>>, vector<512x128xf32>,
    %12 = tpu.iota {dimensions = array<i32: 0>} : vector<512x1xi32>
    %c512_i32 = arith.constant 512 : i32
    %13 = arith.muli %arg0, %c512_i32 : i32
    %14 = vector.broadcast %13 : i32 to vector<512x1xi32>
    %15 = arith.addi %12, %14 : vector<512x1xi32>
    %c5488_i32 = arith.constant 5488 : i32
    %16 = vector.broadcast %c5488_i32 : i32 to vector<512x1xi32>
    %17 = arith.cmpi slt, %15, %16 : vector<512x1xi32>
    %cst_10 = arith.constant 0.000000e+00 : f32
    %18 = vector.shape_cast %17 : vector<512x1xi1> to vector<512x1xi1>
    %19 = vector.broadcast %18 : vector<512x1xi1> to vector<512x128xi1>
    %20 = vector.broadcast %cst_10 : f32 to vector<512x128xf32>
    %21 = arith.select %19, %10, %20 : vector<512x128xi1>, vector<512x128xf32>
    %cst_11 = arith.constant dense<0.000000e+00> : vector<128xf32>
    %22 = vector.multi_reduction <add>, %21, %cst_11 [0] : vector<512x128xf32> to vector<128xf32>
    %23 = vector.shape_cast %22 : vector<128xf32> to vector<1x128xf32>
    %24 = arith.mulf %21, %21 : vector<512x128xf32>
    %cst_12 = arith.constant dense<0.000000e+00> : vector<128xf32>
    %25 = vector.multi_reduction <add>, %24, %cst_12 [0] : vector<512x128xf32> to vector<128xf32>
    %26 = vector.shape_cast %25 : vector<128xf32> to vector<1x128xf32>
    %cst_13 = arith.constant 0.000000e+00 : f32
    %27 = vector.broadcast %cst_13 : f32 to vector<6x128xf32>
    %28 = tpu.concatenate %23, %26, %27 in 0 : vector<1x128xf32>, vector<1x128xf32>, vector<6x128xf32> -> vector<8x128xf32>
    %c0_14 = arith.constant 0 : index
    %c0_15 = arith.constant 0 : index
    %c0_16 = arith.constant 0 : index
    %29 = vector.load %arg6[%c0_14, %c0_15, %c0_16] : memref<1x8x128xf32, #tpu.memory_space<vmem>>, vector<1x8x128xf32>
    %30 = vector.shape_cast %29 : vector<1x8x128xf32> to vector<8x128xf32>
    %31 = vector.shape_cast %28 : vector<8x128xf32> to vector<1x8x128xf32>
    tpu.vector_store %arg6[%c0_14, %c0_15, %c0_16], %31 {strides = array<i32>} : memref<1x8x128xf32, #tpu.memory_space<vmem>>, vector<1x8x128xf32>,
    return
  }
  func.func @transform_0(%arg0: i32) -> (i32, i32) {
    %c0_i32 = arith.constant 0 : i32
    %c0_i32_0 = arith.constant 0 : i32
    return %arg0, %c0_i32 : i32, i32
  }
  func.func @transform_1(%arg0: i32) -> (i32, i32) {
    %c0_i32 = arith.constant 0 : i32
    %c0_i32_0 = arith.constant 0 : i32
    %c0_i32_1 = arith.constant 0 : i32
    return %c0_i32, %c0_i32_0 : i32, i32
  }
  func.func @transform_2(%arg0: i32) -> (i32, i32) {
    %c0_i32 = arith.constant 0 : i32
    %c0_i32_0 = arith.constant 0 : i32
    %c0_i32_1 = arith.constant 0 : i32
    return %c0_i32, %c0_i32_0 : i32, i32
  }
  func.func @transform_3(%arg0: i32) -> (i32, i32) {
    %c0_i32 = arith.constant 0 : i32
    %c0_i32_0 = arith.constant 0 : i32
    %c0_i32_1 = arith.constant 0 : i32
    return %c0_i32, %c0_i32_0 : i32, i32
  }
  func.func @transform_4(%arg0: i32) -> (i32, i32) {
    %c0_i32 = arith.constant 0 : i32
    %c0_i32_0 = arith.constant 0 : i32
    return %arg0, %c0_i32 : i32, i32
  }
  func.func @transform_5(%arg0: i32) -> (i32, i32, i32) {
    %c0_i32 = arith.constant 0 : i32
    %c0_i32_0 = arith.constant 0 : i32
    %c0_i32_1 = arith.constant 0 : i32
    return %arg0, %c0_i32, %c0_i32_0 : i32, i32, i32
  }
}

module attributes {stable_mosaic.version = 11 : i64} {
  func.func @_bn_relu_matmul_kernel(%arg0: i32, %arg1: memref<512x256xf32, #tpu.memory_space<vmem>>, %arg2: memref<1x256xf32, #tpu.memory_space<vmem>>, %arg3: memref<1x256xf32, #tpu.memory_space<vmem>>, %arg4: memref<256x128xf32, #tpu.memory_space<vmem>>, %arg5: memref<512x128xf32, #tpu.memory_space<vmem>>) attributes {dimension_semantics = [#tpu.dimension_semantics<parallel>], iteration_bounds = array<i64: 7>, scalar_prefetch = 0 : i64, scratch_operands = 0 : i64, tpu.core_type = #tpu.core_type<tc>, window_params = [{transform_indices = @transform_0, window_bounds = array<i64: 512, 256>}, {pipeline_mode = #tpu.pipeline_mode<synchronous>, transform_indices = @transform_1, window_bounds = array<i64: 1, 256>}, {pipeline_mode = #tpu.pipeline_mode<synchronous>, transform_indices = @transform_2, window_bounds = array<i64: 1, 256>}, {pipeline_mode = #tpu.pipeline_mode<synchronous>, transform_indices = @transform_3, window_bounds = array<i64: 256, 128>}, {transform_indices = @transform_4, window_bounds = array<i64: 512, 128>}]} {
    %c0 = arith.constant 0 : index
    %c0_0 = arith.constant 0 : index
    %0 = vector.load %arg1[%c0, %c0_0] : memref<512x256xf32, #tpu.memory_space<vmem>>, vector<512x256xf32>
    %c0_1 = arith.constant 0 : index
    %c0_2 = arith.constant 0 : index
    %1 = vector.load %arg2[%c0_1, %c0_2] : memref<1x256xf32, #tpu.memory_space<vmem>>, vector<1x256xf32>
    %2 = vector.broadcast %1 : vector<1x256xf32> to vector<512x256xf32>
    %3 = arith.mulf %0, %2 : vector<512x256xf32>
    %c0_3 = arith.constant 0 : index
    %c0_4 = arith.constant 0 : index
    %4 = vector.load %arg3[%c0_3, %c0_4] : memref<1x256xf32, #tpu.memory_space<vmem>>, vector<1x256xf32>
    %5 = vector.broadcast %4 : vector<1x256xf32> to vector<512x256xf32>
    %6 = arith.addf %3, %5 : vector<512x256xf32>
    %cst = arith.constant 0.000000e+00 : f32
    %7 = vector.broadcast %cst : f32 to vector<512x256xf32>
    %8 = arith.maximumf %6, %7 : vector<512x256xf32>
    %c0_5 = arith.constant 0 : index
    %c0_6 = arith.constant 0 : index
    %9 = vector.load %arg4[%c0_5, %c0_6] : memref<256x128xf32, #tpu.memory_space<vmem>>, vector<256x128xf32>
    %cst_7 = arith.constant dense<0.000000e+00> : vector<512x128xf32>
    %10 = tpu.matmul %8, %9, %cst_7 {dimension_numbers = #tpu.dot_dimension_numbers<[1], [0], [0], [1], [0, 0, 1, 1], [], []>} : vector<512x256xf32>, vector<256x128xf32>, vector<512x128xf32> -> vector<512x128xf32>
    %c0_8 = arith.constant 0 : index
    %c0_9 = arith.constant 0 : index
    %11 = vector.load %arg5[%c0_8, %c0_9] : memref<512x128xf32, #tpu.memory_space<vmem>>, vector<512x128xf32>
    tpu.vector_store %arg5[%c0_8, %c0_9], %10 {strides = array<i32>} : memref<512x128xf32, #tpu.memory_space<vmem>>, vector<512x128xf32>,
    return
  }
  func.func @transform_0(%arg0: i32) -> (i32, i32) {
    %c0_i32 = arith.constant 0 : i32
    %c0_i32_0 = arith.constant 0 : i32
    return %arg0, %c0_i32 : i32, i32
  }
  func.func @transform_1(%arg0: i32) -> (i32, i32) {
    %c0_i32 = arith.constant 0 : i32
    %c0_i32_0 = arith.constant 0 : i32
    %c0_i32_1 = arith.constant 0 : i32
    return %c0_i32, %c0_i32_0 : i32, i32
  }
  func.func @transform_2(%arg0: i32) -> (i32, i32) {
    %c0_i32 = arith.constant 0 : i32
    %c0_i32_0 = arith.constant 0 : i32
    %c0_i32_1 = arith.constant 0 : i32
    return %c0_i32, %c0_i32_0 : i32, i32
  }
  func.func @transform_3(%arg0: i32) -> (i32, i32) {
    %c0_i32 = arith.constant 0 : i32
    %c0_i32_0 = arith.constant 0 : i32
    %c0_i32_1 = arith.constant 0 : i32
    return %c0_i32, %c0_i32_0 : i32, i32
  }
  func.func @transform_4(%arg0: i32) -> (i32, i32) {
    %c0_i32 = arith.constant 0 : i32
    %c0_i32_0 = arith.constant 0 : i32
    return %arg0, %c0_i32 : i32, i32
  }
}

</mosaic_0001>

<bundles_post_ra>
// kernel: tile.28
= control target key start
LH: loop header
LB: loop body
LE: loop exit
PB: predicated region body
PF: predicated region fallthrough
CT: control target
= control target key end

     0   :  { %s40_s0 = inlined_call_operand.vmem [shape: f32[4], index: 0, kind: input, shape index: {}]   ;;  %s41_s1 = inlined_call_operand.vmem [shape: f32[27,4], index: 1, kind: output, shape index: {}]  }
   0x1   :  { %v4_v0 = vld [vmem:[%s40_s0] ss:$0 sm:$0xff] }
   0x2   :  { %5 = vst [vmem:[%s41_s1] sm:$0xff] %v4_v0  ;;  %12 = vst [vmem:[%s41_s1 + $0x8] sm:$0xff] %v4_v0 }
   0x3   :  { %13 = vst [vmem:[%s41_s1 + $0x10] sm:$0xff] %v4_v0  ;;  %14 = vst [vmem:[%s41_s1 + $0x18] sm:$0xff] %v4_v0 }

// kernel: tile.29
= control target key start
LH: loop header
LB: loop body
LE: loop exit
PB: predicated region body
PF: predicated region fallthrough
CT: control target
= control target key end

     0   :  { %s219_s10 = smov 104   ;;  %s220_s11 = smov 96   ;;  %vm3_vm0 = vcmask 31744   ;;  %vm9_vm1 = vcmask 884544   ;;  %vm15_vm2 = vcmask 851744   ;;  %vm21_vm3 = vcmask 818944   ;;  %s339_s0 = inlined_call_operand.vmem [shape: f32[27,4], index: 0, kind: input, shape index: {}]   ;;  %s340_s1 = inlined_call_operand.vmem [shape: f32[108], index: 1, kind: output, shape index: {}]  }
   0x1   :  { %v167_v0 = vld [vmem:[%s339_s0 + $0x1a] sm:$0x1]   ;;  %v169_v1 = vld [vmem:[%s339_s0 + $0x18] sm:$0x1]   ;;  %v168_v2 = vld [vmem:[%s339_s0 + $0x19] sm:$0x1]  }
   0x2   :  { %7 = vrot.lane.b32.xlu0 %v167_v0, %s219_s10  ;;  %19 = vrot.lane.b32.xlu1 %v169_v1, %s220_s11  ;;  %v170_v3 = vld [vmem:[%s339_s0 + $0x17] sm:$0x1]   ;;  %s221_s16 = smov 100   ;;  %s222_s17 = smov 92   ;;  %v171_v4 = vld [vmem:[%s339_s0 + $0x16] sm:$0x1]  }
   0x3   :  { %v172_v5 = vld [vmem:[%s339_s0 + $0x15] sm:$0x1]   ;;  %s223_s22 = smov 88   ;;  %s224_s23 = smov 84   ;;  %v173_v6 = vld [vmem:[%s339_s0 + $0x14] sm:$0x1]  }
   0x4   :  { %v174_v7 = vld [vmem:[%s339_s0 + $0x13] sm:$0x1]   ;;  %s225_s28 = smov 80   ;;  %s226_s29 = smov 76   ;;  %v2_v8 = vld [vmem:[%s339_s0] sm:$0x1]  }
   0x5   :  { %v175_v9 = vld [vmem:[%s339_s0 + $0x12] sm:$0x1]   ;;  %v176_v10 = vld [vmem:[%s339_s0 + $0x11] sm:$0x1]   ;;  %4 = vst.msk [vmem:[#allocation0] sm:$0x1] %vm3_vm0, %v2_v8  }
   0x6   :  { %13 = vrot.lane.b32.xlu0 %v168_v2, %s221_s16  ;;  %25 = vrot.lane.b32.xlu1 %v170_v3, %s222_s17  ;;  %s227_s7 = smov 72   ;;  %s228_s8 = smov 68   ;;  %v177_v11 = vld [vmem:[%s339_s0 + $0x10] sm:$0x1]   ;;  %v178_v12 = vld [vmem:[%s339_s0 + $0xf] sm:$0x1]  }
   0x7   :  { %s229_s13 = smov 64   ;;  %s230_s14 = smov 60   ;;  %v179_v13 = vld [vmem:[%s339_s0 + $0xe] sm:$0x1]   ;;  %v180_v14 = vld [vmem:[%s339_s0 + $0xd] sm:$0x1]  }
   0x8   :  { %s231_s19 = smov 56   ;;  %s232_s20 = smov 52   ;;  %v181_v15 = vld [vmem:[%s339_s0 + $0xc] sm:$0x1]   ;;  %v182_v16 = vld [vmem:[%s339_s0 + $0xb] sm:$0x1]  }
   0x9   :  { %s233_s25 = smov 48   ;;  %s234_s26 = smov 44   ;;  %v183_v17 = vld [vmem:[%s339_s0 + $0xa] sm:$0x1]   ;;  %v184_v18 = vld [vmem:[%s339_s0 + $0x9] sm:$0x1]  }
   0xa   :  { %31 = vrot.lane.b32.xlu0 %v171_v4, %s223_s22  ;;  %37 = vrot.lane.b32.xlu1 %v172_v5, %s224_s23  ;;  %s235_s2 = smov 40   ;;  %s236_s3 = smov 36   ;;  %v185_v19 = vld [vmem:[%s339_s0 + $0x8] sm:$0x1]   ;;  %v186_v20 = vld [vmem:[%s339_s0 + $0x7] sm:$0x1]  }
   0xb   :  { %s238_s9 = smov 28   ;;  %v187_v21 = vld [vmem:[%s339_s0 + $0x6] sm:$0x1]   ;;  %v188_v22 = vld [vmem:[%s339_s0 + $0x5] sm:$0x1]   ;;  %s240_s15 = smov 20  }
   0xc   :  { %v189_v23 = vld [vmem:[%s339_s0 + $0x4] sm:$0x1]   ;;  %v190_v24 = vld [vmem:[%s339_s0 + $0x3] sm:$0x1]   ;;  %s242_s21 = smov 12   ;;  %vm27_vm4 = vcmask 786144  }
   0xd   :  { %v191_v25 = vld [vmem:[%s339_s0 + $0x2] sm:$0x1]   ;;  %v192_v26 = vld [vmem:[%s339_s0 + $0x1] sm:$0x1]   ;;  %s243_s0 = smov 8   ;;  %vm33_vm5 = vcmask 753344  }
   0xe   :  { %43 = vrot.lane.b32.xlu0 %v173_v6, %s225_s28  ;;  %49 = vrot.lane.b32.xlu1 %v174_v7, %s226_s29  ;;  %vm39_vm6 = vcmask 720544   ;;  %vm45_vm7 = vcmask 687744   ;;  %vm51_vm8 = vcmask 654944   ;;  %vm57_vm9 = vcmask 622144  }
   0xf   :  { %vm63_vm10 = vcmask 589344   ;;  %vm69_vm11 = vcmask 556544   ;;  %vm75_vm12 = vcmask 523744   ;;  %vm81_vm13 = vcmask 490944  }
  0x10   :  { %vm87_vm14 = vcmask 458144   ;;  %vm93_vm15 = vcmask 425344   ;;  %vm99_vm0 = vcmask 392544  }
  0x12   :  { %55 = vrot.lane.b32.xlu0 %v175_v9, %s227_s7  ;;  %61 = vrot.lane.b32.xlu1 %v176_v10, %s228_s8  ;;  %s237_s8 = smov 32  }
  0x16   :  { %67 = vrot.lane.b32.xlu0 %v177_v11, %s229_s13  ;;  %73 = vrot.lane.b32.xlu1 %v178_v12, %s230_s14  ;;  %s239_s14 = smov 24  }
  0x1a   :  { %79 = vrot.lane.b32.xlu0 %v179_v13, %s231_s19  ;;  %85 = vrot.lane.b32.xlu1 %v180_v14, %s232_s20  ;;  %s241_s20 = smov 16  }
  0x1e   :  { %91 = vrot.lane.b32.xlu0 %v181_v15, %s233_s25  ;;  %97 = vrot.lane.b32.xlu1 %v182_v16, %s234_s26  ;;  %s244_s26 = smov 4  }
  0x22   :  { %103 = vrot.lane.b32.xlu0 %v183_v17, %s235_s2  ;;  %109 = vrot.lane.b32.xlu1 %v184_v18, %s236_s3 }
  0x26   :  { %115 = vrot.lane.b32.xlu0 %v185_v19, %s237_s8  ;;  %121 = vrot.lane.b32.xlu1 %v186_v20, %s238_s9 }
  0x2a   :  { %127 = vrot.lane.b32.xlu0 %v187_v21, %s239_s14  ;;  %133 = vrot.lane.b32.xlu1 %v188_v22, %s240_s15 }
  0x2e   :  { %139 = vrot.lane.b32.xlu0 %v189_v23, %s241_s20  ;;  %145 = vrot.lane.b32.xlu1 %v190_v24, %s242_s21 }
  0x32   :  { %151 = vrot.lane.b32.xlu0 %v191_v25, %s243_s0  ;;  %157 = vrot.lane.b32.xlu1 %v192_v26, %s244_s26 }
  0x74   :  { %v8_v27 = vpop.permute.xlu0 %7   ;;  %v20_v28 = vpop.permute.xlu1 %19  }
  0x75   :  { %10 = vst.msk [vmem:[#allocation0] sm:$0x1] %vm9_vm1, %v8_v27   ;;  %vm105_vm1 = vcmask 359744  }
  0x78   :  { %v14_v29 = vpop.permute.xlu0 %13   ;;  %v26_v30 = vpop.permute.xlu1 %25  }
  0x79   :  { %16 = vst.msk [vmem:[#allocation0] sm:$0x1] %vm15_vm2, %v14_v29   ;;  %vm111_vm2 = vcmask 326944  }
  0x7a   :  { %22 = vst.msk [vmem:[#allocation0] sm:$0x1] %vm21_vm3, %v20_v28   ;;  %vm117_vm3 = vcmask 294144  }
  0x7b   :  { %28 = vst.msk [vmem:[#allocation0] sm:$0x1] %vm27_vm4, %v26_v30   ;;  %vm123_vm4 = vcmask 261344  }
  0x7c   :  { %v32_v31 = vpop.permute.xlu0 %31   ;;  %v38_v32 = vpop.permute.xlu1 %37  }
  0x7d   :  { %34 = vst.msk [vmem:[#allocation0] sm:$0x1] %vm33_vm5, %v32_v31   ;;  %vm129_vm5 = vcmask 228544  }
  0x7e   :  { %40 = vst.msk [vmem:[#allocation0] sm:$0x1] %vm39_vm6, %v38_v32   ;;  %vm135_vm6 = vcmask 195744  }
  0x80   :  { %v44_v33 = vpop.permute.xlu0 %43   ;;  %v50_v34 = vpop.permute.xlu1 %49  }
  0x81   :  { %46 = vst.msk [vmem:[#allocation0] sm:$0x1] %vm45_vm7, %v44_v33   ;;  %vm141_vm7 = vcmask 162944  }
  0x82   :  { %52 = vst.msk [vmem:[#allocation0] sm:$0x1] %vm51_vm8, %v50_v34   ;;  %vm147_vm8 = vcmask 130144  }
  0x84   :  { %v56_v35 = vpop.permute.xlu0 %55   ;;  %v62_v36 = vpop.permute.xlu1 %61  }
  0x85   :  { %58 = vst.msk [vmem:[#allocation0] sm:$0x1] %vm57_vm9, %v56_v35   ;;  %vm153_vm9 = vcmask 97344  }
  0x86   :  { %64 = vst.msk [vmem:[#allocation0] sm:$0x1] %vm63_vm10, %v62_v36   ;;  %vm159_vm10 = vcmask 64544  }
  0x88   :  { %v68_v37 = vpop.permute.xlu0 %67   ;;  %v74_v38 = vpop.permute.xlu1 %73  }
  0x89   :  { %70 = vst.msk [vmem:[#allocation0] sm:$0x1] %vm69_vm11, %v68_v37  }
  0x8a   :  { %76 = vst.msk [vmem:[#allocation0] sm:$0x1] %vm75_vm12, %v74_v38  }
  0x8c   :  { %v80_v39 = vpop.permute.xlu0 %79   ;;  %v86_v40 = vpop.permute.xlu1 %85  }
  0x8d   :  { %82 = vst.msk [vmem:[#allocation0] sm:$0x1] %vm81_vm13, %v80_v39  }
  0x8e   :  { %88 = vst.msk [vmem:[#allocation0] sm:$0x1] %vm87_vm14, %v86_v40  }
  0x90   :  { %v92_v41 = vpop.permute.xlu0 %91   ;;  %v98_v42 = vpop.permute.xlu1 %97  }
  0x91   :  { %94 = vst.msk [vmem:[#allocation0] sm:$0x1] %vm93_vm15, %v92_v41  }
  0x92   :  { %100 = vst.msk [vmem:[#allocation0] sm:$0x1] %vm99_vm0, %v98_v42  }
  0x94   :  { %v104_v43 = vpop.permute.xlu0 %103   ;;  %v110_v44 = vpop.permute.xlu1 %109  }
  0x95   :  { %106 = vst.msk [vmem:[#allocation0] sm:$0x1] %vm105_vm1, %v104_v43  }
  0x96   :  { %112 = vst.msk [vmem:[#allocation0] sm:$0x1] %vm111_vm2, %v110_v44  }
  0x98   :  { %v116_v45 = vpop.permute.xlu0 %115   ;;  %v122_v46 = vpop.permute.xlu1 %121  }
  0x99   :  { %118 = vst.msk [vmem:[#allocation0] sm:$0x1] %vm117_vm3, %v116_v45  }
  0x9a   :  { %124 = vst.msk [vmem:[#allocation0] sm:$0x1] %vm123_vm4, %v122_v46  }
  0x9c   :  { %v128_v47 = vpop.permute.xlu0 %127   ;;  %v134_v48 = vpop.permute.xlu1 %133  }
  0x9d   :  { %130 = vst.msk [vmem:[#allocation0] sm:$0x1] %vm129_vm5, %v128_v47  }
  0x9e   :  { %136 = vst.msk [vmem:[#allocation0] sm:$0x1] %vm135_vm6, %v134_v48  }
  0xa0   :  { %v140_v49 = vpop.permute.xlu0 %139   ;;  %v146_v50 = vpop.permute.xlu1 %145  }
  0xa1   :  { %142 = vst.msk [vmem:[#allocation0] sm:$0x1] %vm141_vm7, %v140_v49  }
  0xa2   :  { %148 = vst.msk [vmem:[#allocation0] sm:$0x1] %vm147_vm8, %v146_v50  }
  0xa4   :  { %v152_v51 = vpop.permute.xlu0 %151   ;;  %v158_v52 = vpop.permute.xlu1 %157  }
  0xa5   :  { %154 = vst.msk [vmem:[#allocation0] sm:$0x1] %vm153_vm9, %v152_v51  }
  0xa6   :  { %160 = vst.msk [vmem:[#allocation0] sm:$0x1] %vm159_vm10, %v158_v52  }
  0xad   :  { %v164_v53 = vld [vmem:[#allocation0] sm:$0x1] }
  0xae   :  { %166 = vst [vmem:[%s340_s1] sm:$0x1] %v164_v53 }

// kernel: tile.33
= control target key start
LH: loop header
LB: loop body
LE: loop exit
PB: predicated region body
PF: predicated region fallthrough
CT: control target
= control target key end

     0   :  { %s40_s0 = inlined_call_operand.vmem [shape: f32[8], index: 0, kind: input, shape index: {}]   ;;  %s41_s1 = inlined_call_operand.vmem [shape: f32[27,8], index: 1, kind: output, shape index: {}]  }
   0x1   :  { %v4_v0 = vld [vmem:[%s40_s0] ss:$0 sm:$0xff] }
   0x2   :  { %5 = vst [vmem:[%s41_s1] sm:$0xff] %v4_v0  ;;  %12 = vst [vmem:[%s41_s1 + $0x8] sm:$0xff] %v4_v0 }
   0x3   :  { %13 = vst [vmem:[%s41_s1 + $0x10] sm:$0xff] %v4_v0  ;;  %14 = vst [vmem:[%s41_s1 + $0x18] sm:$0xff] %v4_v0 }

// kernel: tile.34
= control target key start
LH: loop header
LB: loop body
LE: loop exit
PB: predicated region body
PF: predicated region fallthrough
CT: control target
= control target key end

     0   :  { %s142_s10 = smov 120   ;;  %s143_s11 = smov 104   ;;  %vm4_vm0 = vcmask 64512   ;;  %vm10_vm1 = vcmask 1048512   ;;  %vm16_vm2 = vcmask 982912   ;;  %vm22_vm3 = vcmask 917312   ;;  %s218_s0 = inlined_call_operand.vmem [shape: f32[27,8], index: 0, kind: input, shape index: {}]   ;;  %s219_s1 = inlined_call_operand.vmem [shape: f32[216], index: 1, kind: output, shape index: {}]  }
   0x1   :  { %v112_v0 = vld [vmem:[%s218_s0 + $0xf] sm:$0x1]   ;;  %v114_v1 = vld [vmem:[%s218_s0 + $0xd] sm:$0x1]   ;;  %v113_v2 = vld [vmem:[%s218_s0 + $0xe] sm:$0x1]  }
   0x2   :  { %8 = vrot.lane.b32.xlu0 %v112_v0, %s142_s10  ;;  %20 = vrot.lane.b32.xlu1 %v114_v1, %s143_s11  ;;  %v115_v3 = vld [vmem:[%s218_s0 + $0xc] sm:$0x1]   ;;  %s37_s16 = smov 3  ;;  %s144_s17 = smov 112   ;;  %v116_v4 = vld [vmem:[%s218_s0 + $0xb] sm:$0x1]  }
   0x3   :  { %s145_s18 = smov 96   ;;  %v117_v5 = vld [vmem:[%s218_s0 + $0xa] ss:$16 sm:%s37_s16]   ;;  %s44_s23 = smov 3  ;;  %vm28_vm4 = vcmask 851712   ;;  %vm34_vm5 = vcmask 786112  }
   0x4   :  { %s51_s24 = smov 3  ;;  %s146_s25 = smov 88   ;;  %v118_v6 = vld [vmem:[%s218_s0 + $0x9] ss:$16 sm:%s44_s23]   ;;  %vm41_vm6 = vcmask 720512   ;;  %vm48_vm7 = vcmask 654912  }
   0x5   :  { %s147_s26 = smov 80   ;;  %v119_v7 = vld [vmem:[%s218_s0 + $0x8] ss:$16 sm:%s51_s24]   ;;  %s58_s2 = smov 3  ;;  %vm55_vm8 = vcmask 589312   ;;  %vm62_vm9 = vcmask 523712  }
   0x6   :  { %14 = vrot.lane.b32.xlu0 %v113_v2, %s144_s17  ;;  %26 = vrot.lane.b32.xlu1 %v115_v3, %s145_s18  ;;  %s65_s3 = smov 3  ;;  %s2_s4 = smov 3  ;;  %v120_v9 = vld [vmem:[%s218_s0 + $0x7] ss:$16 sm:%s58_s2]   ;;  %vm69_vm10 = vcmask 458112   ;;  %vm76_vm11 = vcmask 392512  }
   0x7   :  { %s148_s5 = smov 72   ;;  %s149_s6 = smov 64   ;;  %v3_v8 = vld [vmem:[%s218_s0] ss:$16 sm:%s2_s4]   ;;  %v121_v10 = vld [vmem:[%s218_s0 + $0x6] ss:$16 sm:%s65_s3]  }
   0x8   :  { %5 = vst.msk [vmem:[#allocation0] sm:$0x3] %vm4_vm0, %v3_v8   ;;  %s72_s13 = smov 3  ;;  %s79_s14 = smov 3  ;;  %vm83_vm12 = vcmask 326912   ;;  %vm90_vm13 = vcmask 261312  }
   0x9   :  { %s150_s15 = smov 56   ;;  %s151_s16 = smov 48   ;;  %v122_v11 = vld [vmem:[%s218_s0 + $0x5] ss:$16 sm:%s72_s13]   ;;  %v123_v12 = vld [vmem:[%s218_s0 + $0x4] ss:$16 sm:%s79_s14]  }
   0xa   :  { %32 = vrot.lane.b32.xlu0 %v116_v4, %s146_s25  ;;  %39 = vrot.lane.b32.xlu1 %v117_v5, %s147_s26  ;;  %s86_s21 = smov 3  ;;  %s93_s22 = smov 3  ;;  %vm97_vm14 = vcmask 195712   ;;  %vm104_vm15 = vcmask 130112  }
   0xb   :  { %s152_s23 = smov 40   ;;  %s153_s24 = smov 32   ;;  %v124_v13 = vld [vmem:[%s218_s0 + $0x3] ss:$16 sm:%s86_s21]   ;;  %v125_v14 = vld [vmem:[%s218_s0 + $0x2] ss:$16 sm:%s93_s22]  }
   0xc   :  { %s100_s29 = smov 3  ;;  %s154_s30 = smov 24  }
   0xd   :  { %s155_s2 = smov 16   ;;  %v126_v15 = vld [vmem:[%s218_s0 + $0x1] ss:$16 sm:%s100_s29]   ;;  %s156_s0 = smov 8  }
   0xe   :  { %46 = vrot.lane.b32.xlu0 %v118_v6, %s148_s5  ;;  %53 = vrot.lane.b32.xlu1 %v119_v7, %s149_s6 }
  0x12   :  { %60 = vrot.lane.b32.xlu0 %v120_v9, %s150_s15  ;;  %67 = vrot.lane.b32.xlu1 %v121_v10, %s151_s16 }
  0x16   :  { %74 = vrot.lane.b32.xlu0 %v122_v11, %s152_s23  ;;  %81 = vrot.lane.b32.xlu1 %v123_v12, %s153_s24 }
  0x1a   :  { %88 = vrot.lane.b32.xlu0 %v124_v13, %s154_s30  ;;  %95 = vrot.lane.b32.xlu1 %v125_v14, %s155_s2 }
  0x1e   :  { %102 = vrot.lane.b32.xlu0 %v126_v15, %s156_s0 }
  0x74   :  { %v9_v16 = vpop.permute.xlu0 %8   ;;  %v21_v17 = vpop.permute.xlu1 %20  }
  0x75   :  { %11 = vst.msk [vmem:[#allocation0] sm:$0x1] %vm10_vm1, %v9_v16  }
  0x78   :  { %v15_v18 = vpop.permute.xlu0 %14   ;;  %v27_v19 = vpop.permute.xlu1 %26  }
  0x79   :  { %17 = vst.msk [vmem:[#allocation0] sm:$0x1] %vm16_vm2, %v15_v18  }
  0x7a   :  { %23 = vst.msk [vmem:[#allocation0] sm:$0x1] %vm22_vm3, %v21_v17  }
  0x7b   :  { %29 = vst.msk [vmem:[#allocation0] sm:$0x1] %vm28_vm4, %v27_v19  }
  0x7c   :  { %v33_v20 = vpop.permute.xlu0 %32   ;;  %v40_v21 = vpop.permute.xlu1 %39  }
  0x7d   :  { %35 = vst.msk [vmem:[#allocation0] sm:$0x1] %vm34_vm5, %v33_v20  }
  0x7e   :  { %42 = vst.msk [vmem:[#allocation0] sm:$0x3] %vm41_vm6, %v40_v21  }
  0x80   :  { %v47_v22 = vpop.permute.xlu0 %46   ;;  %v54_v23 = vpop.permute.xlu1 %53  }
  0x81   :  { %49 = vst.msk [vmem:[#allocation0] sm:$0x3] %vm48_vm7, %v47_v22  }
  0x82   :  { %56 = vst.msk [vmem:[#allocation0] sm:$0x3] %vm55_vm8, %v54_v23  }
  0x84   :  { %v61_v24 = vpop.permute.xlu0 %60   ;;  %v68_v25 = vpop.permute.xlu1 %67  }
  0x85   :  { %63 = vst.msk [vmem:[#allocation0] sm:$0x3] %vm62_vm9, %v61_v24  }
  0x86   :  { %70 = vst.msk [vmem:[#allocation0] sm:$0x3] %vm69_vm10, %v68_v25  }
  0x88   :  { %v75_v26 = vpop.permute.xlu0 %74   ;;  %v82_v27 = vpop.permute.xlu1 %81  }
  0x89   :  { %77 = vst.msk [vmem:[#allocation0] sm:$0x3] %vm76_vm11, %v75_v26  }
  0x8a   :  { %84 = vst.msk [vmem:[#allocation0] sm:$0x3] %vm83_vm12, %v82_v27  }
  0x8c   :  { %v89_v28 = vpop.permute.xlu0 %88   ;;  %v96_v29 = vpop.permute.xlu1 %95  }
  0x8d   :  { %91 = vst.msk [vmem:[#allocation0] sm:$0x3] %vm90_vm13, %v89_v28  }
  0x8e   :  { %98 = vst.msk [vmem:[#allocation0] sm:$0x3] %vm97_vm14, %v96_v29  }
  0x90   :  { %v103_v30 = vpop.permute.xlu0 %102  }
  0x91   :  { %105 = vst.msk [vmem:[#allocation0] sm:$0x3] %vm104_vm15, %v103_v30  }
  0x98   :  { %v109_v31 = vld [vmem:[#allocation0] sm:$0x3] }
  0x99   :  { %111 = vst [vmem:[%s219_s1] sm:$0x3] %v109_v31 }

// kernel: block_forward.2
= control target key start
LH: loop header
LB: loop body
LE: loop exit
PB: predicated region body
PF: predicated region fallthrough
CT: control target
= control target key end

     0   :  { %s2577_s18 = smov 0   ;;  %s2579_s19 = smov 0   ;;  %s3566_s0 = inlined_call_operand.vmem [shape: f32[5488,128], index: 0, kind: input, shape index: {}]   ;;  %s3567_s1 = inlined_call_operand.vmem [shape: f32[1,128], index: 1, kind: input, shape index: {}]   ;;  %s3568_s2 = inlined_call_operand.vmem [shape: f32[1,128], index: 2, kind: input, shape index: {}]   ;;  %s3569_s3 = inlined_call_operand.vmem [shape: f32[128,128], index: 3, kind: input, shape index: {}]   ;;  %s3570_s4 = inlined_call_operand.vmem [shape: f32[5488,128], index: 4, kind: output, shape index: {0}]   ;;  %s3571_s5 = inlined_call_operand.vmem [shape: f32[11,8,128], index: 5, kind: output, shape index: {1}]  }
   0x1   :  { %s2581_s20 = smov 0  }
   0x2 LB: > { %s2590_s21 = sadd.s32 4294967295, %s2513_s20   ;;  %s2592_s22 = sadd.s32 1, %s2513_s20   ;;  %s2513_s20 = sphi %s2581_s20, %s3580_s20   ;;  %s2509_s19 = sphi %s2579_s19, %s3579_s19   ;;  %s2505_s18 = sphi %s2577_s18, %s3578_s18  }
   0x3   : > { %s109_s23 = ssub.s32 %s2513_s20, %s2592_s22  ;;  %s112_s24 = sadd.s32 1, %s2509_s19 }
   0x4   : > { %p110_p0 = scmp.eq.s32.totalorder %s109_s23, 0  ;;  %p122_p1 = scmp.ne.s32.totalorder %s2509_s19, %s2505_s18 }
   0x5   : > { %p123_p2 = scmp.eq.s32.totalorder %s2590_s21, 10  ;;  %p2087_p3 = scmp.ge.s32.totalorder %s2513_s20, 1 }
   0x6   : > { %s2600_s25 = scalar_select %p110_p0, %s2509_s19, %s112_s24  }
   0x7   : > { %p2602_p4 = por %p123_p2, %p122_p1  ;;  %p199_p5 = scmp.lt.s32.totalorder %s2513_s20, 12 }
   0x9   : > { %p200_p6 = pnand %p2087_p3, %p199_p5 }
   0xa   : > { %v527_v0 = vld [vmem:[%s3569_s3] sm:$0xff] (!%p200_p6)  ;;  %v528_v1 = vld [vmem:[%s3569_s3 + $0x8] sm:$0xff] (!%p200_p6)  ;;  %v529_v2 = vld [vmem:[%s3569_s3 + $0x10] sm:$0xff] (!%p200_p6)  ;;  %s2616_s8 = sshll.u32 (!%p200_p6), %s2590_s21, 6  ;;  %s225_s9 = sand.u32 (!%p200_p6), 1, %s2505_s18  }
   0xb   : > { %203 = sbr.rel (%p200_p6) target bundleno = 476 (0x1dc), region = 36  ;;  %v2323_v3 = vpack.c.bf16 (!%p200_p6), %v528_v1, %v527_v0  ;;  %v530_v4 = vld [vmem:[%s3569_s3 + $0x18] sm:$0xff] (!%p200_p6)  ;;  %p239_p7 = scmp.lt.s32.totalorder (!%p200_p6), %s2616_s8, 685  ;;  %v531_v6 = vld [vmem:[%s3569_s3 + $0x20] sm:$0xff] (!%p200_p6)  ;;  %v532_v7 = vld [vmem:[%s3569_s3 + $0x28] sm:$0xff] (!%p200_p6) }
   0xc   : > { %v2327_v5 = vpack.c.bf16 (!%p200_p6), %v530_v4, %v529_v2  ;;  %v2331_v8 = vpack.c.bf16 (!%p200_p6), %v532_v7, %v531_v6  ;;  %v2632_v9 = vld [vmem:[%s3567_s1] ss:$0 sm:$0xff] (!%p200_p6)  ;;  %v533_v10 = vld [vmem:[%s3569_s3 + $0x30] sm:$0xff] (!%p200_p6)  ;;  %v534_v11 = vld [vmem:[%s3569_s3 + $0x38] sm:$0xff] (!%p200_p6)  ;;  %s2088_s10 = sshll.u32 (!%p200_p6), %s225_s9, 9  ;;  %p253_p8 = scmp.lt.s32.totalorder (!%p200_p6), %s2590_s21, 10 }
   0xd   : > { %2324 = vmatprep.subr.bf16.mxu0 (!%p200_p6), %v2323_v3  ;;  %2355 = vmatprep.subr.bf16.mxu1 (!%p200_p6), %v2323_v3  ;;  %v2649_v13 = vld [vmem:[%s3568_s2] ss:$0 sm:$0xff] (!%p200_p6)  ;;  %v2335_v15 = vpack.c.bf16 (!%p200_p6), %v534_v11, %v533_v10  ;;  %v536_v17 = vld [vmem:[%s3569_s3 + $0x48] sm:$0xff] (!%p200_p6)  ;;  %v537_v21 = vld [vmem:[%s3569_s3 + $0x50] sm:$0xff] (!%p200_p6)  ;;  %s3003_s18 = scalar_lea.vmem (!%p200_p6), [#allocation2], %s2088_s10  }
   0xe   : > { %2326 = vmatpush3.bf16.msra.mxu0 (!%p200_p6), %v2323_v3  ;;  %2363 = vmatpush3.bf16.msra.mxu1 (!%p200_p6), %v2323_v3  ;;  %v535_v16 = vld [vmem:[%s3569_s3 + $0x40] sm:$0xff] (!%p200_p6)  ;;  %v538_v22 = vld [vmem:[%s3569_s3 + $0x58] sm:$0xff] (!%p200_p6)  ;;  %v540_v25 = vld [vmem:[%s3569_s3 + $0x68] sm:$0xff] (!%p200_p6) }
   0xf   : > { %2328 = vmatprep.subr.bf16.mxu0 (!%p200_p6), %v2327_v5  ;;  %2356 = vmatprep.subr.bf16.mxu1 (!%p200_p6), %v2327_v5  ;;  %v2339_v20 = vpack.c.bf16 (!%p200_p6), %v536_v17, %v535_v16  ;;  %v2343_v23 = vpack.c.bf16 (!%p200_p6), %v538_v22, %v537_v21  ;;  %v539_v24 = vld [vmem:[%s3569_s3 + $0x60] sm:$0xff] (!%p200_p6)  ;;  %v541_v32 = vld [vmem:[%s3569_s3 + $0x70] sm:$0xff] (!%p200_p6)  ;;  %v542_v33 = vld [vmem:[%s3569_s3 + $0x78] sm:$0xff] (!%p200_p6) }
  0x10   : > { %v2347_v31 = vpack.c.bf16 (!%p200_p6), %v540_v25, %v539_v24  ;;  %v2692_v44 = vpack.c.bf16 (!%p200_p6), %v542_v33, %v541_v32 }
  0x12   : > { %s240_s15 = scalar_select %p239_p7, %s2616_s8, 685  ;;  %2330 = vmatpush3.bf16.msra.mxu0 %v2327_v5  ;;  %2364 = vmatpush3.bf16.msra.mxu1 %v2327_v5 }
  0x13   : > { %2332 = vmatprep.subr.bf16.mxu0 %v2331_v8  ;;  %2357 = vmatprep.subr.bf16.mxu1 %v2331_v8  ;;  %s254_s11 = scalar_select %p253_p8, %s2590_s21, 10 }
  0x14   : > { %s2090_s16 = sshll.u32 %s240_s15, 3 }
  0x15   : > { %s2643_s6 = scalar_lea.vmem %s3566_s0, %s2090_s16  ;;  %s2091_s12 = sshll.u32 %s254_s11, 3 }
  0x16   : > { %v257_v12 = vld [vmem:[%s2643_s6] sm:$0xff]  ;;  %2334 = vmatpush3.bf16.msra.mxu0 %v2331_v8  ;;  %2365 = vmatpush3.bf16.msra.mxu1 %v2331_v8  ;;  %v258_v26 = vld [vmem:[%s2643_s6 + $0x8] sm:$0xff]  ;;  %v259_v27 = vld [vmem:[%s2643_s6 + $0x10] sm:$0xff]  ;;  %s256_s15 = scalar_lea.vmem %s3571_s5, %s2091_s12  ;;  %s1598_s16 = ssub.s32 (%p2602_p4), 686, %s2616_s8 }
  0x17   : > { %v328_v14 = vmul.f32 %v2632_v9, %v257_v12  ;;  %2336 = vmatprep.subr.bf16.mxu0 %v2335_v15  ;;  %2358 = vmatprep.subr.bf16.mxu1 %v2335_v15  ;;  %v260_v28 = vld [vmem:[%s2643_s6 + $0x18] sm:$0xff]  ;;  %v261_v29 = vld [vmem:[%s2643_s6 + $0x20] sm:$0xff]  ;;  %v329_v34 = vmul.f32 %v2632_v9, %v258_v26  ;;  %v330_v35 = vmul.f32 %v2632_v9, %v259_v27  ;;  %v262_v36 = vld [vmem:[%s2643_s6 + $0x28] sm:$0xff]  ;;  %p1599_p9 = scmp.lt.s32.totalorder (%p2602_p4), %s1598_s16, 64 }
  0x18   : > { %v280_v30 = vld [vmem:[%s2643_s6 + $0xb8] sm:$0xff]  ;;  %v331_v37 = vmul.f32 %v2632_v9, %v260_v28  ;;  %v263_v38 = vld [vmem:[%s2643_s6 + $0x30] sm:$0xff]  ;;  %v332_v39 = vmul.f32 %v2632_v9, %v261_v29  ;;  %v281_v41 = vld [vmem:[%s2643_s6 + $0xc0] sm:$0xff]  ;;  %v333_v45 = vmul.f32 %v2632_v9, %v262_v36 }
  0x19   : > { %v399_v18 = vadd.f32 %v2649_v13, %v328_v14  ;;  %v351_v40 = vmul.f32 %v2632_v9, %v280_v30  ;;  %v282_v42 = vld [vmem:[%s2643_s6 + $0xc8] sm:$0xff]  ;;  %v283_v43 = vld [vmem:[%s2643_s6 + $0xd0] sm:$0xff]  ;;  %v284_v46 = vld [vmem:[%s2643_s6 + $0xd8] sm:$0xff]  ;;  %v400_v49 = vadd.f32 %v2649_v13, %v329_v34  ;;  %v2700_v50 = vadd.f32 %v2649_v13, %v330_v35 }
  0x1a   : > { %2338 = vmatpush3.bf16.msra.mxu0 %v2335_v15  ;;  %2366 = vmatpush3.bf16.msra.mxu1 %v2335_v15  ;;  %v285_v47 = vld [vmem:[%s2643_s6 + $0xe0] sm:$0xff]  ;;  %v286_v48 = vld [vmem:[%s2643_s6 + $0xe8] sm:$0xff]  ;;  %v334_v51 = vmul.f32 %v2632_v9, %v263_v38  ;;  %v287_v53 = vld [vmem:[%s2643_s6 + $0xf0] sm:$0xff]  ;;  %v2708_v54 = vadd.f32 %v2649_v13, %v331_v37  ;;  %v352_v55 = vmul.f32 %v2632_v9, %v281_v41 }
  0x1b   : > { %v463_v19 = vmax.f32 %v399_v18, 0.0  ;;  %2340 = vmatprep.subr.bf16.mxu0 %v2339_v20  ;;  %2359 = vmatprep.subr.bf16.mxu1 %v2339_v20  ;;  %v2704_v52 = vadd.f32 %v2649_v13, %v351_v40  ;;  %v353_v56 = vmul.f32 %v2632_v9, %v282_v42  ;;  %v354_v57 = vmul.f32 %v2632_v9, %v283_v43  ;;  %v288_v58 = vld [vmem:[%s2643_s6 + $0xf8] sm:$0xff]  ;;  %v289_v8 = vld [vmem:[%s2643_s6 + $0x100] sm:$0xff]  ;;  %v290_v10 = vld [vmem:[%s2643_s6 + $0x108] sm:$0xff] }
  0x1c   : > { %v2715_v59 = vadd.f32 %v2649_v13, %v332_v39  ;;  %v264_v60 = vld [vmem:[%s2643_s6 + $0x38] sm:$0xff]  ;;  %v355_v61 = vmul.f32 %v2632_v9, %v284_v46  ;;  %v356_v62 = vmul.f32 %v2632_v9, %v285_v47  ;;  %v357_v63 = vmul.f32 %v2632_v9, %v286_v48  ;;  %v291_v11 = vld [vmem:[%s2643_s6 + $0x110] sm:$0xff]  ;;  %v265_v15 = vld [vmem:[%s2643_s6 + $0x40] sm:$0xff] }
  0x1d   : > { %2227 = vmatprep.mubr.f32.mxu0 %v463_v19  ;;  %v2722_v0 = vadd.f32 %v2649_v13, %v352_v55  ;;  %v2725_v1 = vadd.f32 %v2649_v13, %v353_v56  ;;  %v2728_v2 = vadd.f32 %v2649_v13, %v354_v57  ;;  %v358_v3 = vmul.f32 %v2632_v9, %v287_v53  ;;  %v292_v17 = vld [vmem:[%s2643_s6 + $0x118] sm:$0xff]  ;;  %v293_v18 = vld [vmem:[%s2643_s6 + $0x120] sm:$0xff]  ;;  %v266_v22 = vld [vmem:[%s2643_s6 + $0x48] sm:$0xff] }
  0x1e   : > { %2342 = vmatpush3.bf16.msra.mxu0 %v2339_v20  ;;  %2367 = vmatpush3.bf16.msra.mxu1 %v2339_v20  ;;  %v2733_v4 = vadd.f32 %v2649_v13, %v355_v61  ;;  %v2736_v5 = vadd.f32 %v2649_v13, %v356_v62  ;;  %v2739_v6 = vadd.f32 %v2649_v13, %v357_v63  ;;  %v464_v19 = vmax.f32 %v400_v49, 0.0  ;;  %v267_v25 = vld [vmem:[%s2643_s6 + $0x50] sm:$0xff]  ;;  %v294_v29 = vld [vmem:[%s2643_s6 + $0x128] sm:$0xff]  ;;  %v268_v36 = vld [vmem:[%s2643_s6 + $0x58] sm:$0xff] }
  0x1f   : > { %2344 = vmatprep.subr.bf16.mxu0 %v2343_v23  ;;  %2360 = vmatprep.subr.bf16.mxu1 %v2343_v23  ;;  %v359_v7 = vmul.f32 %v2632_v9, %v288_v58  ;;  %v2746_v12 = vadd.f32 %v2649_v13, %v333_v45  ;;  %v335_v14 = vmul.f32 %v2632_v9, %v264_v60  ;;  %v465_v20 = vmax.f32 %v2700_v50, 0.0  ;;  %v295_v30 = vld [vmem:[%s2643_s6 + $0x130] sm:$0xff]  ;;  %v269_v37 = vld [vmem:[%s2643_s6 + $0x60] sm:$0xff]  ;;  %v270_v42 = vld [vmem:[%s2643_s6 + $0x68] sm:$0xff] }
  0x20   : > { %v2751_v16 = vadd.f32 %v2649_v13, %v358_v3  ;;  %v2757_v21 = vadd.f32 %v2649_v13, %v334_v51  ;;  %v466_v24 = vmax.f32 %v2708_v54, 0.0  ;;  %v360_v26 = vmul.f32 %v2632_v9, %v289_v8  ;;  %v271_v43 = vld [vmem:[%s2643_s6 + $0x70] sm:$0xff]  ;;  %v296_v51 = vld [vmem:[%s2643_s6 + $0x138] sm:$0xff]  ;;  %v297_v57 = vld [vmem:[%s2643_s6 + $0x140] sm:$0xff] }
  0x21   : > { %v361_v27 = vmul.f32 %v2632_v9, %v290_v10  ;;  %v362_v28 = vmul.f32 %v2632_v9, %v291_v11  ;;  %v336_v32 = vmul.f32 %v2632_v9, %v265_v15  ;;  %v363_v33 = vmul.f32 %v2632_v9, %v292_v17  ;;  %v272_v63 = vld [vmem:[%s2643_s6 + $0x78] sm:$0xff]  ;;  %v298_v15 = vld [vmem:[%s2643_s6 + $0x148] sm:$0xff] }
  0x22   : > { %2346 = vmatpush3.bf16.msra.mxu0 %v2343_v23  ;;  %2368 = vmatpush3.bf16.msra.mxu1 %v2343_v23  ;;  %v2762_v23 = vadd.f32 %v2649_v13, %v359_v7  ;;  %v364_v34 = vmul.f32 %v2632_v9, %v293_v18  ;;  %v337_v35 = vmul.f32 %v2632_v9, %v266_v22  ;;  %v468_v53 = vmax.f32 %v2746_v12, 0.0 }
  0x23   : > { %2348 = vmatprep.subr.bf16.mxu0 %v2347_v31  ;;  %2361 = vmatprep.subr.bf16.mxu1 %v2347_v31  ;;  %v431_v38 = vadd.f32 %v2649_v13, %v360_v26  ;;  %v432_v39 = vadd.f32 %v2649_v13, %v361_v27  ;;  %v433_v40 = vadd.f32 %v2649_v13, %v362_v28  ;;  %v469_v58 = vmax.f32 %v2757_v21, 0.0  ;;  %v300_v26 = vld [vmem:[%s2643_s6 + $0x158] sm:$0xff]  ;;  %v301_v27 = vld [vmem:[%s2643_s6 + $0x160] sm:$0xff] }
  0x24   : > { %v338_v41 = vmul.f32 %v2632_v9, %v267_v25  ;;  %v434_v45 = vadd.f32 %v2649_v13, %v363_v33  ;;  %v365_v46 = vmul.f32 %v2632_v9, %v294_v29  ;;  %v366_v47 = vmul.f32 %v2632_v9, %v295_v30 }
  0x25   : > { %v496_v48 = vmax.f32 %v432_v39, 0.0  ;;  %v497_v49 = vmax.f32 %v433_v40, 0.0  ;;  %v435_v50 = vadd.f32 %v2649_v13, %v364_v34  ;;  %v406_v54 = vadd.f32 %v2649_v13, %v335_v14  ;;  %v273_v34 = vld [vmem:[%s2643_s6 + $0x80] sm:$0xff] }
  0x26   : > { %2350 = vmatpush3.bf16.msra.mxu0 %v2347_v31  ;;  %2369 = vmatpush3.bf16.msra.mxu1 %v2347_v31  ;;  %v467_v31 = vmax.f32 %v2715_v59, 0.0  ;;  %v339_v55 = vmul.f32 %v2632_v9, %v268_v36  ;;  %v340_v56 = vmul.f32 %v2632_v9, %v269_v37  ;;  %v2798_v59 = vadd.f32 %v2649_v13, %v336_v32  ;;  %v310_v32 = vld [vmem:[%s2643_s6 + $0x1a8] sm:$0xff] }
  0x27   : > { %2352 = vmatprep.subr.bf16.mxu0 %v2692_v44  ;;  %2362 = vmatprep.subr.bf16.mxu1 %v2692_v44  ;;  %v341_v60 = vmul.f32 %v2632_v9, %v270_v42  ;;  %v342_v61 = vmul.f32 %v2632_v9, %v271_v43  ;;  %v2803_v62 = vadd.f32 %v2649_v13, %v337_v35  ;;  %v498_v3 = vmax.f32 %v434_v45, 0.0  ;;  %v274_v35 = vld [vmem:[%s2643_s6 + $0x88] sm:$0xff]  ;;  %v311_v43 = vld [vmem:[%s2643_s6 + $0x1b0] sm:$0xff] }
  0x28   : > { %v436_v7 = vadd.f32 %v2649_v13, %v365_v46  ;;  %v367_v8 = vmul.f32 %v2632_v9, %v296_v51  ;;  %v2809_v10 = vadd.f32 %v2649_v13, %v338_v41  ;;  %v499_v11 = vmax.f32 %v435_v50, 0.0 }
  0x29   : > { %v437_v12 = vadd.f32 %v2649_v13, %v366_v47  ;;  %v368_v14 = vmul.f32 %v2632_v9, %v297_v57  ;;  %v470_v17 = vmax.f32 %v406_v54, 0.0  ;;  %v2815_v18 = vadd.f32 %v2649_v13, %v339_v55  ;;  %v303_v55 = vld [vmem:[%s2643_s6 + $0x170] sm:$0xff]  ;;  %v314_v57 = vld [vmem:[%s2643_s6 + $0x1c8] sm:$0xff] }
  0x2a   : > { %2354 = vmatpush3.bf16.msra.mxu0 %v2692_v44  ;;  %2370 = vmatpush3.bf16.msra.mxu1 %v2692_v44  ;;  %v495_v44 = vmax.f32 %v431_v38, 0.0  ;;  %v471_v21 = vmax.f32 %v2798_v59, 0.0  ;;  %v2823_v22 = vadd.f32 %v2649_v13, %v341_v60  ;;  %v343_v25 = vmul.f32 %v2632_v9, %v272_v63  ;;  %v316_v63 = vld [vmem:[%s2643_s6 + $0x1d8] sm:$0xff] }
  0x2b   : > { %v472_v28 = vmax.f32 %v2803_v62, 0.0  ;;  %v500_v29 = vmax.f32 %v436_v7, 0.0  ;;  %v438_v30 = vadd.f32 %v2649_v13, %v367_v8  ;;  %v473_v33 = vmax.f32 %v2809_v10, 0.0  ;;  %v315_v62 = vld [vmem:[%s2643_s6 + $0x1d0] sm:$0xff] }
  0x2c   : > { %2275 = vmatprep.mubr.f32.mxu1 %v495_v44  ;;  %v501_v36 = vmax.f32 %v437_v12, 0.0  ;;  %v439_v37 = vadd.f32 %v2649_v13, %v368_v14  ;;  %v474_v39 = vmax.f32 %v2815_v18, 0.0  ;;  %v371_v41 = vmul.f32 %v2632_v9, %v300_v26  ;;  %v302_v44 = vld [vmem:[%s2643_s6 + $0x168] sm:$0xff]  ;;  %v275_v12 = vld [vmem:[%s2643_s6 + $0x90] sm:$0xff] }
  0x2d   : > { %2228 = vmatmul.mubr.f32.vlgmr.msra.gmra.mrb[0].mxu0 %v464_v19  ;;  %2276 = vmatmul.mubr.f32.vlgmr.msra.gmra.mrb[0].mxu1 %v496_v48  ;;  %v2818_v19 = vadd.f32 %v2649_v13, %v340_v56  ;;  %v372_v42 = vmul.f32 %v2632_v9, %v301_v27  ;;  %v476_v45 = vmax.f32 %v2823_v22, 0.0  ;;  %v2848_v47 = vadd.f32 %v2649_v13, %v343_v25  ;;  %v313_v56 = vld [vmem:[%s2643_s6 + $0x1c0] sm:$0xff] }
  0x2e   : > { %2230 = vmatprep.mubr.f32.mxu0 %v465_v20  ;;  %2278 = vmatprep.mubr.f32.mxu1 %v497_v49  ;;  %v299_v20 = vld [vmem:[%s2643_s6 + $0x150] sm:$0xff]  ;;  %v381_v48 = vmul.f32 %v2632_v9, %v310_v32  ;;  %v312_v49 = vld [vmem:[%s2643_s6 + $0x1b8] sm:$0xff]  ;;  %v344_v50 = vmul.f32 %v2632_v9, %v273_v34  ;;  %v2855_v51 = vmul.f32 %v2632_v9, %v274_v35 }
  0x2f   : > { %v370_v38 = vmul.f32 %v2632_v9, %v299_v20  ;;  %v475_v40 = vmax.f32 %v2818_v19, 0.0  ;;  %v2870_v7 = vadd.f32 %v2649_v13, %v372_v42  ;;  %v373_v8 = vmul.f32 %v2632_v9, %v302_v44  ;;  %v304_v32 = vld [vmem:[%s2643_s6 + $0x178] sm:$0xff] }
  0x30   : > { %v2863_v60 = vadd.f32 %v2649_v13, %v381_v48  ;;  %v383_v10 = vmul.f32 %v2632_v9, %v312_v49  ;;  %v374_v14 = vmul.f32 %v2632_v9, %v303_v55  ;;  %v385_v20 = vmul.f32 %v2632_v9, %v314_v57 }
  0x31   : > { %2231 = vmatmul.mubr.f32.gmra.mrb[2].mxu0 %v466_v24  ;;  %v2826_v24 = vadd.f32 %v2649_v13, %v342_v61  ;;  %2279 = vmatmul.mubr.f32.gmra.mrb[2].mxu1 %v498_v3  ;;  %v441_v59 = vadd.f32 %v2649_v13, %v370_v38  ;;  %v382_v61 = vmul.f32 %v2632_v9, %v311_v43  ;;  %v305_v38 = vld [vmem:[%s2643_s6 + $0x180] sm:$0xff]  ;;  %v507_v18 = vmax.f32 %v2870_v7, 0.0 }
  0x32   : > { %2233 = vmatprep.mubr.f32.mxu0 %v467_v31  ;;  %v369_v31 = vmul.f32 %v2632_v9, %v298_v15  ;;  %2281 = vmatprep.mubr.f32.mxu1 %v499_v11  ;;  %v442_v3 = vadd.f32 %v2649_v13, %v371_v41  ;;  %v317_v11 = vld [vmem:[%s2643_s6 + $0x1e0] sm:$0xff]  ;;  %v2884_v26 = vadd.f32 %v2649_v13, %v383_v10  ;;  %v478_v19 = vmax.f32 %v2848_v47, 0.0  ;;  %v278_v10 = vld [vmem:[%s2643_s6 + $0xa8] sm:$0xff] }
  0x33   : > { %v477_v46 = vmax.f32 %v2826_v24, 0.0  ;;  %v2878_v15 = vadd.f32 %v2649_v13, %v382_v61  ;;  %v386_v27 = vmul.f32 %v2632_v9, %v315_v62  ;;  %v388_v35 = vmul.f32 %v2632_v9, %v317_v11  ;;  %v307_v62 = vld [vmem:[%s2643_s6 + $0x190] sm:$0xff] }
  0x34   : > { %v440_v54 = vadd.f32 %v2649_v13, %v369_v31  ;;  %v505_v31 = vmax.f32 %v441_v59, 0.0  ;;  %v415_v43 = vadd.f32 %v2649_v13, %v344_v50  ;;  %v444_v44 = vadd.f32 %v2649_v13, %v373_v8  ;;  %v306_v59 = vld [vmem:[%s2643_s6 + $0x188] sm:$0xff]  ;;  %v279_v11 = vld [vmem:[%s2643_s6 + $0xb0] sm:$0xff] }
  0x35   : > { %2234 = vmatmul.mubr.f32.gmra.mrb[4].mxu0 %v468_v53  ;;  %2282 = vmatmul.mubr.f32.gmra.mrb[4].mxu1 %v500_v29  ;;  %v502_v53 = vmax.f32 %v438_v30, 0.0  ;;  %v387_v29 = vmul.f32 %v2632_v9, %v316_v63  ;;  %v319_v30 = vld [vmem:[%s2643_s6 + $0x1f0] sm:$0xff]  ;;  %v2901_v41 = vadd.f32 %v2649_v13, %v386_v27  ;;  %v2910_v48 = vadd.f32 %v2649_v13, %v388_v35 }
  0x36   : > { %2236 = vmatprep.mubr.f32.mxu0 %v469_v58  ;;  %2284 = vmatprep.mubr.f32.mxu1 %v501_v36  ;;  %v503_v58 = vmax.f32 %v439_v37, 0.0  ;;  %v504_v25 = vmax.f32 %v440_v54, 0.0  ;;  %v320_v36 = vld [vmem:[%s2643_s6 + $0x1f8] sm:$0xff]  ;;  %v346_v37 = vmul.f32 %v2632_v9, %v275_v12  ;;  %v390_v49 = vmul.f32 %v2632_v9, %v319_v30  ;;  %v277_v54 = vld [vmem:[%s2643_s6 + $0xa0] sm:$0xff] }
  0x37   : > { %v506_v55 = vmax.f32 %v442_v3, 0.0  ;;  %v391_v57 = vmul.f32 %v2632_v9, %v320_v36  ;;  %v348_v7 = vmul.f32 %v2632_v9, %v277_v54  ;;  %v508_v12 = vmax.f32 %v444_v44, 0.0 }
  0x38   : > { %v2929_v61 = vadd.f32 %v2649_v13, %v390_v49  ;;  %v417_v8 = vadd.f32 %v2649_v13, %v346_v37  ;;  %v350_v30 = vmul.f32 %v2632_v9, %v279_v11 }
  0x39   : > { %2237 = vmatmul.mubr.f32.gmra.mrb[6].mxu0 %v470_v17  ;;  %v384_v17 = vmul.f32 %v2632_v9, %v313_v56  ;;  %2285 = vmatmul.mubr.f32.gmra.mrb[6].mxu1 %v502_v53  ;;  %v276_v53 = vld [vmem:[%s2643_s6 + $0x98] sm:$0xff]  ;;  %v375_v56 = vmul.f32 %v2632_v9, %v304_v32  ;;  %v2933_v63 = vadd.f32 %v2649_v13, %v391_v57 }
  0x3a   : > { %2239 = vmatprep.mubr.f32.mxu0 %v471_v21  ;;  %v318_v21 = vld [vmem:[%s2643_s6 + $0x1e8] sm:$0xff]  ;;  %2287 = vmatprep.mubr.f32.mxu1 %v503_v58  ;;  %v376_v58 = vmul.f32 %v2632_v9, %v305_v38  ;;  %v347_v3 = vmul.f32 %v2632_v9, %v276_v53  ;;  %v419_v27 = vadd.f32 %v2649_v13, %v348_v7  ;;  %v481_v35 = vmax.f32 %v417_v8, 0.0 }
  0x3b   : > { %v2891_v34 = vadd.f32 %v2649_v13, %v384_v17  ;;  %v389_v42 = vmul.f32 %v2632_v9, %v318_v21  ;;  %v446_v47 = vadd.f32 %v2649_v13, %v375_v56  ;;  %v309_v21 = vld [vmem:[%s2643_s6 + $0x1a0] sm:$0xff]  ;;  %v421_v54 = vadd.f32 %v2649_v13, %v350_v30 }
  0x3c   : > { %v447_v22 = vadd.f32 %v2649_v13, %v376_v58  ;;  %v380_v38 = vmul.f32 %v2632_v9, %v309_v21  ;;  %v483_v53 = vmax.f32 %v419_v27, 0.0  ;;  %v486_v58 = vmax.f32 %v2704_v52, 0.0 }
  0x3d   : > { %2240 = vmatmul.mubr.f32.gmra.mrb[8].mxu0 %v472_v28  ;;  %v2894_v28 = vadd.f32 %v2649_v13, %v385_v20  ;;  %2288 = vmatmul.mubr.f32.gmra.mrb[8].mxu1 %v504_v25  ;;  %v2919_v50 = vadd.f32 %v2649_v13, %v389_v42  ;;  %v308_v20 = vld [vmem:[%s2643_s6 + $0x198] sm:$0xff]  ;;  %v418_v25 = vadd.f32 %v2649_v13, %v347_v3  ;;  %v489_v3 = vmax.f32 %v2728_v2, 0.0  ;;  %s2094_s6 = sshll.u32 %s2590_s21, 9 }
  0x3e   : > { %2242 = vmatprep.mubr.f32.mxu0 %v473_v33  ;;  %v2904_v33 = vadd.f32 %v2649_v13, %v387_v29  ;;  %2290 = vmatprep.mubr.f32.mxu1 %v505_v31  ;;  %v349_v29 = vmul.f32 %v2632_v9, %v278_v10  ;;  %v379_v32 = vmul.f32 %v2632_v9, %v308_v20  ;;  %v511_v36 = vmax.f32 %v447_v22, 0.0  ;;  %s3367_s23 = scalar_lea.vmem (%p2602_p4), %s3570_s4, %s2094_s6  }
  0x3f   : > { %v482_v42 = vmax.f32 %v418_v25, 0.0  ;;  %v451_v56 = vadd.f32 %v2649_v13, %v380_v38  ;;  %v519_v52 = vmax.f32 %v2891_v34, 0.0  ;;  %v493_v34 = vmax.f32 %v2751_v16, 0.0 }
  0x40   : > { %v450_v49 = vadd.f32 %v2649_v13, %v379_v32  ;;  %v522_v2 = vmax.f32 %v2904_v33, 0.0  ;;  %v526_v16 = vmax.f32 %v2933_v63, 0.0 }
  0x41   : > { %2243 = vmatmul.mubr.f32.gmra.mrb[10].mxu0 %v474_v39  ;;  %v445_v39 = vadd.f32 %v2649_v13, %v374_v14  ;;  %2291 = vmatmul.mubr.f32.gmra.mrb[10].mxu1 %v506_v55  ;;  %v377_v14 = vmul.f32 %v2632_v9, %v306_v59  ;;  %v516_v59 = vmax.f32 %v2863_v60, 0.0  ;;  %v490_v60 = vmax.f32 %v2733_v4, 0.0 }
  0x42   : > { %2245 = vmatprep.mubr.f32.mxu0 %v475_v40  ;;  %v416_v40 = vadd.f32 %v2649_v13, %v2855_v51  ;;  %v479_v51 = vmax.f32 %v415_v43, 0.0  ;;  %2293 = vmatprep.mubr.f32.mxu1 %v507_v18  ;;  %v420_v43 = vadd.f32 %v2649_v13, %v349_v29  ;;  %v485_v18 = vmax.f32 %v421_v54, 0.0 }
  0x43   : > { %v509_v17 = vmax.f32 %v445_v39, 0.0  ;;  %v448_v31 = vadd.f32 %v2649_v13, %v377_v14  ;;  %v515_v39 = vmax.f32 %v451_v56, 0.0  ;;  %v523_v4 = vmax.f32 %v2910_v48, 0.0 }
  0x44   : > { %v480_v24 = vmax.f32 %v416_v40, 0.0  ;;  %v484_v57 = vmax.f32 %v420_v43, 0.0  ;;  %v518_v40 = vmax.f32 %v2884_v26, 0.0  ;;  %v492_v26 = vmax.f32 %v2739_v6, 0.0 }
  0x45   : > { %2246 = vmatmul.mubr.f32.gmra.mrb[12].mxu0 %v476_v45  ;;  %v378_v45 = vmul.f32 %v2632_v9, %v307_v62  ;;  %2294 = vmatmul.mubr.f32.gmra.mrb[12].mxu1 %v508_v12  ;;  %v512_v44 = vmax.f32 %v448_v31, 0.0  ;;  %v514_v9 = vmax.f32 %v450_v49, 0.0  ;;  %v487_v62 = vmax.f32 %v2722_v0, 0.0 }
  0x46   : > { %2248 = vmatprep.mubr.f32.mxu0 %v477_v46  ;;  %v510_v46 = vmax.f32 %v446_v47, 0.0  ;;  %2296 = vmatprep.mubr.f32.mxu1 %v509_v17  ;;  %v520_v0 = vmax.f32 %v2894_v28, 0.0  ;;  %v524_v28 = vmax.f32 %v2919_v50, 0.0  ;;  %v525_v6 = vmax.f32 %v2929_v61, 0.0 }
  0x47   : > { %v449_v37 = vadd.f32 %v2649_v13, %v378_v45  ;;  %v517_v13 = vmax.f32 %v2878_v15, 0.0  ;;  %v491_v15 = vmax.f32 %v2736_v5, 0.0  ;;  %v494_v5 = vmax.f32 %v2762_v23, 0.0 }
  0x48   : > { %v2991_v48 = vstv %s2094_s6 }
  0x49   : > { %2249 = vmatmul.mubr.f32.gmra.mrb[14].mxu0 %v478_v19  ;;  %2297 = vmatmul.mubr.f32.gmra.mrb[14].mxu1 %v510_v46  ;;  %v513_v55 = vmax.f32 %v449_v37, 0.0  ;;  %v488_v19 = vmax.f32 %v2725_v1, 0.0  ;;  %v521_v1 = vmax.f32 %v2901_v41, 0.0  ;;  %v992_v41 = vlaneseq }
  0x4a   : > { %2251 = vmatprep.mubr.f32.mxu0 %v479_v51  ;;  %2299 = vmatprep.mubr.f32.mxu1 %v511_v36 }
  0x4b   : > { %v2985_v33 = vshrl.u32 %v992_v41, 7 }
  0x4d   : > { %2252 = vmatmul.mubr.f32.gmra.mrb[16].mxu0 %v480_v24  ;;  %2300 = vmatmul.mubr.f32.gmra.mrb[16].mxu1 %v512_v44  ;;  %v994_v23 = vadd.s32 8, %v2985_v33  ;;  %v996_v50 = vadd.s32 24, %v2985_v33  ;;  %v995_v61 = vadd.s32 16, %v2985_v33  ;;  %v1059_v63 = vadd.s32 %v2991_v48, %v2985_v33 }
  0x4e   : > { %2254 = vmatprep.mubr.f32.mxu0 %v481_v35  ;;  %2302 = vmatprep.mubr.f32.mxu1 %v513_v55  ;;  %v998_v11 = vadd.s32 40, %v2985_v33  ;;  %v997_v12 = vadd.s32 32, %v2985_v33  ;;  %v1000_v20 = vadd.s32 56, %v2985_v33  ;;  %v999_v29 = vadd.s32 48, %v2985_v33 }
  0x4f   : > { %v1060_v7 = vadd.s32 %v2991_v48, %v994_v23  ;;  %v1062_v8 = vadd.s32 %v2991_v48, %v996_v50  ;;  %v1061_v10 = vadd.s32 %v2991_v48, %v995_v61  ;;  %vm1123_vm1 = vcmp.lt.s32.totalorder %v1059_v63, 5488 }
  0x50   : > { %v1064_v45 = vadd.s32 %v2991_v48, %v998_v11  ;;  %v1063_v27 = vadd.s32 %v2991_v48, %v997_v12  ;;  %v1002_v24 = vadd.s32 72, %v2985_v33  ;;  %v1001_v46 = vadd.s32 64, %v2985_v33 }
  0x51   : > { %2255 = vmatmul.mubr.f32.gmra.mrb[18].mxu0 %v482_v42  ;;  %2303 = vmatmul.mubr.f32.gmra.mrb[18].mxu1 %v514_v9  ;;  %vm1124_vm0 = vcmp.lt.s32.totalorder %v1060_v7, 5488  ;;  %vm1126_vm2 = vcmp.lt.s32.totalorder %v1062_v8, 5488  ;;  %vm1125_vm3 = vcmp.lt.s32.totalorder %v1061_v10, 5488  ;;  %v1066_v42 = vadd.s32 %v2991_v48, %v1000_v20 }
  0x52   : > { %2257 = vmatprep.mubr.f32.mxu0 %v483_v53  ;;  %2305 = vmatprep.mubr.f32.mxu1 %v515_v39  ;;  %vm1128_vm4 = vcmp.lt.s32.totalorder %v1064_v45, 5488  ;;  %vm1127_vm5 = vcmp.lt.s32.totalorder %v1063_v27, 5488  ;;  %v1065_v49 = vadd.s32 %v2991_v48, %v999_v29  ;;  %v1068_v54 = vadd.s32 %v2991_v48, %v1002_v24 }
  0x53   : > { %v1067_v55 = vadd.s32 %v2991_v48, %v1001_v46  ;;  %vm1130_vm6 = vcmp.lt.s32.totalorder %v1066_v42, 5488  ;;  %v1005_v61 = vadd.s32 96, %v2985_v33  ;;  %v1008_v63 = vadd.s32 120, %v2985_v33 }
  0x54   : > { %vm1129_vm7 = vcmp.lt.s32.totalorder %v1065_v49, 5488  ;;  %vm1132_vm8 = vcmp.lt.s32.totalorder %v1068_v54, 5488  ;;  %v1007_v8 = vadd.s32 112, %v2985_v33  ;;  %v1010_v42 = vadd.s32 136, %v2985_v33 }
  0x55   : > { %2258 = vmatmul.mubr.f32.gmra.mrb[20].mxu0 %v484_v57  ;;  %2306 = vmatmul.mubr.f32.gmra.mrb[20].mxu1 %v516_v59  ;;  %vm1131_vm9 = vcmp.lt.s32.totalorder %v1067_v55, 5488  ;;  %v1071_v27 = vadd.s32 %v2991_v48, %v1005_v61 }
  0x56   : > { %2260 = vmatprep.mubr.f32.mxu0 %v485_v18  ;;  %2308 = vmatprep.mubr.f32.mxu1 %v517_v13  ;;  %v1073_v24 = vadd.s32 %v2991_v48, %v1007_v8 }
  0x57   : > { %vm1135_vm13 = vcmp.lt.s32.totalorder %v1071_v27, 5488 }
  0x58   : > { %vm1137_vm15 = vcmp.lt.s32.totalorder %v1073_v24, 5488  ;;  %v1016_v24 = vadd.s32 184, %v2985_v33 }
  0x59   : > { %2261 = vmatmul.mubr.f32.gmra.mrb[22].mxu0 %v486_v58  ;;  %2309 = vmatmul.mubr.f32.gmra.mrb[22].mxu1 %v518_v40  ;;  %v1004_v58 = vadd.s32 88, %v2985_v33 }
  0x5a   : > { %2263 = vmatprep.mubr.f32.mxu0 %v487_v62  ;;  %2311 = vmatprep.mubr.f32.mxu1 %v519_v52 }
  0x5d   : > { %2264 = vmatmul.mubr.f32.gmra.mrb[24].mxu0 %v488_v19  ;;  %2312 = vmatmul.mubr.f32.gmra.mrb[24].mxu1 %v520_v0  ;;  %v1003_v19 = vadd.s32 80, %v2985_v33 }
  0x5e   : > { %2266 = vmatprep.mubr.f32.mxu0 %v489_v3  ;;  %2314 = vmatprep.mubr.f32.mxu1 %v521_v1 }
  0x61   : > { %2267 = vmatmul.mubr.f32.gmra.mrb[26].mxu0 %v490_v60  ;;  %2315 = vmatmul.mubr.f32.gmra.mrb[26].mxu1 %v522_v2 }
  0x62   : > { %2269 = vmatprep.mubr.f32.mxu0 %v491_v15  ;;  %2317 = vmatprep.mubr.f32.mxu1 %v523_v4 }
  0x65   : > { %2270 = vmatmul.mubr.f32.gmra.mrb[28].mxu0 %v492_v26  ;;  %2318 = vmatmul.mubr.f32.gmra.mrb[28].mxu1 %v524_v28 }
  0x66   : > { %2272 = vmatprep.mubr.f32.mxu0 %v493_v34  ;;  %2320 = vmatprep.mubr.f32.mxu1 %v525_v6  ;;  %v1070_v34 = vadd.s32 %v2991_v48, %v1004_v58  ;;  %v1069_v6 = vadd.s32 %v2991_v48, %v1003_v19  ;;  %v1076_v19 = vadd.s32 %v2991_v48, %v1010_v42 }
  0x68   : > { %vm1134_vm10 = vcmp.lt.s32.totalorder %v1070_v34, 5488  ;;  %vm1133_vm11 = vcmp.lt.s32.totalorder %v1069_v6, 5488  ;;  %v1011_v34 = vadd.s32 144, %v2985_v33  ;;  %v1013_v6 = vadd.s32 160, %v2985_v33 }
  0x69   : > { %2273 = vmatmul.mubr.f32.gmra.mrb[30].mxu0 %v494_v5  ;;  %2321 = vmatmul.mubr.f32.gmra.mrb[30].mxu1 %v526_v16  ;;  %v1006_v16 = vadd.s32 104, %v2985_v33 }
  0x6b   : > { %v1072_v45 = vadd.s32 %v2991_v48, %v1006_v16 }
  0x6d   : > { %vm1136_vm12 = vcmp.lt.s32.totalorder %v1072_v45, 5488 }
 0x100   : > { %v2229_v47 = vpop.f32.mrb[0].mxu0  ;;  %v3013_v31 = vpop.f32.mrb[0].mxu1 }
 0x101   : > { %929 = vst [vmem:[%s3003_s18 + $0x8] sm:$0xff] %v2229_v47  ;;  %v1316_v14 = vsel %vm1124_vm0, %v2229_v47, 0.0  ;;  %v609_v51 = vpop.f32.mrb[1].mxu0  ;;  %961 = vst [vmem:[%s3003_s18 + $0x108] sm:$0xff] %v3013_v31  ;;  %v3018_v36 = vpop.f32.mrb[1].mxu1  ;;  %vm1140_vm0 = vcmp.lt.s32.totalorder %v1076_v19, 5488 }
 0x102   : > { %v1449_v17 = vmul.f32 %v1316_v14, %v1316_v14  ;;  %928 = vst [vmem:[%s3003_s18] sm:$0xff] %v609_v51  ;;  %v1315_v22 = vsel %vm1123_vm1, %v609_v51, 0.0  ;;  %960 = vst [vmem:[%s3003_s18 + $0x100] sm:$0xff] %v3018_v36 }
 0x103   : > { %v1379_v21 = vadd.f32 %v1316_v14, %v1315_v22  ;;  %v1448_v25 = vmul.f32 %v1315_v22, %v1315_v22 }
 0x104   : > { %v2232_v30 = vpop.f32.mrb[2].mxu0  ;;  %v3029_v56 = vpop.f32.mrb[2].mxu1 }
 0x105   : > { %v1512_v32 = vadd.f32 %v1449_v17, %v1448_v25  ;;  %931 = vst [vmem:[%s3003_s18 + $0x18] sm:$0xff] %v2232_v30  ;;  %v619_v35 = vpop.f32.mrb[3].mxu0  ;;  %v1318_v37 = vsel %vm1126_vm2, %v2232_v30, 0.0  ;;  %963 = vst [vmem:[%s3003_s18 + $0x118] sm:$0xff] %v3029_v56  ;;  %v3035_v59 = vpop.f32.mrb[3].mxu1  ;;  %v1074_v30 = vadd.s32 %v2991_v48, %v1008_v63 }
 0x106   : > { %930 = vst [vmem:[%s3003_s18 + $0x10] sm:$0xff] %v619_v35  ;;  %v1317_v38 = vsel %vm1125_vm3, %v619_v35, 0.0  ;;  %v1451_v57 = vmul.f32 %v1318_v37, %v1318_v37  ;;  %962 = vst [vmem:[%s3003_s18 + $0x110] sm:$0xff] %v3035_v59 }
 0x107   : > { %v1380_v43 = vadd.f32 %v1379_v21, %v1317_v38  ;;  %v1450_v44 = vmul.f32 %v1317_v38, %v1317_v38  ;;  %vm1138_vm14 = vcmp.lt.s32.totalorder %v1074_v30, 5488 }
 0x108   : > { %v2235_v53 = vpop.f32.mrb[4].mxu0  ;;  %v3043_v0 = vpop.f32.mrb[4].mxu1 }
 0x109   : > { %v1513_v9 = vadd.f32 %v1512_v32, %v1450_v44  ;;  %933 = vst [vmem:[%s3003_s18 + $0x28] sm:$0xff] %v2235_v53  ;;  %v629_v18 = vpop.f32.mrb[5].mxu0  ;;  %v1381_v39 = vadd.f32 %v1380_v43, %v1318_v37  ;;  %v1320_v62 = vsel %vm1128_vm4, %v2235_v53, 0.0  ;;  %965 = vst [vmem:[%s3003_s18 + $0x128] sm:$0xff] %v3043_v0  ;;  %v3049_v4 = vpop.f32.mrb[5].mxu1  ;;  %v1009_v53 = vadd.s32 128, %v2985_v33 }
 0x10a   : > { %932 = vst [vmem:[%s3003_s18 + $0x20] sm:$0xff] %v629_v18  ;;  %v1319_v13 = vsel %vm1127_vm5, %v629_v18, 0.0  ;;  %v1453_v15 = vmul.f32 %v1320_v62, %v1320_v62  ;;  %964 = vst [vmem:[%s3003_s18 + $0x120] sm:$0xff] %v3049_v4 }
 0x10b   : > { %v1382_v40 = vadd.f32 %v1381_v39, %v1319_v13  ;;  %v1452_v3 = vmul.f32 %v1319_v13, %v1319_v13  ;;  %v1514_v52 = vadd.f32 %v1513_v9, %v1451_v57 }
 0x10c   : > { %v2238_v60 = vpop.f32.mrb[6].mxu0  ;;  %v3060_v10 = vpop.f32.mrb[6].mxu1 }
 0x10d   : > { %v1515_v1 = vadd.f32 %v1514_v52, %v1452_v3  ;;  %935 = vst [vmem:[%s3003_s18 + $0x38] sm:$0xff] %v2238_v60  ;;  %v639_v26 = vpop.f32.mrb[7].mxu0  ;;  %v1383_v2 = vadd.f32 %v1382_v40, %v1320_v62  ;;  %v1322_v5 = vsel %vm1130_vm6, %v2238_v60, 0.0  ;;  %967 = vst [vmem:[%s3003_s18 + $0x138] sm:$0xff] %v3060_v10  ;;  %v3065_v51 = vpop.f32.mrb[7].mxu1  ;;  %v1075_v60 = vadd.s32 %v2991_v48, %v1009_v53 }
 0x10e   : > { %934 = vst [vmem:[%s3003_s18 + $0x30] sm:$0xff] %v639_v26  ;;  %v1321_v28 = vsel %vm1129_vm7, %v639_v26, 0.0  ;;  %v1455_v11 = vmul.f32 %v1322_v5, %v1322_v5  ;;  %966 = vst [vmem:[%s3003_s18 + $0x130] sm:$0xff] %v3065_v51 }
 0x10f   : > { %v1384_v41 = vadd.f32 %v1383_v2, %v1321_v28  ;;  %v1454_v23 = vmul.f32 %v1321_v28, %v1321_v28  ;;  %v1516_v50 = vadd.f32 %v1515_v1, %v1453_v15  ;;  %v1012_v15 = vadd.s32 152, %v2985_v33 }
 0x110   : > { %v2241_v7 = vpop.f32.mrb[8].mxu0  ;;  %v3076_v46 = vpop.f32.mrb[8].mxu1  ;;  %v1014_v28 = vadd.s32 168, %v2985_v33  ;;  %vm1139_vm1 = vcmp.lt.s32.totalorder %v1075_v60, 5488 }
 0x111   : > { %v1517_v12 = vadd.f32 %v1516_v50, %v1454_v23  ;;  %937 = vst [vmem:[%s3003_s18 + $0x48] sm:$0xff] %v2241_v7  ;;  %v649_v47 = vpop.f32.mrb[9].mxu0  ;;  %v1385_v14 = vadd.f32 %v1384_v41, %v1322_v5  ;;  %v1324_v17 = vsel %vm1132_vm8, %v2241_v7, 0.0  ;;  %969 = vst [vmem:[%s3003_s18 + $0x148] sm:$0xff] %v3076_v46  ;;  %v3082_v43 = vpop.f32.mrb[9].mxu1 }
 0x112   : > { %936 = vst [vmem:[%s3003_s18 + $0x40] sm:$0xff] %v649_v47  ;;  %v1323_v22 = vsel %vm1131_vm9, %v649_v47, 0.0  ;;  %v1457_v32 = vmul.f32 %v1324_v17, %v1324_v17  ;;  %968 = vst [vmem:[%s3003_s18 + $0x140] sm:$0xff] %v3082_v43  ;;  %v1080_v45 = vadd.s32 %v2991_v48, %v1014_v28 }
 0x113   : > { %v1386_v20 = vadd.f32 %v1385_v14, %v1323_v22  ;;  %v1456_v21 = vmul.f32 %v1323_v22, %v1323_v22  ;;  %v1518_v25 = vadd.f32 %v1517_v12, %v1455_v11  ;;  %v1078_v11 = vadd.s32 %v2991_v48, %v1012_v15 }
 0x114   : > { %v2244_v29 = vpop.f32.mrb[10].mxu0  ;;  %v3090_v18 = vpop.f32.mrb[10].mxu1  ;;  %vm1144_vm4 = vcmp.lt.s32.totalorder %v1080_v45, 5488 }
 0x115   : > { %v1519_v35 = vadd.f32 %v1518_v25, %v1456_v21  ;;  %939 = vst [vmem:[%s3003_s18 + $0x58] sm:$0xff] %v2244_v29  ;;  %v659_v37 = vpop.f32.mrb[11].mxu0  ;;  %v1387_v38 = vadd.f32 %v1386_v20, %v1324_v17  ;;  %v1326_v44 = vsel %vm1134_vm10, %v2244_v29, 0.0  ;;  %971 = vst [vmem:[%s3003_s18 + $0x158] sm:$0xff] %v3090_v18  ;;  %v3096_v40 = vpop.f32.mrb[11].mxu1  ;;  %v1077_v17 = vadd.s32 %v2991_v48, %v1011_v34 }
 0x116   : > { %938 = vst [vmem:[%s3003_s18 + $0x50] sm:$0xff] %v659_v37  ;;  %v1325_v49 = vsel %vm1133_vm11, %v659_v37, 0.0  ;;  %v1459_v39 = vmul.f32 %v1326_v44, %v1326_v44  ;;  %970 = vst [vmem:[%s3003_s18 + $0x150] sm:$0xff] %v3096_v40  ;;  %v1079_v20 = vadd.s32 %v2991_v48, %v1013_v6  ;;  %vm1142_vm2 = vcmp.lt.s32.totalorder %v1078_v11, 5488 }
 0x117   : > { %v1388_v54 = vadd.f32 %v1387_v38, %v1325_v49  ;;  %v1458_v55 = vmul.f32 %v1325_v49, %v1325_v49  ;;  %v1520_v57 = vadd.f32 %v1519_v35, %v1457_v32  ;;  %v1015_v38 = vadd.s32 176, %v2985_v33 }
 0x118   : > { %v2247_v9 = vpop.f32.mrb[12].mxu0  ;;  %v3107_v16 = vpop.f32.mrb[12].mxu1  ;;  %vm1141_vm3 = vcmp.lt.s32.totalorder %v1077_v17, 5488  ;;  %vm1143_vm5 = vcmp.lt.s32.totalorder %v1079_v20, 5488  ;;  %v1020_v34 = vadd.s32 216, %v2985_v33 }
 0x119   : > { %v1521_v58 = vadd.f32 %v1520_v57, %v1458_v55  ;;  %941 = vst [vmem:[%s3003_s18 + $0x68] sm:$0xff] %v2247_v9  ;;  %v669_v62 = vpop.f32.mrb[13].mxu0  ;;  %v1389_v13 = vadd.f32 %v1388_v54, %v1326_v44  ;;  %v1328_v3 = vsel %vm1136_vm12, %v2247_v9, 0.0  ;;  %973 = vst [vmem:[%s3003_s18 + $0x168] sm:$0xff] %v3107_v16  ;;  %v3112_v7 = vpop.f32.mrb[13].mxu1 }
 0x11a   : > { %940 = vst [vmem:[%s3003_s18 + $0x60] sm:$0xff] %v669_v62  ;;  %v1327_v52 = vsel %vm1135_vm13, %v669_v62, 0.0  ;;  %v1461_v41 = vmul.f32 %v1328_v3, %v1328_v3  ;;  %972 = vst [vmem:[%s3003_s18 + $0x160] sm:$0xff] %v3112_v7  ;;  %v1086_v45 = vadd.s32 %v2991_v48, %v1020_v34 }
 0x11b   : > { %v1390_v1 = vadd.f32 %v1389_v13, %v1327_v52  ;;  %v1460_v26 = vmul.f32 %v1327_v52, %v1327_v52  ;;  %v1522_v2 = vadd.f32 %v1521_v58, %v1459_v39  ;;  %v1082_v58 = vadd.s32 %v2991_v48, %v1016_v24 }
 0x11c   : > { %v2250_v5 = vpop.f32.mrb[14].mxu0  ;;  %v3123_v21 = vpop.f32.mrb[14].mxu1  ;;  %v1018_v52 = vadd.s32 200, %v2985_v33  ;;  %vm1150_vm10 = vcmp.lt.s32.totalorder %v1086_v45, 5488 }
 0x11d   : > { %v1523_v23 = vadd.f32 %v1522_v2, %v1460_v26  ;;  %943 = vst [vmem:[%s3003_s18 + $0x78] sm:$0xff] %v2250_v5  ;;  %v679_v50 = vpop.f32.mrb[15].mxu0  ;;  %v1391_v61 = vadd.f32 %v1390_v1, %v1328_v3  ;;  %v1330_v63 = vsel %vm1138_vm14, %v2250_v5, 0.0  ;;  %975 = vst [vmem:[%s3003_s18 + $0x178] sm:$0xff] %v3123_v21  ;;  %v3129_v32 = vpop.f32.mrb[15].mxu1  ;;  %v1081_v3 = vadd.s32 %v2991_v48, %v1015_v38 }
 0x11e   : > { %942 = vst [vmem:[%s3003_s18 + $0x70] sm:$0xff] %v679_v50  ;;  %v1329_v8 = vsel %vm1137_vm15, %v679_v50, 0.0  ;;  %v1463_v25 = vmul.f32 %v1330_v63, %v1330_v63  ;;  %974 = vst [vmem:[%s3003_s18 + $0x170] sm:$0xff] %v3129_v32  ;;  %v1017_v26 = vadd.s32 192, %v2985_v33  ;;  %v1019_v5 = vadd.s32 208, %v2985_v33 }
 0x11f   : > { %v1392_v12 = vadd.f32 %v1391_v61, %v1329_v8  ;;  %v1462_v47 = vmul.f32 %v1329_v8, %v1329_v8  ;;  %v1524_v14 = vadd.f32 %v1523_v23, %v1461_v41  ;;  %vm1146_vm6 = vcmp.lt.s32.totalorder %v1082_v58, 5488 }
 0x120   : > { %v2253_v22 = vpop.f32.mrb[16].mxu0  ;;  %v3137_v54 = vpop.f32.mrb[16].mxu1  ;;  %vm1145_vm7 = vcmp.lt.s32.totalorder %v1081_v3, 5488  ;;  %v1084_v11 = vadd.s32 %v2991_v48, %v1018_v52  ;;  %v1083_v17 = vadd.s32 %v2991_v48, %v1017_v26  ;;  %v1085_v20 = vadd.s32 %v2991_v48, %v1019_v5 }
 0x121   : > { %v1525_v27 = vadd.f32 %v1524_v14, %v1462_v47  ;;  %945 = vst [vmem:[%s3003_s18 + $0x88] sm:$0xff] %v2253_v22  ;;  %v689_v29 = vpop.f32.mrb[17].mxu0  ;;  %v1393_v30 = vadd.f32 %v1392_v12, %v1330_v63  ;;  %v1332_v35 = vsel %vm1140_vm0, %v2253_v22, 0.0  ;;  %977 = vst [vmem:[%s3003_s18 + $0x188] sm:$0xff] %v3137_v54  ;;  %v3143_v62 = vpop.f32.mrb[17].mxu1  ;;  %v1024_v52 = vadd.s32 248, %v2985_v33 }
 0x122   : > { %944 = vst [vmem:[%s3003_s18 + $0x80] sm:$0xff] %v689_v29  ;;  %v1331_v37 = vsel %vm1139_vm1, %v689_v29, 0.0  ;;  %v1465_v55 = vmul.f32 %v1332_v35, %v1332_v35  ;;  %976 = vst [vmem:[%s3003_s18 + $0x180] sm:$0xff] %v3143_v62  ;;  %vm1148_vm8 = vcmp.lt.s32.totalorder %v1084_v11, 5488  ;;  %vm1147_vm9 = vcmp.lt.s32.totalorder %v1083_v17, 5488 }
 0x123   : > { %v1394_v42 = vadd.f32 %v1393_v30, %v1331_v37  ;;  %v1464_v44 = vmul.f32 %v1331_v37, %v1331_v37  ;;  %v1526_v49 = vadd.f32 %v1525_v27, %v1463_v25  ;;  %v1022_v25 = vadd.s32 232, %v2985_v33 }
 0x124   : > { %v2256_v53 = vpop.f32.mrb[18].mxu0  ;;  %v3154_v28 = vpop.f32.mrb[18].mxu1  ;;  %vm1149_vm11 = vcmp.lt.s32.totalorder %v1085_v20, 5488  ;;  %v1090_v17 = vadd.s32 %v2991_v48, %v1024_v52 }
 0x125   : > { %v1527_v57 = vadd.f32 %v1526_v49, %v1464_v44  ;;  %947 = vst [vmem:[%s3003_s18 + $0x98] sm:$0xff] %v2256_v53  ;;  %v699_v9 = vpop.f32.mrb[19].mxu0  ;;  %v1395_v39 = vadd.f32 %v1394_v42, %v1332_v35  ;;  %v1334_v13 = vsel %vm1142_vm2, %v2256_v53, 0.0  ;;  %979 = vst [vmem:[%s3003_s18 + $0x198] sm:$0xff] %v3154_v28  ;;  %v3159_v61 = vpop.f32.mrb[19].mxu1  ;;  %v1021_v44 = vadd.s32 224, %v2985_v33 }
 0x126   : > { %946 = vst [vmem:[%s3003_s18 + $0x90] sm:$0xff] %v699_v9  ;;  %v1333_v19 = vsel %vm1141_vm3, %v699_v9, 0.0  ;;  %v1467_v6 = vmul.f32 %v1334_v13, %v1334_v13  ;;  %978 = vst [vmem:[%s3003_s18 + $0x190] sm:$0xff] %v3159_v61  ;;  %v1088_v9 = vadd.s32 %v2991_v48, %v1022_v25  ;;  %vm1154_vm14 = vcmp.lt.s32.totalorder %v1090_v17, 5488 }
 0x127   : > { %v1396_v60 = vadd.f32 %v1395_v39, %v1333_v19  ;;  %v1466_v15 = vmul.f32 %v1333_v19, %v1333_v19  ;;  %v1528_v1 = vadd.f32 %v1527_v57, %v1465_v55  ;;  %v1087_v26 = vadd.s32 %v2991_v48, %v1021_v44 }
 0x128   : > { %v2259_v2 = vpop.f32.mrb[20].mxu0  ;;  %v3171_v27 = vpop.f32.mrb[20].mxu1  ;;  %vm1152_vm12 = vcmp.lt.s32.totalorder %v1088_v9, 5488  ;;  %v1032_v17 = vadd.s32 312, %v2985_v33 }
 0x129   : > { %v1529_v41 = vadd.f32 %v1528_v1, %v1466_v15  ;;  %949 = vst [vmem:[%s3003_s18 + $0xa8] sm:$0xff] %v2259_v2  ;;  %v709_v23 = vpop.f32.mrb[21].mxu0  ;;  %v1397_v50 = vadd.f32 %v1396_v60, %v1334_v13  ;;  %v1336_v63 = vsel %vm1144_vm4, %v2259_v2, 0.0  ;;  %981 = vst [vmem:[%s3003_s18 + $0x1a8] sm:$0xff] %v3171_v27  ;;  %v3176_v37 = vpop.f32.mrb[21].mxu1  ;;  %v1023_v2 = vadd.s32 240, %v2985_v33 }
 0x12a   : > { %948 = vst [vmem:[%s3003_s18 + $0xa0] sm:$0xff] %v709_v23  ;;  %v1335_v8 = vsel %vm1143_vm5, %v709_v23, 0.0  ;;  %v1469_v29 = vmul.f32 %v1336_v63, %v1336_v63  ;;  %980 = vst [vmem:[%s3003_s18 + $0x1a0] sm:$0xff] %v3176_v37  ;;  %vm1151_vm13 = vcmp.lt.s32.totalorder %v1087_v26, 5488 }
 0x12b   : > { %v1398_v12 = vadd.f32 %v1397_v50, %v1335_v8  ;;  %v1468_v47 = vmul.f32 %v1335_v8, %v1335_v8  ;;  %v1530_v14 = vadd.f32 %v1529_v41, %v1467_v6  ;;  %v1025_v41 = vadd.s32 256, %v2985_v33 }
 0x12c   : > { %v2262_v22 = vpop.f32.mrb[22].mxu0  ;;  %v3185_v39 = vpop.f32.mrb[22].mxu1  ;;  %v1026_v50 = vadd.s32 264, %v2985_v33 }
 0x12d   : > { %v1531_v30 = vadd.f32 %v1530_v14, %v1468_v47  ;;  %951 = vst [vmem:[%s3003_s18 + $0xb8] sm:$0xff] %v2262_v22  ;;  %v719_v24 = vpop.f32.mrb[23].mxu0  ;;  %v1399_v35 = vadd.f32 %v1398_v12, %v1336_v63  ;;  %v1338_v38 = vsel %vm1146_vm6, %v2262_v22, 0.0  ;;  %983 = vst [vmem:[%s3003_s18 + $0x1b8] sm:$0xff] %v3185_v39  ;;  %v3191_v60 = vpop.f32.mrb[23].mxu1  ;;  %v1027_v63 = vadd.s32 272, %v2985_v33 }
 0x12e   : > { %950 = vst [vmem:[%s3003_s18 + $0xb0] sm:$0xff] %v719_v24  ;;  %v1337_v42 = vsel %vm1145_vm7, %v719_v24, 0.0  ;;  %v1471_v58 = vmul.f32 %v1338_v38, %v1338_v38  ;;  %982 = vst [vmem:[%s3003_s18 + $0x1b0] sm:$0xff] %v3191_v60  ;;  %v1092_v45 = vadd.s32 %v2991_v48, %v1026_v50 }
 0x12f   : > { %v1400_v49 = vadd.f32 %v1399_v35, %v1337_v42  ;;  %v1470_v53 = vmul.f32 %v1337_v42, %v1337_v42  ;;  %v1532_v55 = vadd.f32 %v1531_v30, %v1469_v29  ;;  %v1089_v30 = vadd.s32 %v2991_v48, %v1023_v2 }
 0x130   : > { %v2265_v57 = vpop.f32.mrb[24].mxu0  ;;  %v3203_v8 = vpop.f32.mrb[24].mxu1  ;;  %v1091_v42 = vadd.s32 %v2991_v48, %v1025_v41  ;;  %v1093_v20 = vadd.s32 %v2991_v48, %v1027_v63  ;;  %vm1156_vm1 = vcmp.lt.s32.totalorder %v1092_v45, 5488  ;;  %v1030_v63 = vadd.s32 296, %v2985_v33 }
 0x131   : > { %v1533_v13 = vadd.f32 %v1532_v55, %v1470_v53  ;;  %953 = vst [vmem:[%s3003_s18 + $0xc8] sm:$0xff] %v2265_v57  ;;  %v729_v19 = vpop.f32.mrb[25].mxu0  ;;  %v1401_v3 = vadd.f32 %v1400_v49, %v1338_v38  ;;  %v1340_v15 = vsel %vm1148_vm8, %v2265_v57, 0.0  ;;  %985 = vst [vmem:[%s3003_s18 + $0x1c8] sm:$0xff] %v3203_v8  ;;  %v3209_v22 = vpop.f32.mrb[25].mxu1  ;;  %v1028_v49 = vadd.s32 280, %v2985_v33 }
 0x132   : > { %952 = vst [vmem:[%s3003_s18 + $0xc0] sm:$0xff] %v729_v19  ;;  %v1339_v1 = vsel %vm1147_vm9, %v729_v19, 0.0  ;;  %v1473_v11 = vmul.f32 %v1340_v15, %v1340_v15  ;;  %984 = vst [vmem:[%s3003_s18 + $0x1c0] sm:$0xff] %v3209_v22  ;;  %vm1153_vm15 = vcmp.lt.s32.totalorder %v1089_v30, 5488  ;;  %vm1155_vm0 = vcmp.lt.s32.totalorder %v1091_v42, 5488 }
 0x133   : > { %v1402_v34 = vadd.f32 %v1401_v3, %v1339_v1  ;;  %v1472_v5 = vmul.f32 %v1339_v1, %v1339_v1  ;;  %v1534_v6 = vadd.f32 %v1533_v13, %v1471_v58  ;;  %v1094_v9 = vadd.s32 %v2991_v48, %v1028_v49 }
 0x134   : > { %v2268_v23 = vpop.f32.mrb[26].mxu0  ;;  %v3221_v53 = vpop.f32.mrb[26].mxu1  ;;  %vm1157_vm2 = vcmp.lt.s32.totalorder %v1093_v20, 5488 }
 0x135   : > { %v1535_v12 = vadd.f32 %v1534_v6, %v1472_v5  ;;  %955 = vst [vmem:[%s3003_s18 + $0xd8] sm:$0xff] %v2268_v23  ;;  %v739_v47 = vpop.f32.mrb[27].mxu0  ;;  %v1403_v14 = vadd.f32 %v1402_v34, %v1340_v15  ;;  %v1342_v25 = vsel %vm1150_vm10, %v2268_v23, 0.0  ;;  %987 = vst [vmem:[%s3003_s18 + $0x1d8] sm:$0xff] %v3221_v53  ;;  %v3226_v19 = vpop.f32.mrb[27].mxu1  ;;  %v1029_v15 = vadd.s32 288, %v2985_v33 }
 0x136   : > { %954 = vst [vmem:[%s3003_s18 + $0xd0] sm:$0xff] %v739_v47  ;;  %v1341_v29 = vsel %vm1149_vm11, %v739_v47, 0.0  ;;  %v1475_v55 = vmul.f32 %v1342_v25, %v1342_v25  ;;  %986 = vst [vmem:[%s3003_s18 + $0x1d0] sm:$0xff] %v3226_v19  ;;  %vm1158_vm3 = vcmp.lt.s32.totalorder %v1094_v9, 5488 }
 0x137   : > { %v1404_v24 = vadd.f32 %v1403_v14, %v1341_v29  ;;  %v1474_v35 = vmul.f32 %v1341_v29, %v1341_v29  ;;  %v1536_v38 = vadd.f32 %v1535_v12, %v1473_v11  ;;  %v1347_v14 = vsel %vm1155_vm0, %v3018_v36, 0.0 }
 0x138   : > { %v2271_v44 = vpop.f32.mrb[28].mxu0  ;;  %v3235_v26 = vpop.f32.mrb[28].mxu1  ;;  %v1480_v42 = vmul.f32 %v1347_v14, %v1347_v14 }
 0x139   : > { %v1537_v57 = vadd.f32 %v1536_v38, %v1474_v35  ;;  %957 = vst [vmem:[%s3003_s18 + $0xe8] sm:$0xff] %v2271_v44  ;;  %v749_v58 = vpop.f32.mrb[29].mxu0  ;;  %v1405_v13 = vadd.f32 %v1404_v24, %v1342_v25  ;;  %v1344_v3 = vsel %vm1152_vm12, %v2271_v44, 0.0  ;;  %989 = vst [vmem:[%s3003_s18 + $0x1e8] sm:$0xff] %v3235_v26  ;;  %v3241_v11 = vpop.f32.mrb[29].mxu1  ;;  %v1095_v25 = vadd.s32 %v2991_v48, %v1029_v15 }
 0x13a   : > { %956 = vst [vmem:[%s3003_s18 + $0xe0] sm:$0xff] %v749_v58  ;;  %v1343_v52 = vsel %vm1151_vm13, %v749_v58, 0.0  ;;  %v1477_v6 = vmul.f32 %v1344_v3, %v1344_v3  ;;  %988 = vst [vmem:[%s3003_s18 + $0x1e0] sm:$0xff] %v3241_v11  ;;  %v1031_v38 = vadd.s32 304, %v2985_v33  ;;  %v1349_v58 = vsel %vm1157_vm2, %v3035_v59, 0.0 }
 0x13b   : > { %v1406_v1 = vadd.f32 %v1405_v13, %v1343_v52  ;;  %v1476_v2 = vmul.f32 %v1343_v52, %v1343_v52  ;;  %v1538_v34 = vadd.f32 %v1537_v57, %v1475_v55  ;;  %v1348_v57 = vsel %vm1156_vm1, %v3013_v31, 0.0 }
 0x13c   : > { %v2274_v5 = vpop.f32.mrb[30].mxu0  ;;  %v3253_v44 = vpop.f32.mrb[30].mxu1  ;;  %v1096_v13 = vadd.s32 %v2991_v48, %v1030_v63  ;;  %vm1159_vm4 = vcmp.lt.s32.totalorder %v1095_v25, 5488  ;;  %v1097_v15 = vadd.s32 %v2991_v48, %v1031_v38  ;;  %v1481_v45 = vmul.f32 %v1348_v57, %v1348_v57 }
 0x13d   : > { %v1539_v41 = vadd.f32 %v1538_v34, %v1476_v2  ;;  %959 = vst [vmem:[%s3003_s18 + $0xf8] sm:$0xff] %v2274_v5  ;;  %v759_v23 = vpop.f32.mrb[31].mxu0  ;;  %v1407_v50 = vadd.f32 %v1406_v1, %v1344_v3  ;;  %v1346_v12 = vsel %vm1154_vm14, %v2274_v5, 0.0  ;;  %991 = vst [vmem:[%s3003_s18 + $0x1f8] sm:$0xff] %v3253_v44  ;;  %v3257_v36 = vpop.f32.mrb[31].mxu1  ;;  %v1033_v1 = vadd.s32 320, %v2985_v33 }
 0x13e   : > { %958 = vst [vmem:[%s3003_s18 + $0xf0] sm:$0xff] %v759_v23  ;;  %v1345_v47 = vsel %vm1153_vm15, %v759_v23, 0.0  ;;  %v1479_v30 = vmul.f32 %v1346_v12, %v1346_v12  ;;  %990 = vst [vmem:[%s3003_s18 + $0x1f0] sm:$0xff] %v3257_v36  ;;  %v1098_v2 = vadd.s32 %v2991_v48, %v1032_v17  ;;  %v1034_v34 = vadd.s32 328, %v2985_v33 }
 0x13f   : > { %v1408_v29 = vadd.f32 %v1407_v50, %v1345_v47  ;;  %v1478_v24 = vmul.f32 %v1345_v47, %v1345_v47  ;;  %v1540_v35 = vadd.f32 %v1539_v41, %v1477_v6  ;;  %v1482_v20 = vmul.f32 %v1349_v58, %v1349_v58 }
 0x140   : > { %v1350_v59 = vsel %vm1158_vm3, %v3029_v56, 0.0  ;;  %vm1160_vm5 = vcmp.lt.s32.totalorder %v1096_v13, 5488  ;;  %v1351_v6 = vsel %vm1159_vm4, %v3049_v4, 0.0  ;;  %v1035_v41 = vadd.s32 336, %v2985_v33 }
 0x141   : > { %v1409_v49 = vadd.f32 %v1408_v29, %v1346_v12  ;;  %v1541_v55 = vadd.f32 %v1540_v35, %v1478_v24  ;;  %vm1161_vm6 = vcmp.lt.s32.totalorder %v1097_v15, 5488  ;;  %v1099_v63 = vadd.s32 %v2991_v48, %v1033_v1 }
 0x142   : > { %vm1162_vm7 = vcmp.lt.s32.totalorder %v1098_v2, 5488  ;;  %v1100_v12 = vadd.s32 %v2991_v48, %v1034_v34  ;;  %v1483_v47 = vmul.f32 %v1350_v59, %v1350_v59  ;;  %v1484_v29 = vmul.f32 %v1351_v6, %v1351_v6 }
 0x143   : > { %v1542_v3 = vadd.f32 %v1541_v55, %v1479_v30  ;;  %v1410_v52 = vadd.f32 %v1409_v49, %v1347_v14  ;;  %v1352_v9 = vsel %vm1160_vm5, %v3043_v0, 0.0  ;;  %v1353_v56 = vsel %vm1161_vm6, %v3065_v51, 0.0 }
 0x144   : > { %v1036_v4 = vadd.s32 344, %v2985_v33  ;;  %v1101_v24 = vadd.s32 %v2991_v48, %v1035_v41  ;;  %vm1163_vm8 = vcmp.lt.s32.totalorder %v1099_v63, 5488  ;;  %v1037_v17 = vadd.s32 352, %v2985_v33 }
 0x145   : > { %v1543_v31 = vadd.f32 %v1542_v3, %v1480_v42  ;;  %v1411_v5 = vadd.f32 %v1410_v52, %v1348_v57  ;;  %vm1164_vm9 = vcmp.lt.s32.totalorder %v1100_v12, 5488  ;;  %v1038_v30 = vadd.s32 360, %v2985_v33 }
 0x146   : > { %v1485_v49 = vmul.f32 %v1352_v9, %v1352_v9  ;;  %v1486_v57 = vmul.f32 %v1353_v56, %v1353_v56  ;;  %v1354_v0 = vsel %vm1162_vm7, %v3060_v10, 0.0  ;;  %v1355_v51 = vsel %vm1163_vm8, %v3082_v43, 0.0 }
 0x147   : > { %v1412_v23 = vadd.f32 %v1411_v5, %v1349_v58  ;;  %v1544_v50 = vadd.f32 %v1543_v31, %v1481_v45  ;;  %v1102_v58 = vadd.s32 %v2991_v48, %v1036_v4  ;;  %vm1165_vm10 = vcmp.lt.s32.totalorder %v1101_v24, 5488 }
 0x148   : > { %v1103_v52 = vadd.s32 %v2991_v48, %v1037_v17  ;;  %v1039_v15 = vadd.s32 368, %v2985_v33  ;;  %v1104_v1 = vadd.s32 %v2991_v48, %v1038_v30  ;;  %v1040_v34 = vadd.s32 376, %v2985_v33 }
 0x149   : > { %v1545_v14 = vadd.f32 %v1544_v50, %v1482_v20  ;;  %v1413_v25 = vadd.f32 %v1412_v23, %v1350_v59  ;;  %v1487_v45 = vmul.f32 %v1354_v0, %v1354_v0  ;;  %v1488_v2 = vmul.f32 %v1355_v51, %v1355_v51 }
 0x14a   : > { %v1356_v10 = vsel %vm1164_vm9, %v3076_v46, 0.0  ;;  %vm1166_vm11 = vcmp.lt.s32.totalorder %v1102_v58, 5488  ;;  %v1357_v43 = vsel %vm1165_vm10, %v3096_v40, 0.0  ;;  %v1041_v20 = vadd.s32 384, %v2985_v33 }
 0x14b   : > { %v1414_v35 = vadd.f32 %v1413_v25, %v1351_v6  ;;  %v1546_v38 = vadd.f32 %v1545_v14, %v1483_v47  ;;  %vm1167_vm12 = vcmp.lt.s32.totalorder %v1103_v52, 5488  ;;  %v1105_v41 = vadd.s32 %v2991_v48, %v1039_v15 }
 0x14c   : > { %vm1168_vm13 = vcmp.lt.s32.totalorder %v1104_v1, 5488  ;;  %v1106_v23 = vadd.s32 %v2991_v48, %v1040_v34  ;;  %v1489_v50 = vmul.f32 %v1356_v10, %v1356_v10  ;;  %v1490_v14 = vmul.f32 %v1357_v43, %v1357_v43 }
 0x14d   : > { %v1547_v55 = vadd.f32 %v1546_v38, %v1484_v29  ;;  %v1415_v42 = vadd.f32 %v1414_v35, %v1352_v9  ;;  %v1358_v12 = vsel %vm1166_vm11, %v3090_v18, 0.0  ;;  %v1359_v46 = vsel %vm1167_vm12, %v3112_v7, 0.0 }
 0x14e   : > { %v1042_v40 = vadd.s32 392, %v2985_v33  ;;  %v1107_v25 = vadd.s32 %v2991_v48, %v1041_v20  ;;  %vm1169_vm14 = vcmp.lt.s32.totalorder %v1105_v41, 5488  ;;  %vm1170_vm15 = vcmp.lt.s32.totalorder %v1106_v23, 5488 }
 0x14f   : > { %v1416_v13 = vadd.f32 %v1415_v42, %v1353_v56  ;;  %v1548_v3 = vadd.f32 %v1547_v55, %v1485_v49  ;;  %v1043_v56 = vadd.s32 400, %v2985_v33  ;;  %v1044_v4 = vadd.s32 408, %v2985_v33 }
 0x150   : > { %v1491_v24 = vmul.f32 %v1358_v12, %v1358_v12  ;;  %v1492_v17 = vmul.f32 %v1359_v46, %v1359_v46  ;;  %v1360_v18 = vsel %vm1168_vm13, %v3107_v16, 0.0  ;;  %v1361_v7 = vsel %vm1169_vm14, %v3129_v32, 0.0 }
 0x151   : > { %v1549_v31 = vadd.f32 %v1548_v3, %v1486_v57  ;;  %v1417_v5 = vadd.f32 %v1416_v13, %v1354_v0  ;;  %v1108_v30 = vadd.s32 %v2991_v48, %v1042_v40  ;;  %vm1171_vm0 = vcmp.lt.s32.totalorder %v1107_v25, 5488 }
 0x152   : > { %v1109_v42 = vadd.s32 %v2991_v48, %v1043_v56  ;;  %v1045_v57 = vadd.s32 416, %v2985_v33  ;;  %v1110_v0 = vadd.s32 %v2991_v48, %v1044_v4  ;;  %v1493_v58 = vmul.f32 %v1360_v18, %v1360_v18 }
 0x153   : > { %v1418_v59 = vadd.f32 %v1417_v5, %v1355_v51  ;;  %v1550_v6 = vadd.f32 %v1549_v31, %v1487_v45  ;;  %v1046_v51 = vadd.s32 424, %v2985_v33  ;;  %v1494_v52 = vmul.f32 %v1361_v7, %v1361_v7 }
 0x154   : > { %v1362_v16 = vsel %vm1170_vm15, %v3123_v21, 0.0  ;;  %vm1172_vm1 = vcmp.lt.s32.totalorder %v1108_v30, 5488  ;;  %v1363_v32 = vsel %vm1171_vm0, %v3143_v62, 0.0  ;;  %v1047_v15 = vadd.s32 432, %v2985_v33 }
 0x155   : > { %v1551_v63 = vadd.f32 %v1550_v6, %v1488_v2  ;;  %v1419_v47 = vadd.f32 %v1418_v59, %v1356_v10  ;;  %vm1173_vm2 = vcmp.lt.s32.totalorder %v1109_v42, 5488  ;;  %v1111_v45 = vadd.s32 %v2991_v48, %v1045_v57 }
 0x156   : > { %vm1174_vm3 = vcmp.lt.s32.totalorder %v1110_v0, 5488  ;;  %v1112_v31 = vadd.s32 %v2991_v48, %v1046_v51  ;;  %v1495_v5 = vmul.f32 %v1362_v16, %v1362_v16  ;;  %v1364_v20 = vsel %vm1172_vm1, %v3137_v54, 0.0 }
 0x157   : > { %v1420_v29 = vadd.f32 %v1419_v47, %v1357_v43  ;;  %v1552_v9 = vadd.f32 %v1551_v63, %v1489_v50  ;;  %v1496_v43 = vmul.f32 %v1363_v32, %v1363_v32  ;;  %v1365_v21 = vsel %vm1173_vm2, %v3159_v61, 0.0 }
 0x158   : > { %v1048_v62 = vadd.s32 440, %v2985_v33  ;;  %v1113_v59 = vadd.s32 %v2991_v48, %v1047_v15  ;;  %vm1175_vm4 = vcmp.lt.s32.totalorder %v1111_v45, 5488  ;;  %v1049_v23 = vadd.s32 448, %v2985_v33 }
 0x159   : > { %v1553_v35 = vadd.f32 %v1552_v9, %v1490_v14  ;;  %v1421_v38 = vadd.f32 %v1420_v29, %v1358_v12  ;;  %vm1176_vm5 = vcmp.lt.s32.totalorder %v1112_v31, 5488  ;;  %v1050_v50 = vadd.s32 456, %v2985_v33 }
 0x15a   : > { %v1497_v63 = vmul.f32 %v1364_v20, %v1364_v20  ;;  %v1498_v12 = vmul.f32 %v1365_v21, %v1365_v21  ;;  %v1366_v54 = vsel %vm1174_vm3, %v3154_v28, 0.0  ;;  %v1367_v61 = vsel %vm1175_vm4, %v3176_v37, 0.0 }
 0x15b   : > { %v1422_v49 = vadd.f32 %v1421_v38, %v1359_v46  ;;  %v1554_v55 = vadd.f32 %v1553_v35, %v1491_v24  ;;  %v1114_v46 = vadd.s32 %v2991_v48, %v1048_v62  ;;  %vm1177_vm6 = vcmp.lt.s32.totalorder %v1113_v59, 5488 }
 0x15c   : > { %v1115_v29 = vadd.s32 %v2991_v48, %v1049_v23  ;;  %v1051_v9 = vadd.s32 464, %v2985_v33  ;;  %v1116_v56 = vadd.s32 %v2991_v48, %v1050_v50  ;;  %v1052_v4 = vadd.s32 472, %v2985_v33 }
 0x15d   : > { %v1555_v13 = vadd.f32 %v1554_v55, %v1492_v17  ;;  %v1423_v3 = vadd.f32 %v1422_v49, %v1360_v18  ;;  %v1499_v24 = vmul.f32 %v1366_v54, %v1366_v54  ;;  %v1500_v17 = vmul.f32 %v1367_v61, %v1367_v61 }
 0x15e   : > { %v1368_v28 = vsel %vm1176_vm5, %v3171_v27, 0.0  ;;  %vm1178_vm7 = vcmp.lt.s32.totalorder %v1114_v46, 5488  ;;  %v1369_v37 = vsel %vm1177_vm6, %v3191_v60, 0.0  ;;  %v1053_v18 = vadd.s32 480, %v2985_v33 }
 0x15f   : > { %v1424_v1 = vadd.f32 %v1423_v3, %v1361_v7  ;;  %v1556_v34 = vadd.f32 %v1555_v13, %v1493_v58  ;;  %vm1179_vm8 = vcmp.lt.s32.totalorder %v1115_v29, 5488  ;;  %v1117_v49 = vadd.s32 %v2991_v48, %v1051_v9 }
 0x160   : > { %vm1180_vm9 = vcmp.lt.s32.totalorder %v1116_v56, 5488  ;;  %v1118_v55 = vadd.s32 %v2991_v48, %v1052_v4  ;;  %v1501_v42 = vmul.f32 %v1368_v28, %v1368_v28  ;;  %v1502_v51 = vmul.f32 %v1369_v37, %v1369_v37 }
 0x161   : > { %v1557_v2 = vadd.f32 %v1556_v34, %v1494_v52  ;;  %v1425_v10 = vadd.f32 %v1424_v1, %v1362_v16  ;;  %v1370_v58 = vsel %vm1178_vm7, %v3185_v39, 0.0  ;;  %v1371_v27 = vsel %vm1179_vm8, %v3209_v22, 0.0 }
 0x162   : > { %v1054_v60 = vadd.s32 488, %v2985_v33  ;;  %v1119_v13 = vadd.s32 %v2991_v48, %v1053_v18  ;;  %vm1181_vm10 = vcmp.lt.s32.totalorder %v1117_v49, 5488  ;;  %v1055_v16 = vadd.s32 496, %v2985_v33 }
 0x163   : > { %v1426_v6 = vadd.f32 %v1425_v10, %v1363_v32  ;;  %v1558_v41 = vadd.f32 %v1557_v2, %v1495_v5  ;;  %vm1182_vm11 = vcmp.lt.s32.totalorder %v1118_v55, 5488  ;;  %v1503_v32 = vmul.f32 %v1370_v58, %v1370_v58 }
 0x164   : > { %v1504_v34 = vmul.f32 %v1371_v27, %v1371_v27  ;;  %v1372_v45 = vsel %vm1180_vm9, %v3203_v8, 0.0  ;;  %v1373_v39 = vsel %vm1181_vm10, %v3226_v19, 0.0  ;;  %v1120_v22 = vadd.s32 %v2991_v48, %v1054_v60 }
 0x165   : > { %v1559_v47 = vadd.f32 %v1558_v41, %v1496_v43  ;;  %v1427_v14 = vadd.f32 %v1426_v6, %v1364_v20  ;;  %vm1183_vm12 = vcmp.lt.s32.totalorder %v1119_v13, 5488  ;;  %v1056_v2 = vadd.s32 504, %v2985_v33 }
 0x166   : > { %v1121_v10 = vadd.s32 %v2991_v48, %v1055_v16  ;;  %v1505_v43 = vmul.f32 %v1372_v45, %v1372_v45  ;;  %v1506_v62 = vmul.f32 %v1373_v39, %v1373_v39  ;;  %v1374_v59 = vsel %vm1182_vm11, %v3221_v53, 0.0 }
 0x167   : > { %v1428_v40 = vadd.f32 %v1427_v14, %v1365_v21  ;;  %v1560_v25 = vadd.f32 %v1559_v47, %v1497_v63  ;;  %vm1184_vm13 = vcmp.lt.s32.totalorder %v1120_v22, 5488  ;;  %v1375_v8 = vsel %vm1183_vm12, %v3241_v11, 0.0 }
 0x168   : > { %v1122_v41 = vadd.s32 %v2991_v48, %v1056_v2  ;;  %vm1185_vm14 = vcmp.lt.s32.totalorder %v1121_v10, 5488  ;;  %v1507_v23 = vmul.f32 %v1374_v59, %v1374_v59  ;;  %v1508_v63 = vmul.f32 %v1375_v8, %v1375_v8 }
 0x169   : > { %v1561_v35 = vadd.f32 %v1560_v25, %v1498_v12  ;;  %v1429_v38 = vadd.f32 %v1428_v40, %v1366_v54  ;;  %v1376_v47 = vsel %vm1184_vm13, %v3235_v26, 0.0  ;;  %v1377_v14 = vsel %vm1185_vm14, %v3257_v36, 0.0 }
 0x16a   : > { %vm1186_vm15 = vcmp.lt.s32.totalorder %v1122_v41, 5488  ;;  %v1509_v53 = vmul.f32 %v1376_v47, %v1376_v47  ;;  %v1510_v46 = vmul.f32 %v1377_v14, %v1377_v14  ;;  %vm1581_vm0 = vcmask 1040384  }
 0x16b   : > { %v1430_v7 = vadd.f32 %v1429_v38, %v1367_v61  ;;  %v1562_v30 = vadd.f32 %v1561_v35, %v1499_v24  ;;  %v1378_v48 = vsel %vm1186_vm15, %v3253_v44, 0.0  ;;  %vm1583_vm1 = vcmask 1041408  }
 0x16c   : > { %v1511_v29 = vmul.f32 %v1378_v48, %v1378_v48 }
 0x16d   : > { %v1563_v57 = vadd.f32 %v1562_v30, %v1500_v17  ;;  %v1431_v0 = vadd.f32 %v1430_v7, %v1368_v28 }
 0x16f   : > { %v1432_v3 = vadd.f32 %v1431_v0, %v1369_v37  ;;  %v1564_v52 = vadd.f32 %v1563_v57, %v1501_v42 }
 0x171   : > { %v1565_v15 = vadd.f32 %v1564_v52, %v1502_v51  ;;  %v1433_v1 = vadd.f32 %v1432_v3, %v1370_v58 }
 0x173   : > { %v1434_v31 = vadd.f32 %v1433_v1, %v1371_v27  ;;  %v1566_v5 = vadd.f32 %v1565_v15, %v1503_v32 }
 0x175   : > { %v1567_v20 = vadd.f32 %v1566_v5, %v1504_v34  ;;  %v1435_v21 = vadd.f32 %v1434_v31, %v1372_v45 }
 0x177   : > { %v1436_v19 = vadd.f32 %v1435_v21, %v1373_v39  ;;  %v1568_v6 = vadd.f32 %v1567_v20, %v1505_v43 }
 0x179   : > { %v1569_v50 = vadd.f32 %v1568_v6, %v1506_v62  ;;  %v1437_v33 = vadd.f32 %v1436_v19, %v1374_v59 }
 0x17b   : > { %v1438_v12 = vadd.f32 %v1437_v33, %v1375_v8  ;;  %v1570_v54 = vadd.f32 %v1569_v50, %v1507_v23 }
 0x17d   : > { %v1571_v61 = vadd.f32 %v1570_v54, %v1508_v63  ;;  %v1439_v11 = vadd.f32 %v1438_v12, %v1376_v47 }
 0x17f   : > { %v1440_v40 = vadd.f32 %v1439_v11, %v1377_v14  ;;  %v1572_v25 = vadd.f32 %v1571_v61, %v1509_v53 }
 0x181   : > { %v1441_v9 = vadd.f32 %v1440_v40, %v1378_v48  ;;  %v1573_v56 = vadd.f32 %v1572_v25, %v1510_v46 }
 0x183   : > { %v1442_v4 = vrot.slane %v1441_v9, 4  ;;  %v1574_v26 = vadd.f32 %v1573_v56, %v1511_v29 }
 0x185   : > { %v1443_v36 = vadd.f32 %v1442_v4, %v1441_v9  ;;  %v1575_v24 = vrot.slane %v1574_v26, 4 }
 0x187   : > { %v1444_v35 = vrot.slane %v1443_v36, 2  ;;  %v1576_v38 = vadd.f32 %v1575_v24, %v1574_v26 }
 0x189   : > { %v1445_v17 = vadd.f32 %v1444_v35, %v1443_v36  ;;  %v1577_v28 = vrot.slane %v1576_v38, 2 }
 0x18b   : > { %v1446_v37 = vrot.slane %v1445_v17, 1  ;;  %v1578_v18 = vadd.f32 %v1577_v28, %v1576_v38 }
 0x18d   : > { %v1579_v7 = vrot.slane %v1578_v18, 1  ;;  %v1447_v44 = vadd.f32 %v1446_v37, %v1445_v17  ;;  %1596 = sbr.rel (!%p2602_p4) target bundleno = 476 (0x1dc), region = 40 }
 0x18f   : > { %v1580_v30 = vadd.f32 %v1579_v7, %v1578_v18 }
 0x191   : > { %v1582_v49 = vsel %vm1581_vm0, %v1447_v44, %v1580_v30 }
 0x192   : > { %v1584_v55 = vsel %vm1583_vm1, %v1582_v49, 0.0 }
 0x193   : > { %1585 = vst [vmem:[%s256_s15] sm:$0xff] %v1584_v55 }
 0x194   : > { %s3582_s16 = smov (!%p1599_p9, %s1598_s16), 64 }
 0x195   : > { %s2097_s24 = sshll.u32 %s3582_s16, 7 }
 0x196   : > { %p2100_p10 = scmp.eq.s32.totalorder %s2097_s24, 0 }
 0x197   : > { %s3373_s27 = sshrl.u32 (!%p2100_p10), %s3582_s16, 6 }
 0x198   : > { %1607 = sbr.rel (%p2100_p10) target bundleno = 476 (0x1dc), region = 44  ;;  %p2101_p11 = scmp.le.s32.totalorder (!%p2100_p10), %s3373_s27, 0 }
 0x19f   : > { %2031 = sbr.rel (%p2101_p11) target bundleno = 455 (0x1c7), region = 132  ;;  %s3573_s21 = smov (!%p2101_p11), %s3367_s23 }
 0x1a0   : > { %s3574_s26 = smov (!%p2101_p11), %s3003_s18  ;;  %s3382_s8 = smov (!%p2101_p11), 0  }
 0x1a1   : > { %s3384_s28 = smov (!%p2101_p11), 0  }
 0x1a6 LB: >> { %v1795_v42 = vld [vmem:[%s2521_s26] sm:$0xff]  ;;  %v1797_v57 = vld [vmem:[%s2521_s26 + $0x8] sm:$0xff]  ;;  %v1799_v0 = vld [vmem:[%s2521_s26 + $0x10] sm:$0xff]  ;;  %s1923_s29 = sadd.s32 1, %s2525_s8  ;;  %s1789_s28 = sadd.s32 1, %s2529_s28   ;;  %s2529_s28 = sphi %s3384_s28, %s1789_s28   ;;  %s2525_s8 = sphi %s3382_s8, %s3577_s8   ;;  %s2521_s26 = sphi %s3574_s26, %s3576_s26   ;;  %s2517_s21 = sphi %s3573_s21, %s3575_s21  }
 0x1a7   : >> { %1796 = vst [vmem:[%s2517_s21] sm:$0xff] %v1795_v42  ;;  %1798 = vst [vmem:[%s2517_s21 + $0x8] sm:$0xff] %v1797_v57  ;;  %v1801_v51 = vld [vmem:[%s2521_s26 + $0x18] sm:$0xff]  ;;  %v1803_v58 = vld [vmem:[%s2521_s26 + $0x20] sm:$0xff]  ;;  %p1924_p12 = scmp.ge.s32.totalorder %s1923_s29, %s3373_s27  ;;  %p1788_p13 = scmp.ge.s32.totalorder %s1789_s28, %s3373_s27 }
 0x1a8   : >> { %1800 = vst [vmem:[%s2517_s21 + $0x10] sm:$0xff] %v1799_v0  ;;  %v1805_v27 = vld [vmem:[%s2521_s26 + $0x28] sm:$0xff]  ;;  %1802 = vst [vmem:[%s2517_s21 + $0x18] sm:$0xff] %v1801_v51  ;;  %v1807_v60 = vld [vmem:[%s2521_s26 + $0x30] sm:$0xff] }
 0x1a9   : >> { %1804 = vst [vmem:[%s2517_s21 + $0x20] sm:$0xff] %v1803_v58  ;;  %1806 = vst [vmem:[%s2517_s21 + $0x28] sm:$0xff] %v1805_v27  ;;  %v1809_v13 = vld [vmem:[%s2521_s26 + $0x38] sm:$0xff]  ;;  %v1811_v3 = vld [vmem:[%s2521_s26 + $0x40] sm:$0xff]  ;;  %s3584_s29 = smov (%p1924_p12, %s1923_s29), 0 }
 0x1aa   : >> { %1808 = vst [vmem:[%s2517_s21 + $0x30] sm:$0xff] %v1807_v60  ;;  %1810 = vst [vmem:[%s2517_s21 + $0x38] sm:$0xff] %v1809_v13  ;;  %v1813_v52 = vld [vmem:[%s2521_s26 + $0x48] sm:$0xff]  ;;  %v1815_v16 = vld [vmem:[%s2521_s26 + $0x50] sm:$0xff]  ;;  %s2102_s30 = sshll.u32 %s3584_s29, 9  ;;  %s3577_s8 = smov %s3584_s29 }
 0x1ab   : >> { %1812 = vst [vmem:[%s2517_s21 + $0x40] sm:$0xff] %v1811_v3  ;;  %v1817_v32 = vld [vmem:[%s2521_s26 + $0x58] sm:$0xff]  ;;  %1814 = vst [vmem:[%s2517_s21 + $0x48] sm:$0xff] %v1813_v52  ;;  %v1819_v15 = vld [vmem:[%s2521_s26 + $0x60] sm:$0xff]  ;;  %s3440_s7 = scalar_lea.vmem %s3003_s18, %s2102_s30 [#allocation2]   ;;  %s3443_s6 = scalar_lea.vmem %s3367_s23, %s2102_s30  }
 0x1ac   : >> { %1816 = vst [vmem:[%s2517_s21 + $0x50] sm:$0xff] %v1815_v16  ;;  %1818 = vst [vmem:[%s2517_s21 + $0x58] sm:$0xff] %v1817_v32  ;;  %v1821_v1 = vld [vmem:[%s2521_s26 + $0x68] sm:$0xff]  ;;  %v1823_v34 = vld [vmem:[%s2521_s26 + $0x70] sm:$0xff] }
 0x1ad   : >> { %1820 = vst [vmem:[%s2517_s21 + $0x60] sm:$0xff] %v1819_v15  ;;  %1822 = vst [vmem:[%s2517_s21 + $0x68] sm:$0xff] %v1821_v1  ;;  %v1825_v45 = vld [vmem:[%s2521_s26 + $0x78] sm:$0xff]  ;;  %v1827_v39 = vld [vmem:[%s2521_s26 + $0x80] sm:$0xff] }
 0x1ae   : >> { %1824 = vst [vmem:[%s2517_s21 + $0x70] sm:$0xff] %v1823_v34  ;;  %v1829_v22 = vld [vmem:[%s2521_s26 + $0x88] sm:$0xff]  ;;  %1826 = vst [vmem:[%s2517_s21 + $0x78] sm:$0xff] %v1825_v45  ;;  %v1831_v31 = vld [vmem:[%s2521_s26 + $0x90] sm:$0xff] }
 0x1af   : >> { %1828 = vst [vmem:[%s2517_s21 + $0x80] sm:$0xff] %v1827_v39  ;;  %1830 = vst [vmem:[%s2517_s21 + $0x88] sm:$0xff] %v1829_v22  ;;  %v1833_v5 = vld [vmem:[%s2521_s26 + $0x98] sm:$0xff]  ;;  %v1835_v2 = vld [vmem:[%s2521_s26 + $0xa0] sm:$0xff] }
 0x1b0   : >> { %1832 = vst [vmem:[%s2517_s21 + $0x90] sm:$0xff] %v1831_v31  ;;  %1834 = vst [vmem:[%s2517_s21 + $0x98] sm:$0xff] %v1833_v5  ;;  %v1837_v10 = vld [vmem:[%s2521_s26 + $0xa8] sm:$0xff]  ;;  %v1839_v43 = vld [vmem:[%s2521_s26 + $0xb0] sm:$0xff] }
 0x1b1   : >> { %1836 = vst [vmem:[%s2517_s21 + $0xa0] sm:$0xff] %v1835_v2  ;;  %v1841_v20 = vld [vmem:[%s2521_s26 + $0xb8] sm:$0xff]  ;;  %1838 = vst [vmem:[%s2517_s21 + $0xa8] sm:$0xff] %v1837_v10  ;;  %v1843_v21 = vld [vmem:[%s2521_s26 + $0xc0] sm:$0xff] }
 0x1b2   : >> { %1840 = vst [vmem:[%s2517_s21 + $0xb0] sm:$0xff] %v1839_v43  ;;  %1842 = vst [vmem:[%s2517_s21 + $0xb8] sm:$0xff] %v1841_v20  ;;  %v1845_v62 = vld [vmem:[%s2521_s26 + $0xc8] sm:$0xff]  ;;  %v1847_v59 = vld [vmem:[%s2521_s26 + $0xd0] sm:$0xff] }
 0x1b3   : >> { %1844 = vst [vmem:[%s2517_s21 + $0xc0] sm:$0xff] %v1843_v21  ;;  %1846 = vst [vmem:[%s2517_s21 + $0xc8] sm:$0xff] %v1845_v62  ;;  %v1849_v8 = vld [vmem:[%s2521_s26 + $0xd8] sm:$0xff]  ;;  %v1851_v19 = vld [vmem:[%s2521_s26 + $0xe0] sm:$0xff] }
 0x1b4   : >> { %1848 = vst [vmem:[%s2517_s21 + $0xd0] sm:$0xff] %v1847_v59  ;;  %v1853_v6 = vld [vmem:[%s2521_s26 + $0xe8] sm:$0xff]  ;;  %1850 = vst [vmem:[%s2517_s21 + $0xd8] sm:$0xff] %v1849_v8  ;;  %v1855_v41 = vld [vmem:[%s2521_s26 + $0xf0] sm:$0xff] }
 0x1b5   : >> { %1852 = vst [vmem:[%s2517_s21 + $0xe0] sm:$0xff] %v1851_v19  ;;  %1854 = vst [vmem:[%s2517_s21 + $0xe8] sm:$0xff] %v1853_v6  ;;  %v1857_v23 = vld [vmem:[%s2521_s26 + $0xf8] sm:$0xff]  ;;  %v1859_v50 = vld [vmem:[%s2521_s26 + $0x100] sm:$0xff] }
 0x1b6   : >> { %1856 = vst [vmem:[%s2517_s21 + $0xf0] sm:$0xff] %v1855_v41  ;;  %1858 = vst [vmem:[%s2517_s21 + $0xf8] sm:$0xff] %v1857_v23  ;;  %v1861_v33 = vld [vmem:[%s2521_s26 + $0x108] sm:$0xff]  ;;  %v1863_v63 = vld [vmem:[%s2521_s26 + $0x110] sm:$0xff] }
 0x1b7   : >> { %1860 = vst [vmem:[%s2517_s21 + $0x100] sm:$0xff] %v1859_v50  ;;  %v1865_v47 = vld [vmem:[%s2521_s26 + $0x118] sm:$0xff]  ;;  %1862 = vst [vmem:[%s2517_s21 + $0x108] sm:$0xff] %v1861_v33  ;;  %v1867_v14 = vld [vmem:[%s2521_s26 + $0x120] sm:$0xff] }
 0x1b8   : >> { %1864 = vst [vmem:[%s2517_s21 + $0x110] sm:$0xff] %v1863_v63  ;;  %1866 = vst [vmem:[%s2517_s21 + $0x118] sm:$0xff] %v1865_v47  ;;  %v1869_v12 = vld [vmem:[%s2521_s26 + $0x128] sm:$0xff]  ;;  %v1871_v54 = vld [vmem:[%s2521_s26 + $0x130] sm:$0xff] }
 0x1b9   : >> { %1868 = vst [vmem:[%s2517_s21 + $0x120] sm:$0xff] %v1867_v14  ;;  %1870 = vst [vmem:[%s2517_s21 + $0x128] sm:$0xff] %v1869_v12  ;;  %v1873_v53 = vld [vmem:[%s2521_s26 + $0x138] sm:$0xff]  ;;  %v1875_v61 = vld [vmem:[%s2521_s26 + $0x140] sm:$0xff] }
 0x1ba   : >> { %1872 = vst [vmem:[%s2517_s21 + $0x130] sm:$0xff] %v1871_v54  ;;  %v1877_v11 = vld [vmem:[%s2521_s26 + $0x148] sm:$0xff]  ;;  %1874 = vst [vmem:[%s2517_s21 + $0x138] sm:$0xff] %v1873_v53  ;;  %v1879_v46 = vld [vmem:[%s2521_s26 + $0x150] sm:$0xff] }
 0x1bb   : >> { %1876 = vst [vmem:[%s2517_s21 + $0x140] sm:$0xff] %v1875_v61  ;;  %1878 = vst [vmem:[%s2517_s21 + $0x148] sm:$0xff] %v1877_v11  ;;  %v1881_v48 = vld [vmem:[%s2521_s26 + $0x158] sm:$0xff]  ;;  %v1883_v40 = vld [vmem:[%s2521_s26 + $0x160] sm:$0xff] }
 0x1bc   : >> { %1880 = vst [vmem:[%s2517_s21 + $0x150] sm:$0xff] %v1879_v46  ;;  %1882 = vst [vmem:[%s2517_s21 + $0x158] sm:$0xff] %v1881_v48  ;;  %v1885_v25 = vld [vmem:[%s2521_s26 + $0x168] sm:$0xff]  ;;  %v1887_v29 = vld [vmem:[%s2521_s26 + $0x170] sm:$0xff] }
 0x1bd   : >> { %1884 = vst [vmem:[%s2517_s21 + $0x160] sm:$0xff] %v1883_v40  ;;  %v1889_v9 = vld [vmem:[%s2521_s26 + $0x178] sm:$0xff]  ;;  %1886 = vst [vmem:[%s2517_s21 + $0x168] sm:$0xff] %v1885_v25  ;;  %v1891_v56 = vld [vmem:[%s2521_s26 + $0x180] sm:$0xff] }
 0x1be   : >> { %1888 = vst [vmem:[%s2517_s21 + $0x170] sm:$0xff] %v1887_v29  ;;  %1890 = vst [vmem:[%s2517_s21 + $0x178] sm:$0xff] %v1889_v9  ;;  %v1893_v4 = vld [vmem:[%s2521_s26 + $0x188] sm:$0xff]  ;;  %v1895_v26 = vld [vmem:[%s2521_s26 + $0x190] sm:$0xff] }
 0x1bf   : >> { %1892 = vst [vmem:[%s2517_s21 + $0x180] sm:$0xff] %v1891_v56  ;;  %1894 = vst [vmem:[%s2517_s21 + $0x188] sm:$0xff] %v1893_v4  ;;  %v1897_v36 = vld [vmem:[%s2521_s26 + $0x198] sm:$0xff]  ;;  %v1899_v24 = vld [vmem:[%s2521_s26 + $0x1a0] sm:$0xff] }
 0x1c0   : >> { %1896 = vst [vmem:[%s2517_s21 + $0x190] sm:$0xff] %v1895_v26  ;;  %v1901_v35 = vld [vmem:[%s2521_s26 + $0x1a8] sm:$0xff]  ;;  %1898 = vst [vmem:[%s2517_s21 + $0x198] sm:$0xff] %v1897_v36  ;;  %v1903_v38 = vld [vmem:[%s2521_s26 + $0x1b0] sm:$0xff]  ;;  %1791 = sbr.rel (!%p1788_p13) target bundleno = 422 (0x1a6), region = 138 }
 0x1c1   : >> { %1900 = vst [vmem:[%s2517_s21 + $0x1a0] sm:$0xff] %v1899_v24  ;;  %1902 = vst [vmem:[%s2517_s21 + $0x1a8] sm:$0xff] %v1901_v35  ;;  %v1905_v17 = vld [vmem:[%s2521_s26 + $0x1b8] sm:$0xff]  ;;  %v1907_v28 = vld [vmem:[%s2521_s26 + $0x1c0] sm:$0xff] }
 0x1c2   : >> { %1904 = vst [vmem:[%s2517_s21 + $0x1b0] sm:$0xff] %v1903_v38  ;;  %1906 = vst [vmem:[%s2517_s21 + $0x1b8] sm:$0xff] %v1905_v17  ;;  %v1909_v37 = vld [vmem:[%s2521_s26 + $0x1c8] sm:$0xff]  ;;  %v1911_v18 = vld [vmem:[%s2521_s26 + $0x1d0] sm:$0xff] }
 0x1c3   : >> { %1908 = vst [vmem:[%s2517_s21 + $0x1c0] sm:$0xff] %v1907_v28  ;;  %v1913_v7 = vld [vmem:[%s2521_s26 + $0x1d8] sm:$0xff]  ;;  %1910 = vst [vmem:[%s2517_s21 + $0x1c8] sm:$0xff] %v1909_v37  ;;  %v1915_v44 = vld [vmem:[%s2521_s26 + $0x1e0] sm:$0xff] }
 0x1c4   : >> { %1912 = vst [vmem:[%s2517_s21 + $0x1d0] sm:$0xff] %v1911_v18  ;;  %1914 = vst [vmem:[%s2517_s21 + $0x1d8] sm:$0xff] %v1913_v7  ;;  %v1917_v30 = vld [vmem:[%s2521_s26 + $0x1e8] sm:$0xff]  ;;  %v1919_v49 = vld [vmem:[%s2521_s26 + $0x1f0] sm:$0xff] }
 0x1c5   : >> { %1916 = vst [vmem:[%s2517_s21 + $0x1e0] sm:$0xff] %v1915_v44  ;;  %1918 = vst [vmem:[%s2517_s21 + $0x1e8] sm:$0xff] %v1917_v30  ;;  %v1921_v55 = vld [vmem:[%s2521_s26 + $0x1f8] sm:$0xff]  ;;  %s3576_s26 = smov %s3440_s7 }
 0x1c6   : >> { %1920 = vst [vmem:[%s2517_s21 + $0x1f0] sm:$0xff] %v1919_v49  ;;  %1922 = vst [vmem:[%s2517_s21 + $0x1f8] sm:$0xff] %v1921_v55  ;;  %s3575_s21 = smov %s3443_s6 }
 0x1c7 PF: > { %s3548_s9 = sand.u32 63, %s3582_s16   ;;  %s2113_s10 = sshll.u32 %s3373_s27, 9 }
 0x1c8   : > { %s1934_s11 = scalar_lea.vmem %s3003_s18, %s2113_s10 [#allocation2]   ;;  %s1936_s12 = scalar_lea.vmem %s3367_s23, %s2113_s10  }
 0x1c9   : > { %p2107_p0 = scmp.le.s32.totalorder %s3548_s9, 0 }
 0x1ca   : > { %s2531_s13 = smov (!%p2107_p0), %s1936_s12   ;;  %s2535_s14 = smov (!%p2107_p0), %s1934_s11  }
 0x1cb   : > { %2045 = sbr.rel (%p2107_p0) target bundleno = 476 (0x1dc), region = 143  ;;  %s2539_s15 = smov (!%p2107_p0), 0  }
 0x1cc   : > { %s2543_s17 = smov (!%p2107_p0), 0  }
 0x1d2 LB: >> { %v1946_v42 = vld [vmem:[%s2537_s14] sm:$0xff]  ;;  %s1948_s16 = sadd.s32 1, %s2541_s15  ;;  %s1940_s17 = sadd.s32 1, %s2545_s17   ;;  %s2545_s17 = sphi %s2543_s17, %s1940_s17   ;;  %s2541_s15 = sphi %s2539_s15, %s2540_s15   ;;  %s2537_s14 = sphi %s2535_s14, %s1953_s14   ;;  %s2533_s13 = sphi %s2531_s13, %s1954_s13  }
 0x1d3   : >> { %1947 = vst [vmem:[%s2533_s13] sm:$0xff] %v1946_v42  ;;  %p1949_p1 = scmp.ge.s32.totalorder %s1948_s16, %s3548_s9  ;;  %p1939_p2 = scmp.ge.s32.totalorder %s1940_s17, %s3548_s9 }
 0x1d5   : >> { %s3586_s16 = smov (%p1949_p1, %s1948_s16), 0  ;;  %1942 = sbr.rel (!%p1939_p2) target bundleno = 466 (0x1d2), region = 149 }
 0x1d6   : >> { %s2108_s18 = sshll.u32 %s3586_s16, 3  ;;  %s2540_s15 = smov %s3586_s16  }
 0x1d7   : >> { %s1953_s14 = scalar_lea.vmem %s1934_s11, %s2108_s18 [#allocation2]   ;;  %s1954_s13 = scalar_lea.vmem %s1936_s12, %s2108_s18  }
 0x1dc PF: > { %p13_p3 = scmp.ge.s32.totalorder %s2592_s22, 13   ;;  %s3578_s18 = smov %s2509_s19 }
 0x1dd   : > { %s3579_s19 = smov %s2600_s25  ;;  %s3580_s20 = smov %s2592_s22 }
 0x1de   :  { %15 = sbr.rel (!%p13_p3) target bundleno = 2 (0x2), region = 160 }

// kernel: block_forward.3
= control target key start
LH: loop header
LB: loop body
LE: loop exit
PB: predicated region body
PF: predicated region fallthrough
CT: control target
= control target key end

     0   :  { %s2023_s15 = smov 0   ;;  %s2025_s16 = smov 0   ;;  %s2873_s0 = inlined_call_operand.vmem [shape: f32[3456,256], index: 0, kind: input, shape index: {}]   ;;  %s2874_s1 = inlined_call_operand.vmem [shape: f32[1,256], index: 1, kind: input, shape index: {}]   ;;  %s2875_s2 = inlined_call_operand.vmem [shape: f32[1,256], index: 2, kind: input, shape index: {}]   ;;  %s2876_s3 = inlined_call_operand.vmem [shape: f32[256,128], index: 3, kind: input, shape index: {}]   ;;  %s2877_s4 = inlined_call_operand.vmem [shape: f32[3456,128], index: 4, kind: output, shape index: {}]  }
   0x1   :  { %s2027_s17 = smov 0  }
   0x2 LB: > { %s2036_s18 = sadd.s32 4294967295, %s1963_s17   ;;  %s2038_s19 = sadd.s32 1, %s1963_s17   ;;  %s1963_s17 = sphi %s2027_s17, %s2886_s17   ;;  %s1959_s16 = sphi %s2025_s16, %s2885_s16   ;;  %s1955_s15 = sphi %s2023_s15, %s2884_s15  }
   0x3   : > { %s107_s20 = ssub.s32 %s1963_s17, %s2038_s19  ;;  %s110_s21 = sadd.s32 1, %s1959_s16 }
   0x4   : > { %p108_p0 = scmp.eq.s32.totalorder %s107_s20, 0  ;;  %p120_p1 = scmp.ne.s32.totalorder %s1959_s16, %s1955_s15 }
   0x5   : > { %p121_p2 = scmp.eq.s32.totalorder %s2036_s18, 6  ;;  %p1714_p3 = scmp.ge.s32.totalorder %s1963_s17, 1 }
   0x6   : > { %s2046_s22 = scalar_select %p108_p0, %s1959_s16, %s110_s21  }
   0x7   : > { %p2048_p4 = por %p121_p2, %p120_p1  ;;  %p174_p5 = scmp.lt.s32.totalorder %s1963_s17, 8 }
   0x9   : > { %p175_p6 = pnand %p1714_p3, %p174_p5 }
   0xa   : > { %v763_v0 = vld [vmem:[%s2876_s3] sm:$0xff] (!%p175_p6)  ;;  %v764_v1 = vld [vmem:[%s2876_s3 + $0x8] sm:$0xff] (!%p175_p6)  ;;  %v765_v2 = vld [vmem:[%s2876_s3 + $0x10] sm:$0xff] (!%p175_p6)  ;;  %s2062_s30 = sshll.u32 (!%p175_p6), %s2036_s18, 6  ;;  %v357_v3 = vlaneseq (!%p175_p6)  ;;  %v1997_v4 = vmov (!%p175_p6), 0.0|0.0  }
   0xb   : > { %178 = sbr.rel (%p175_p6) target bundleno = 485 (0x1e5), region = 36  ;;  %1740 = vmatprep.subr.bf16.mxu0 (!%p175_p6), %v1997_v4  ;;  %1788 = vmatprep.subr.bf16.mxu1 (!%p175_p6), %v1997_v4  ;;  %v1741_v5 = vpack.c.bf16 (!%p175_p6), %v764_v1, %v763_v0  ;;  %v766_v6 = vld [vmem:[%s2876_s3 + $0x18] sm:$0xff] (!%p175_p6)  ;;  %p211_p7 = scmp.lt.s32.totalorder (!%p175_p6), %s2062_s30, 431  ;;  %v767_v8 = vld [vmem:[%s2876_s3 + $0x20] sm:$0xff] (!%p175_p6)  ;;  %v768_v9 = vld [vmem:[%s2876_s3 + $0x28] sm:$0xff] (!%p175_p6) }
   0xc   : > { %v1744_v7 = vpack.c.bf16 (!%p175_p6), %v766_v6, %v765_v2  ;;  %v2079_v10 = vshrl.u32 (!%p175_p6), %v357_v3, 7  ;;  %v1747_v11 = vpack.c.bf16 (!%p175_p6), %v768_v9, %v767_v8  ;;  %v769_v12 = vld [vmem:[%s2876_s3 + $0x30] sm:$0xff] (!%p175_p6)  ;;  %v770_v13 = vld [vmem:[%s2876_s3 + $0x38] sm:$0xff] (!%p175_p6)  ;;  %v2099_v17 = vld [vmem:[%s2874_s1] sm:$0x3] (!%p175_p6) }
   0xd   : > { %1742 = vmatpush1.bf16.msra.mxu0 (!%p175_p6), %v1741_v5  ;;  %1804 = vmatpush1.bf16.msra.mxu1 (!%p175_p6), %v1741_v5  ;;  %v1750_v16 = vpack.c.bf16 (!%p175_p6), %v770_v13, %v769_v12  ;;  %v2104_v18 = vld [vmem:[%s2875_s2] sm:$0x3] (!%p175_p6)  ;;  %v772_v21 = vld [vmem:[%s2876_s3 + $0x48] sm:$0xff] (!%p175_p6)  ;;  %v773_v27 = vld [vmem:[%s2876_s3 + $0x50] sm:$0xff] (!%p175_p6) }
   0xe   : > { %1743 = vmatprep.subr.bf16.mxu0 (!%p175_p6), %v1997_v4  ;;  %1789 = vmatprep.subr.bf16.mxu1 (!%p175_p6), %v1997_v4  ;;  %v363_v14 = vsub.s32 (!%p175_p6), 1, %v2079_v10  ;;  %v771_v20 = vld [vmem:[%s2876_s3 + $0x40] sm:$0xff] (!%p175_p6)  ;;  %v774_v28 = vld [vmem:[%s2876_s3 + $0x58] sm:$0xff] (!%p175_p6)  ;;  %v776_v35 = vld [vmem:[%s2876_s3 + $0x68] sm:$0xff] (!%p175_p6)  ;;  %v359_v54 = vsub.s32 (!%p175_p6), 0, %v2079_v10 }
   0xf   : > { %v1753_v26 = vpack.c.bf16 (!%p175_p6), %v772_v21, %v771_v20  ;;  %v1756_v33 = vpack.c.bf16 (!%p175_p6), %v774_v28, %v773_v27  ;;  %v775_v34 = vld [vmem:[%s2876_s3 + $0x60] sm:$0xff] (!%p175_p6)  ;;  %v777_v37 = vld [vmem:[%s2876_s3 + $0x70] sm:$0xff] (!%p175_p6)  ;;  %v778_v38 = vld [vmem:[%s2876_s3 + $0x78] sm:$0xff] (!%p175_p6) }
  0x10   : > { %v2116_v22 = vrot.slane (!%p175_p6), %v2099_v17, %v363_v14  ;;  %v2119_v23 = vrot.slane (!%p175_p6), %v2104_v18, %v363_v14  ;;  %v1759_v36 = vpack.c.bf16 (!%p175_p6), %v776_v35, %v775_v34  ;;  %v1762_v39 = vpack.c.bf16 (!%p175_p6), %v778_v38, %v777_v37  ;;  %v779_v40 = vld [vmem:[%s2876_s3 + $0x80] sm:$0xff] (!%p175_p6)  ;;  %v780_v41 = vld [vmem:[%s2876_s3 + $0x88] sm:$0xff] (!%p175_p6)  ;;  %v781_v43 = vld [vmem:[%s2876_s3 + $0x90] sm:$0xff] (!%p175_p6) }
  0x11   : > { %1745 = vmatpush1.bf16.msra.mxu0 (!%p175_p6), %v1744_v7  ;;  %1805 = vmatpush1.bf16.msra.mxu1 (!%p175_p6), %v1744_v7  ;;  %v1765_v42 = vpack.c.bf16 (!%p175_p6), %v780_v41, %v779_v40  ;;  %v782_v44 = vld [vmem:[%s2876_s3 + $0x98] sm:$0xff] (!%p175_p6)  ;;  %v783_v46 = vld [vmem:[%s2876_s3 + $0xa0] sm:$0xff] (!%p175_p6)  ;;  %v784_v47 = vld [vmem:[%s2876_s3 + $0xa8] sm:$0xff] (!%p175_p6)  ;;  %v2199_v58 = vrot.slane (!%p175_p6), %v2099_v17, %v359_v54  ;;  %v2214_v2 = vrot.slane (!%p175_p6), %v2104_v18, %v359_v54 }
  0x12   : > { %s212_s7 = scalar_select %p211_p7, %s2062_s30, 431  ;;  %1746 = vmatprep.subr.bf16.mxu0 %v1997_v4  ;;  %1790 = vmatprep.subr.bf16.mxu1 %v1997_v4  ;;  %v1768_v45 = vpack.c.bf16 %v782_v44, %v781_v43  ;;  %v1771_v48 = vpack.c.bf16 %v784_v47, %v783_v46  ;;  %v785_v49 = vld [vmem:[%s2876_s3 + $0xb0] sm:$0xff]  ;;  %v786_v50 = vld [vmem:[%s2876_s3 + $0xb8] sm:$0xff]  ;;  %v787_v52 = vld [vmem:[%s2876_s3 + $0xc0] sm:$0xff] }
  0x13   : > { %v1774_v51 = vpack.c.bf16 %v786_v50, %v785_v49  ;;  %v788_v53 = vld [vmem:[%s2876_s3 + $0xc8] sm:$0xff]  ;;  %v789_v56 = vld [vmem:[%s2876_s3 + $0xd0] sm:$0xff]  ;;  %v790_v57 = vld [vmem:[%s2876_s3 + $0xd8] sm:$0xff]  ;;  %s1737_s26 = sshll.u32 (%p2048_p4), %s2036_s18, 9 }
  0x14   : > { %s1736_s12 = sshll.u32 %s212_s7, 4  ;;  %v1777_v55 = vpack.c.bf16 %v788_v53, %v787_v52  ;;  %v1780_v60 = vpack.c.bf16 %v790_v57, %v789_v56  ;;  %v791_v61 = vld [vmem:[%s2876_s3 + $0xe0] sm:$0xff]  ;;  %v792_v63 = vld [vmem:[%s2876_s3 + $0xe8] sm:$0xff]  ;;  %v793_v9 = vld [vmem:[%s2876_s3 + $0xf0] sm:$0xff]  ;;  %s2674_s29 = scalar_lea.vmem (%p2048_p4), %s2877_s4, %s1737_s26  }
  0x15   : > { %s2084_s17 = scalar_lea.vmem %s2873_s0, %s1736_s12  ;;  %1748 = vmatpush1.bf16.msra.mxu0 %v1747_v11  ;;  %1806 = vmatpush1.bf16.msra.mxu1 %v1747_v11  ;;  %v1783_v8 = vpack.c.bf16 %v792_v63, %v791_v61  ;;  %v794_v10 = vld [vmem:[%s2876_s3 + $0xf8] sm:$0xff] }
  0x16   : > { %v228_v15 = vld [vmem:[%s2084_s17 + $0x8] sm:$0xff]  ;;  %1749 = vmatprep.subr.bf16.mxu0 %v1997_v4  ;;  %1791 = vmatprep.subr.bf16.mxu1 %v1997_v4  ;;  %v227_v59 = vld [vmem:[%s2084_s17] sm:$0xff]  ;;  %v230_v0 = vld [vmem:[%s2084_s17 + $0x18] sm:$0xff]  ;;  %v1786_v18 = vpack.c.bf16 %v794_v10, %v793_v9 }
  0x17   : > { %v292_v19 = vld [vmem:[%s2084_s17 + $0x208] sm:$0xff]  ;;  %v368_v24 = vmul.f32 %v2116_v22, %v228_v15  ;;  %v291_v62 = vld [vmem:[%s2084_s17 + $0x200] sm:$0xff]  ;;  %v294_v1 = vld [vmem:[%s2084_s17 + $0x218] sm:$0xff]  ;;  %v367_v3 = vmul.f32 %v2199_v58, %v227_v59  ;;  %v370_v11 = vmul.f32 %v2116_v22, %v230_v0 }
  0x18   : > { %v432_v25 = vmul.f32 %v2116_v22, %v292_v19  ;;  %v431_v5 = vmul.f32 %v2199_v58, %v291_v62  ;;  %v229_v6 = vld [vmem:[%s2084_s17 + $0x10] sm:$0xff]  ;;  %v434_v12 = vmul.f32 %v2116_v22, %v294_v1  ;;  %v232_v13 = vld [vmem:[%s2084_s17 + $0x28] sm:$0xff]  ;;  %v231_v21 = vld [vmem:[%s2084_s17 + $0x20] sm:$0xff] }
  0x19   : > { %1751 = vmatpush1.bf16.msra.mxu0 %v1750_v16  ;;  %1807 = vmatpush1.bf16.msra.mxu1 %v1750_v16  ;;  %v508_v29 = vadd.f32 %v2119_v23, %v368_v24  ;;  %v293_v7 = vld [vmem:[%s2084_s17 + $0x210] sm:$0xff]  ;;  %v296_v14 = vld [vmem:[%s2084_s17 + $0x228] sm:$0xff]  ;;  %v507_v15 = vadd.f32 %v2214_v2, %v367_v3  ;;  %v369_v16 = vmul.f32 %v2199_v58, %v229_v6  ;;  %v295_v27 = vld [vmem:[%s2084_s17 + $0x220] sm:$0xff] }
  0x1a   : > { %1752 = vmatprep.subr.bf16.mxu0 %v1997_v4  ;;  %1792 = vmatprep.subr.bf16.mxu1 %v1997_v4  ;;  %v572_v30 = vadd.f32 %v2119_v23, %v432_v25  ;;  %v433_v17 = vmul.f32 %v2199_v58, %v293_v7  ;;  %v571_v19 = vadd.f32 %v2214_v2, %v431_v5  ;;  %v234_v28 = vld [vmem:[%s2084_s17 + $0x38] sm:$0xff]  ;;  %v233_v38 = vld [vmem:[%s2084_s17 + $0x30] sm:$0xff]  ;;  %v236_v43 = vld [vmem:[%s2084_s17 + $0x48] sm:$0xff] }
  0x1b   : > { %v636_v31 = vmax.f32 %v508_v29, 0.0  ;;  %v372_v20 = vmul.f32 %v2116_v22, %v232_v13  ;;  %v510_v24 = vadd.f32 %v2119_v23, %v370_v11  ;;  %v574_v25 = vadd.f32 %v2119_v23, %v434_v12  ;;  %v298_v29 = vld [vmem:[%s2084_s17 + $0x238] sm:$0xff]  ;;  %v300_v44 = vld [vmem:[%s2084_s17 + $0x248] sm:$0xff]  ;;  %v235_v53 = vld [vmem:[%s2084_s17 + $0x40] sm:$0xff] }
  0x1c   : > { %v700_v32 = vmax.f32 %v572_v30, 0.0  ;;  %v635_v30 = vmax.f32 %v507_v15, 0.0  ;;  %v699_v34 = vmax.f32 %v571_v19, 0.0  ;;  %v374_v37 = vmul.f32 %v2116_v22, %v234_v28  ;;  %v299_v54 = vld [vmem:[%s2084_s17 + $0x240] sm:$0xff]  ;;  %v302_v61 = vld [vmem:[%s2084_s17 + $0x258] sm:$0xff]  ;;  %v301_v13 = vld [vmem:[%s2084_s17 + $0x250] sm:$0xff] }
  0x1d   : > { %1754 = vmatpush1.bf16.msra.mxu0 %v1753_v26  ;;  %1808 = vmatpush1.bf16.msra.mxu1 %v1753_v26  ;;  %v436_v26 = vmul.f32 %v2116_v22, %v296_v14  ;;  %v512_v35 = vadd.f32 %v2119_v23, %v372_v20  ;;  %v438_v41 = vmul.f32 %v2116_v22, %v298_v29  ;;  %v240_v14 = vld [vmem:[%s2084_s17 + $0x68] sm:$0xff] }
  0x1e   : > { %1755 = vmatprep.subr.bf16.mxu0 %v1997_v4  ;;  %1793 = vmatprep.subr.bf16.mxu1 %v1997_v4  ;;  %v376_v57 = vmul.f32 %v2116_v22, %v236_v43  ;;  %v440_v59 = vmul.f32 %v2116_v22, %v300_v44  ;;  %v375_v0 = vmul.f32 %v2199_v58, %v235_v53  ;;  %v304_v15 = vld [vmem:[%s2084_s17 + $0x268] sm:$0xff] }
  0x1f   : > { %859 = vmatprep.mubr.f32.mxu0 %v636_v31  ;;  %1019 = vmatprep.mubr.f32.mxu1 %v700_v32  ;;  %v509_v31 = vadd.f32 %v2214_v2, %v369_v16  ;;  %v573_v32 = vadd.f32 %v2214_v2, %v433_v17  ;;  %v576_v40 = vadd.f32 %v2119_v23, %v436_v26  ;;  %v640_v49 = vmax.f32 %v512_v35, 0.0  ;;  %v239_v26 = vld [vmem:[%s2084_s17 + $0x60] sm:$0xff] }
  0x20   : > { %v578_v56 = vadd.f32 %v2119_v23, %v438_v41  ;;  %v439_v1 = vmul.f32 %v2199_v58, %v299_v54  ;;  %v516_v10 = vadd.f32 %v2119_v23, %v376_v57  ;;  %v580_v11 = vadd.f32 %v2119_v23, %v440_v59  ;;  %v241_v41 = vld [vmem:[%s2084_s17 + $0x70] sm:$0xff]  ;;  %v243_v57 = vld [vmem:[%s2084_s17 + $0x80] sm:$0xff] }
  0x21   : > { %1757 = vmatpush1.bf16.msra.mxu0 %v1756_v33  ;;  %1809 = vmatpush1.bf16.msra.mxu1 %v1756_v33  ;;  %v371_v33 = vmul.f32 %v2199_v58, %v231_v21  ;;  %v701_v46 = vmax.f32 %v573_v32, 0.0  ;;  %v442_v12 = vmul.f32 %v2116_v22, %v302_v61  ;;  %v515_v17 = vadd.f32 %v2214_v2, %v375_v0  ;;  %v242_v32 = vld [vmem:[%s2084_s17 + $0x78] sm:$0xff] }
  0x22   : > { %1758 = vmatprep.subr.bf16.mxu0 %v1997_v4  ;;  %1794 = vmatprep.subr.bf16.mxu1 %v1997_v4  ;;  %v706_v9 = vmax.f32 %v578_v56, 0.0  ;;  %v708_v28 = vmax.f32 %v580_v11, 0.0  ;;  %v246_v0 = vld [vmem:[%s2084_s17 + $0x98] sm:$0xff] }
  0x23   : > { %v511_v47 = vadd.f32 %v2214_v2, %v371_v33  ;;  %v582_v29 = vadd.f32 %v2119_v23, %v442_v12  ;;  %v306_v33 = vld [vmem:[%s2084_s17 + $0x278] sm:$0xff]  ;;  %v386_v11 = vmul.f32 %v2116_v22, %v246_v0  ;;  %v245_v12 = vld [vmem:[%s2084_s17 + $0x90] sm:$0xff] }
  0x25   : > { %1760 = vmatpush1.bf16.msra.mxu0 %v1759_v36  ;;  %1810 = vmatpush1.bf16.msra.mxu1 %v1759_v36  ;;  %v435_v36 = vmul.f32 %v2199_v58, %v295_v27  ;;  %v639_v62 = vmax.f32 %v511_v47, 0.0  ;;  %v644_v27 = vmax.f32 %v516_v10, 0.0  ;;  %v710_v43 = vmax.f32 %v582_v29, 0.0  ;;  %v244_v47 = vld [vmem:[%s2084_s17 + $0x88] sm:$0xff] }
  0x26   : > { %1761 = vmatprep.subr.bf16.mxu0 %v1997_v4  ;;  %1795 = vmatprep.subr.bf16.mxu1 %v1997_v4  ;;  %v384_v56 = vmul.f32 %v2116_v22, %v244_v47 }
  0x27   : > { %v575_v50 = vadd.f32 %v2214_v2, %v435_v36 }
  0x29   : > { %1763 = vmatpush1.bf16.msra.mxu0 %v1762_v39  ;;  %1811 = vmatpush1.bf16.msra.mxu1 %v1762_v39  ;;  %v702_v39 = vmax.f32 %v574_v25, 0.0  ;;  %v703_v3 = vmax.f32 %v575_v50, 0.0  ;;  %v380_v25 = vmul.f32 %v2116_v22, %v240_v14 }
  0x2a   : > { %1764 = vmatprep.subr.bf16.mxu0 %v1997_v4  ;;  %1796 = vmatprep.subr.bf16.mxu1 %v1997_v4 }
  0x2d   : > { %1766 = vmatpush1.bf16.msra.mxu0 %v1765_v42  ;;  %1812 = vmatpush1.bf16.msra.mxu1 %v1765_v42  ;;  %v297_v42 = vld [vmem:[%s2084_s17 + $0x230] sm:$0xff] }
  0x2e   : > { %1767 = vmatprep.subr.bf16.mxu0 %v1997_v4  ;;  %1797 = vmatprep.subr.bf16.mxu1 %v1997_v4  ;;  %v437_v52 = vmul.f32 %v2199_v58, %v297_v42  ;;  %v305_v42 = vld [vmem:[%s2084_s17 + $0x270] sm:$0xff] }
  0x30   : > { %v577_v6 = vadd.f32 %v2214_v2, %v437_v52  ;;  %v445_v52 = vmul.f32 %v2199_v58, %v305_v42 }
  0x31   : > { %1769 = vmatpush1.bf16.msra.mxu0 %v1768_v45  ;;  %1813 = vmatpush1.bf16.msra.mxu1 %v1768_v45  ;;  %v637_v45 = vmax.f32 %v509_v31, 0.0  ;;  %v303_v31 = vld [vmem:[%s2084_s17 + $0x260] sm:$0xff] }
  0x32   : > { %1770 = vmatprep.subr.bf16.mxu0 %v1997_v4  ;;  %1798 = vmatprep.subr.bf16.mxu1 %v1997_v4  ;;  %v705_v20 = vmax.f32 %v577_v6, 0.0  ;;  %v585_v6 = vadd.f32 %v2214_v2, %v445_v52  ;;  %v316_v52 = vld [vmem:[%s2084_s17 + $0x2c8] sm:$0xff] }
  0x35   : > { %1772 = vmatpush1.bf16.msra.mxu0 %v1771_v48  ;;  %1814 = vmatpush1.bf16.msra.mxu1 %v1771_v48  ;;  %v373_v48 = vmul.f32 %v2199_v58, %v233_v38 }
  0x36   : > { %1773 = vmatprep.subr.bf16.mxu0 %v1997_v4  ;;  %1799 = vmatprep.subr.bf16.mxu1 %v1997_v4 }
  0x37   : > { %v513_v63 = vadd.f32 %v2214_v2, %v373_v48  ;;  %v308_v48 = vld [vmem:[%s2084_s17 + $0x288] sm:$0xff] }
  0x39   : > { %1775 = vmatpush1.bf16.msra.mxu0 %v1774_v51  ;;  %1815 = vmatpush1.bf16.msra.mxu1 %v1774_v51  ;;  %v514_v51 = vadd.f32 %v2119_v23, %v374_v37  ;;  %v641_v16 = vmax.f32 %v513_v63, 0.0  ;;  %v379_v37 = vmul.f32 %v2199_v58, %v239_v26  ;;  %v307_v63 = vld [vmem:[%s2084_s17 + $0x280] sm:$0xff] }
  0x3a   : > { %1776 = vmatprep.subr.bf16.mxu0 %v1997_v4  ;;  %1800 = vmatprep.subr.bf16.mxu1 %v1997_v4  ;;  %v447_v10 = vmul.f32 %v2199_v58, %v307_v63 }
  0x3b   : > { %v642_v5 = vmax.f32 %v514_v51, 0.0  ;;  %v519_v50 = vadd.f32 %v2214_v2, %v379_v37  ;;  %v381_v51 = vmul.f32 %v2199_v58, %v241_v41  ;;  %v314_v37 = vld [vmem:[%s2084_s17 + $0x2b8] sm:$0xff] }
  0x3d   : > { %1778 = vmatpush1.bf16.msra.mxu0 %v1777_v55  ;;  %1816 = vmatpush1.bf16.msra.mxu1 %v1777_v55  ;;  %v704_v55 = vmax.f32 %v576_v40, 0.0  ;;  %v443_v40 = vmul.f32 %v2199_v58, %v303_v31  ;;  %v311_v31 = vld [vmem:[%s2084_s17 + $0x2a0] sm:$0xff] }
  0x3e   : > { %1779 = vmatprep.subr.bf16.mxu0 %v1997_v4  ;;  %1801 = vmatprep.subr.bf16.mxu1 %v1997_v4 }
  0x41   : > { %1781 = vmatpush1.bf16.msra.mxu0 %v1780_v60  ;;  %1817 = vmatpush1.bf16.msra.mxu1 %v1780_v60  ;;  %v238_v60 = vld [vmem:[%s2084_s17 + $0x58] sm:$0xff] }
  0x42   : > { %1782 = vmatprep.subr.bf16.mxu0 %v1997_v4  ;;  %1802 = vmatprep.subr.bf16.mxu1 %v1997_v4  ;;  %v378_v7 = vmul.f32 %v2116_v22, %v238_v60 }
  0x44   : > { %v518_v21 = vadd.f32 %v2119_v23, %v378_v7  ;;  %v383_v7 = vmul.f32 %v2199_v58, %v243_v57 }
  0x45   : > { %1784 = vmatpush1.bf16.msra.mxu0 %v1783_v8  ;;  %1818 = vmatpush1.bf16.msra.mxu1 %v1783_v8  ;;  %v237_v8 = vld [vmem:[%s2084_s17 + $0x50] sm:$0xff] }
  0x46   : > { %1785 = vmatprep.subr.bf16.mxu0 %v1997_v4  ;;  %1803 = vmatprep.subr.bf16.mxu1 %v1997_v4  ;;  %v638_v4 = vmax.f32 %v510_v24, 0.0  ;;  %v377_v19 = vmul.f32 %v2199_v58, %v237_v8  ;;  %v441_v24 = vmul.f32 %v2199_v58, %v301_v13  ;;  %v646_v38 = vmax.f32 %v518_v21, 0.0 }
  0x47   : > { %v713_v21 = vmax.f32 %v585_v6, 0.0  ;;  %v254_v6 = vld [vmem:[%s2084_s17 + $0xd8] sm:$0xff] }
  0x48   : > { %v517_v36 = vadd.f32 %v2214_v2, %v377_v19  ;;  %v312_v19 = vld [vmem:[%s2084_s17 + $0x2a8] sm:$0xff] }
  0x49   : > { %1787 = vmatpush1.bf16.msra.mxu0 %v1786_v18  ;;  %1819 = vmatpush1.bf16.msra.mxu1 %v1786_v18  ;;  %v579_v18 = vadd.f32 %v2214_v2, %v439_v1  ;;  %v310_v1 = vld [vmem:[%s2084_s17 + $0x298] sm:$0xff] }
  0x4b   : > { %v707_v35 = vmax.f32 %v579_v18, 0.0  ;;  %v248_v18 = vld [vmem:[%s2084_s17 + $0xa8] sm:$0xff] }
  0x4c   : > { %860 = vmatmul.mubr.f32.vlgmr.msra.gmra.mrb[0].mxu0 %v635_v30  ;;  %1020 = vmatmul.mubr.f32.vlgmr.msra.gmra.mrb[0].mxu1 %v699_v34  ;;  %v444_v30 = vmul.f32 %v2116_v22, %v304_v15  ;;  %v643_v34 = vmax.f32 %v515_v17, 0.0  ;;  %v309_v17 = vld [vmem:[%s2084_s17 + $0x290] sm:$0xff] }
  0x4d   : > { %864 = vmatprep.mubr.f32.mxu0 %v638_v4  ;;  %1024 = vmatprep.mubr.f32.mxu1 %v702_v39  ;;  %v581_v4 = vadd.f32 %v2214_v2, %v441_v24  ;;  %v520_v39 = vadd.f32 %v2119_v23, %v380_v25  ;;  %v523_v24 = vadd.f32 %v2214_v2, %v383_v7  ;;  %v318_v7 = vld [vmem:[%s2084_s17 + $0x2d8] sm:$0xff] }
  0x4e   : > { %v584_v44 = vadd.f32 %v2119_v23, %v444_v30  ;;  %v385_v25 = vmul.f32 %v2199_v58, %v245_v12  ;;  %v449_v29 = vmul.f32 %v2199_v58, %v309_v17  ;;  %v247_v30 = vld [vmem:[%s2084_s17 + $0xa0] sm:$0xff]  ;;  %v317_v17 = vld [vmem:[%s2084_s17 + $0x2d0] sm:$0xff] }
  0x4f   : > { %v709_v53 = vmax.f32 %v581_v4, 0.0  ;;  %v648_v54 = vmax.f32 %v520_v39, 0.0  ;;  %v387_v39 = vmul.f32 %v2199_v58, %v247_v30 }
  0x50   : > { %865 = vmatmul.mubr.f32.gmra.mrb[2].mxu0 %v637_v45  ;;  %1025 = vmatmul.mubr.f32.gmra.mrb[2].mxu1 %v701_v46  ;;  %v382_v45 = vmul.f32 %v2116_v22, %v242_v32  ;;  %v446_v46 = vmul.f32 %v2116_v22, %v306_v33  ;;  %v712_v59 = vmax.f32 %v584_v44, 0.0  ;;  %v525_v4 = vadd.f32 %v2214_v2, %v385_v25  ;;  %v320_v25 = vld [vmem:[%s2084_s17 + $0x2e8] sm:$0xff] }
  0x51   : > { %869 = vmatprep.mubr.f32.mxu0 %v640_v49  ;;  %1029 = vmatprep.mubr.f32.mxu1 %v704_v55  ;;  %v645_v49 = vmax.f32 %v517_v36, 0.0  ;;  %v583_v55 = vadd.f32 %v2214_v2, %v443_v40  ;;  %v250_v36 = vld [vmem:[%s2084_s17 + $0xb8] sm:$0xff]  ;;  %v451_v40 = vmul.f32 %v2199_v58, %v311_v31 }
  0x52   : > { %v522_v60 = vadd.f32 %v2119_v23, %v382_v45  ;;  %v586_v61 = vadd.f32 %v2119_v23, %v446_v46  ;;  %v390_v44 = vmul.f32 %v2116_v22, %v250_v36  ;;  %v249_v45 = vld [vmem:[%s2084_s17 + $0xb0] sm:$0xff] }
  0x53   : > { %v711_v8 = vmax.f32 %v583_v55, 0.0  ;;  %v591_v55 = vadd.f32 %v2214_v2, %v451_v40  ;;  %v322_v40 = vld [vmem:[%s2084_s17 + $0x2f8] sm:$0xff] }
  0x54   : > { %870 = vmatmul.mubr.f32.gmra.mrb[4].mxu0 %v639_v62  ;;  %1030 = vmatmul.mubr.f32.gmra.mrb[4].mxu1 %v703_v3  ;;  %v448_v62 = vmul.f32 %v2116_v22, %v308_v48  ;;  %v647_v3 = vmax.f32 %v519_v50, 0.0  ;;  %v650_v13 = vmax.f32 %v522_v60, 0.0  ;;  %v714_v14 = vmax.f32 %v586_v61, 0.0  ;;  %v313_v50 = vld [vmem:[%s2084_s17 + $0x2b0] sm:$0xff] }
  0x55   : > { %874 = vmatprep.mubr.f32.mxu0 %v642_v5  ;;  %1034 = vmatprep.mubr.f32.mxu1 %v706_v9  ;;  %v521_v5 = vadd.f32 %v2214_v2, %v381_v51  ;;  %v524_v9 = vadd.f32 %v2119_v23, %v384_v56  ;;  %v252_v51 = vld [vmem:[%s2084_s17 + $0xc8] sm:$0xff]  ;;  %v389_v56 = vmul.f32 %v2199_v58, %v249_v45 }
  0x56   : > { %v588_v15 = vadd.f32 %v2119_v23, %v448_v62  ;;  %v453_v60 = vmul.f32 %v2199_v58, %v313_v50  ;;  %v392_v61 = vmul.f32 %v2116_v22, %v252_v51  ;;  %v251_v62 = vld [vmem:[%s2084_s17 + $0xc0] sm:$0xff] }
  0x57   : > { %v652_v26 = vmax.f32 %v524_v9, 0.0  ;;  %v719_v9 = vmax.f32 %v591_v55, 0.0  ;;  %v260_v55 = vld [vmem:[%s2084_s17 + $0x108] sm:$0xff] }
  0x58   : > { %875 = vmatmul.mubr.f32.gmra.mrb[6].mxu0 %v641_v16  ;;  %1035 = vmatmul.mubr.f32.gmra.mrb[6].mxu1 %v705_v20  ;;  %v450_v16 = vmul.f32 %v2116_v22, %v310_v1  ;;  %v649_v20 = vmax.f32 %v521_v5, 0.0  ;;  %v716_v32 = vmax.f32 %v588_v15, 0.0  ;;  %v315_v5 = vld [vmem:[%s2084_s17 + $0x2c0] sm:$0xff] }
  0x59   : > { %879 = vmatprep.mubr.f32.mxu0 %v644_v27  ;;  %1039 = vmatprep.mubr.f32.mxu1 %v708_v28  ;;  %v587_v27 = vadd.f32 %v2214_v2, %v447_v10  ;;  %v526_v28 = vadd.f32 %v2119_v23, %v386_v11  ;;  %v529_v10 = vadd.f32 %v2214_v2, %v389_v56  ;;  %v324_v56 = vld [vmem:[%s2084_s17 + $0x308] sm:$0xff] }
  0x5a   : > { %v590_v33 = vadd.f32 %v2119_v23, %v450_v16  ;;  %v391_v11 = vmul.f32 %v2199_v58, %v251_v62  ;;  %v455_v15 = vmul.f32 %v2199_v58, %v315_v5  ;;  %v253_v16 = vld [vmem:[%s2084_s17 + $0xd0] sm:$0xff]  ;;  %v323_v5 = vld [vmem:[%s2084_s17 + $0x300] sm:$0xff] }
  0x5b   : > { %v715_v41 = vmax.f32 %v587_v27, 0.0  ;;  %v654_v42 = vmax.f32 %v526_v28, 0.0  ;;  %v393_v28 = vmul.f32 %v2199_v58, %v253_v16 }
  0x5c   : > { %880 = vmatmul.mubr.f32.gmra.mrb[8].mxu0 %v643_v34  ;;  %1040 = vmatmul.mubr.f32.gmra.mrb[8].mxu1 %v707_v35  ;;  %v388_v34 = vmul.f32 %v2116_v22, %v248_v18  ;;  %v452_v35 = vmul.f32 %v2116_v22, %v312_v19  ;;  %v718_v46 = vmax.f32 %v590_v33, 0.0  ;;  %v531_v27 = vadd.f32 %v2214_v2, %v391_v11  ;;  %v326_v11 = vld [vmem:[%s2084_s17 + $0x318] sm:$0xff] }
  0x5d   : > { %884 = vmatprep.mubr.f32.mxu0 %v646_v38  ;;  %1044 = vmatprep.mubr.f32.mxu1 %v710_v43  ;;  %v651_v38 = vmax.f32 %v523_v24, 0.0  ;;  %v589_v43 = vadd.f32 %v2214_v2, %v449_v29  ;;  %v256_v24 = vld [vmem:[%s2084_s17 + $0xe8] sm:$0xff]  ;;  %v457_v29 = vmul.f32 %v2199_v58, %v317_v17 }
  0x5e   : > { %v528_v47 = vadd.f32 %v2119_v23, %v388_v34  ;;  %v592_v48 = vadd.f32 %v2119_v23, %v452_v35  ;;  %v396_v33 = vmul.f32 %v2116_v22, %v256_v24  ;;  %v255_v34 = vld [vmem:[%s2084_s17 + $0xe0] sm:$0xff] }
  0x5f   : > { %v717_v57 = vmax.f32 %v589_v43, 0.0  ;;  %v597_v43 = vadd.f32 %v2214_v2, %v457_v29  ;;  %v328_v29 = vld [vmem:[%s2084_s17 + $0x328] sm:$0xff] }
  0x60   : > { %885 = vmatmul.mubr.f32.gmra.mrb[10].mxu0 %v645_v49  ;;  %1045 = vmatmul.mubr.f32.gmra.mrb[10].mxu1 %v709_v53  ;;  %v454_v49 = vmul.f32 %v2116_v22, %v314_v37  ;;  %v653_v53 = vmax.f32 %v525_v4, 0.0  ;;  %v656_v63 = vmax.f32 %v528_v47, 0.0  ;;  %v720_v0 = vmax.f32 %v592_v48, 0.0  ;;  %v319_v4 = vld [vmem:[%s2084_s17 + $0x2e0] sm:$0xff] }
  0x61   : > { %889 = vmatprep.mubr.f32.mxu0 %v648_v54  ;;  %1049 = vmatprep.mubr.f32.mxu1 %v712_v59  ;;  %v527_v54 = vadd.f32 %v2214_v2, %v387_v39  ;;  %v530_v59 = vadd.f32 %v2119_v23, %v390_v44  ;;  %v258_v39 = vld [vmem:[%s2084_s17 + $0xf8] sm:$0xff]  ;;  %v395_v44 = vmul.f32 %v2199_v58, %v255_v34 }
  0x62   : > { %v594_v1 = vadd.f32 %v2119_v23, %v454_v49  ;;  %v459_v47 = vmul.f32 %v2199_v58, %v319_v4  ;;  %v398_v48 = vmul.f32 %v2116_v22, %v258_v39  ;;  %v257_v49 = vld [vmem:[%s2084_s17 + $0xf0] sm:$0xff] }
  0x63   : > { %v658_v12 = vmax.f32 %v530_v59, 0.0  ;;  %v725_v59 = vmax.f32 %v597_v43, 0.0  ;;  %v266_v43 = vld [vmem:[%s2084_s17 + $0x138] sm:$0xff] }
  0x64   : > { %890 = vmatmul.mubr.f32.gmra.mrb[12].mxu0 %v647_v3  ;;  %1050 = vmatmul.mubr.f32.gmra.mrb[12].mxu1 %v711_v8  ;;  %v456_v3 = vmul.f32 %v2116_v22, %v316_v52  ;;  %v655_v8 = vmax.f32 %v527_v54, 0.0  ;;  %v722_v18 = vmax.f32 %v594_v1, 0.0  ;;  %v321_v54 = vld [vmem:[%s2084_s17 + $0x2f0] sm:$0xff] }
  0x65   : > { %894 = vmatprep.mubr.f32.mxu0 %v650_v13  ;;  %1054 = vmatprep.mubr.f32.mxu1 %v714_v14  ;;  %v593_v13 = vadd.f32 %v2214_v2, %v453_v60  ;;  %v532_v14 = vadd.f32 %v2119_v23, %v392_v61  ;;  %v535_v60 = vadd.f32 %v2214_v2, %v395_v44  ;;  %v330_v44 = vld [vmem:[%s2084_s17 + $0x338] sm:$0xff] }
  0x66   : > { %v596_v19 = vadd.f32 %v2119_v23, %v456_v3  ;;  %v397_v61 = vmul.f32 %v2199_v58, %v257_v49  ;;  %v461_v1 = vmul.f32 %v2199_v58, %v321_v54  ;;  %v259_v3 = vld [vmem:[%s2084_s17 + $0x100] sm:$0xff]  ;;  %v329_v54 = vld [vmem:[%s2084_s17 + $0x330] sm:$0xff] }
  0x67   : > { %v721_v30 = vmax.f32 %v593_v13, 0.0  ;;  %v660_v31 = vmax.f32 %v532_v14, 0.0  ;;  %v399_v14 = vmul.f32 %v2199_v58, %v259_v3 }
  0x68   : > { %895 = vmatmul.mubr.f32.gmra.mrb[14].mxu0 %v649_v20  ;;  %1055 = vmatmul.mubr.f32.gmra.mrb[14].mxu1 %v713_v21  ;;  %v394_v20 = vmul.f32 %v2116_v22, %v254_v6  ;;  %v458_v21 = vmul.f32 %v2116_v22, %v318_v7  ;;  %v724_v35 = vmax.f32 %v596_v19, 0.0  ;;  %v537_v13 = vadd.f32 %v2214_v2, %v397_v61  ;;  %v332_v61 = vld [vmem:[%s2084_s17 + $0x348] sm:$0xff] }
  0x69   : > { %899 = vmatprep.mubr.f32.mxu0 %v652_v26  ;;  %1059 = vmatprep.mubr.f32.mxu1 %v716_v32  ;;  %v657_v26 = vmax.f32 %v529_v10, 0.0  ;;  %v595_v32 = vadd.f32 %v2214_v2, %v455_v15  ;;  %v262_v10 = vld [vmem:[%s2084_s17 + $0x118] sm:$0xff]  ;;  %v463_v15 = vmul.f32 %v2199_v58, %v323_v5 }
  0x6a   : > { %v534_v36 = vadd.f32 %v2119_v23, %v394_v20  ;;  %v598_v37 = vadd.f32 %v2119_v23, %v458_v21  ;;  %v402_v19 = vmul.f32 %v2116_v22, %v262_v10  ;;  %v261_v20 = vld [vmem:[%s2084_s17 + $0x110] sm:$0xff] }
  0x6b   : > { %v723_v45 = vmax.f32 %v595_v32, 0.0  ;;  %v603_v32 = vadd.f32 %v2214_v2, %v463_v15  ;;  %v334_v15 = vld [vmem:[%s2084_s17 + $0x358] sm:$0xff] }
  0x6c   : > { %900 = vmatmul.mubr.f32.gmra.mrb[16].mxu0 %v651_v38  ;;  %1060 = vmatmul.mubr.f32.gmra.mrb[16].mxu1 %v715_v41  ;;  %v460_v38 = vmul.f32 %v2116_v22, %v320_v25  ;;  %v659_v41 = vmax.f32 %v531_v27, 0.0  ;;  %v662_v50 = vmax.f32 %v534_v36, 0.0  ;;  %v726_v51 = vmax.f32 %v598_v37, 0.0  ;;  %v325_v27 = vld [vmem:[%s2084_s17 + $0x310] sm:$0xff] }
  0x6d   : > { %904 = vmatprep.mubr.f32.mxu0 %v654_v42  ;;  %1064 = vmatprep.mubr.f32.mxu1 %v718_v46  ;;  %v533_v42 = vadd.f32 %v2214_v2, %v393_v28  ;;  %v536_v46 = vadd.f32 %v2119_v23, %v396_v33  ;;  %v264_v28 = vld [vmem:[%s2084_s17 + $0x128] sm:$0xff]  ;;  %v401_v33 = vmul.f32 %v2199_v58, %v261_v20 }
  0x6e   : > { %v600_v52 = vadd.f32 %v2119_v23, %v460_v38  ;;  %v465_v36 = vmul.f32 %v2199_v58, %v325_v27  ;;  %v404_v37 = vmul.f32 %v2116_v22, %v264_v28  ;;  %v263_v38 = vld [vmem:[%s2084_s17 + $0x120] sm:$0xff] }
  0x6f   : > { %v664_v62 = vmax.f32 %v536_v46, 0.0  ;;  %v731_v46 = vmax.f32 %v603_v32, 0.0  ;;  %v272_v32 = vld [vmem:[%s2084_s17 + $0x168] sm:$0xff] }
  0x70   : > { %905 = vmatmul.mubr.f32.gmra.mrb[18].mxu0 %v653_v53  ;;  %1065 = vmatmul.mubr.f32.gmra.mrb[18].mxu1 %v717_v57  ;;  %v462_v53 = vmul.f32 %v2116_v22, %v322_v40  ;;  %v661_v57 = vmax.f32 %v533_v42, 0.0  ;;  %v728_v6 = vmax.f32 %v600_v52, 0.0  ;;  %v327_v42 = vld [vmem:[%s2084_s17 + $0x320] sm:$0xff] }
  0x71   : > { %909 = vmatprep.mubr.f32.mxu0 %v656_v63  ;;  %1069 = vmatprep.mubr.f32.mxu1 %v720_v0  ;;  %v599_v63 = vadd.f32 %v2214_v2, %v459_v47  ;;  %v538_v0 = vadd.f32 %v2119_v23, %v398_v48  ;;  %v541_v47 = vadd.f32 %v2214_v2, %v401_v33  ;;  %v336_v33 = vld [vmem:[%s2084_s17 + $0x368] sm:$0xff] }
  0x72   : > { %v602_v7 = vadd.f32 %v2119_v23, %v462_v53  ;;  %v403_v48 = vmul.f32 %v2199_v58, %v263_v38  ;;  %v467_v52 = vmul.f32 %v2199_v58, %v327_v42  ;;  %v265_v53 = vld [vmem:[%s2084_s17 + $0x130] sm:$0xff]  ;;  %v335_v42 = vld [vmem:[%s2084_s17 + $0x360] sm:$0xff] }
  0x73   : > { %v727_v16 = vmax.f32 %v599_v63, 0.0  ;;  %v666_v17 = vmax.f32 %v538_v0, 0.0  ;;  %v405_v0 = vmul.f32 %v2199_v58, %v265_v53 }
  0x74   : > { %910 = vmatmul.mubr.f32.gmra.mrb[20].mxu0 %v655_v8  ;;  %1070 = vmatmul.mubr.f32.gmra.mrb[20].mxu1 %v719_v9  ;;  %v400_v8 = vmul.f32 %v2116_v22, %v260_v55  ;;  %v464_v9 = vmul.f32 %v2116_v22, %v324_v56  ;;  %v730_v21 = vmax.f32 %v602_v7, 0.0  ;;  %v543_v63 = vadd.f32 %v2214_v2, %v403_v48  ;;  %v338_v48 = vld [vmem:[%s2084_s17 + $0x378] sm:$0xff] }
  0x75   : > { %914 = vmatprep.mubr.f32.mxu0 %v658_v12  ;;  %1074 = vmatprep.mubr.f32.mxu1 %v722_v18  ;;  %v663_v12 = vmax.f32 %v535_v60, 0.0  ;;  %v601_v18 = vadd.f32 %v2214_v2, %v461_v1  ;;  %v268_v60 = vld [vmem:[%s2084_s17 + $0x148] sm:$0xff]  ;;  %v469_v1 = vmul.f32 %v2199_v58, %v329_v54 }
  0x76   : > { %v540_v24 = vadd.f32 %v2119_v23, %v400_v8  ;;  %v604_v25 = vadd.f32 %v2119_v23, %v464_v9  ;;  %v408_v7 = vmul.f32 %v2116_v22, %v268_v60  ;;  %v267_v8 = vld [vmem:[%s2084_s17 + $0x140] sm:$0xff] }
  0x77   : > { %v729_v34 = vmax.f32 %v601_v18, 0.0  ;;  %v609_v18 = vadd.f32 %v2214_v2, %v469_v1  ;;  %v340_v1 = vld [vmem:[%s2084_s17 + $0x388] sm:$0xff] }
  0x78   : > { %915 = vmatmul.mubr.f32.gmra.mrb[22].mxu0 %v657_v26  ;;  %1075 = vmatmul.mubr.f32.gmra.mrb[22].mxu1 %v721_v30  ;;  %v466_v26 = vmul.f32 %v2116_v22, %v326_v11  ;;  %v665_v30 = vmax.f32 %v537_v13, 0.0  ;;  %v668_v4 = vmax.f32 %v540_v24, 0.0  ;;  %v732_v39 = vmax.f32 %v604_v25, 0.0  ;;  %v331_v13 = vld [vmem:[%s2084_s17 + $0x340] sm:$0xff] }
  0x79   : > { %919 = vmatprep.mubr.f32.mxu0 %v660_v31  ;;  %1079 = vmatprep.mubr.f32.mxu1 %v724_v35  ;;  %v539_v31 = vadd.f32 %v2214_v2, %v399_v14  ;;  %v542_v35 = vadd.f32 %v2119_v23, %v402_v19  ;;  %v270_v14 = vld [vmem:[%s2084_s17 + $0x158] sm:$0xff]  ;;  %v407_v19 = vmul.f32 %v2199_v58, %v267_v8 }
  0x7a   : > { %v606_v40 = vadd.f32 %v2119_v23, %v466_v26  ;;  %v471_v24 = vmul.f32 %v2199_v58, %v331_v13  ;;  %v410_v25 = vmul.f32 %v2116_v22, %v270_v14  ;;  %v269_v26 = vld [vmem:[%s2084_s17 + $0x150] sm:$0xff] }
  0x7b   : > { %v670_v49 = vmax.f32 %v542_v35, 0.0  ;;  %v737_v35 = vmax.f32 %v609_v18, 0.0  ;;  %v278_v18 = vld [vmem:[%s2084_s17 + $0x198] sm:$0xff] }
  0x7c   : > { %920 = vmatmul.mubr.f32.gmra.mrb[24].mxu0 %v659_v41  ;;  %1080 = vmatmul.mubr.f32.gmra.mrb[24].mxu1 %v723_v45  ;;  %v468_v41 = vmul.f32 %v2116_v22, %v328_v29  ;;  %v667_v45 = vmax.f32 %v539_v31, 0.0  ;;  %v734_v55 = vmax.f32 %v606_v40, 0.0  ;;  %v333_v31 = vld [vmem:[%s2084_s17 + $0x350] sm:$0xff] }
  0x7d   : > { %924 = vmatprep.mubr.f32.mxu0 %v662_v50  ;;  %1084 = vmatprep.mubr.f32.mxu1 %v726_v51  ;;  %v605_v50 = vadd.f32 %v2214_v2, %v465_v36  ;;  %v544_v51 = vadd.f32 %v2119_v23, %v404_v37  ;;  %v547_v36 = vadd.f32 %v2214_v2, %v407_v19  ;;  %v342_v19 = vld [vmem:[%s2084_s17 + $0x398] sm:$0xff] }
  0x7e   : > { %v608_v56 = vadd.f32 %v2119_v23, %v468_v41  ;;  %v409_v37 = vmul.f32 %v2199_v58, %v269_v26  ;;  %v473_v40 = vmul.f32 %v2199_v58, %v333_v31  ;;  %v271_v41 = vld [vmem:[%s2084_s17 + $0x160] sm:$0xff]  ;;  %v341_v31 = vld [vmem:[%s2084_s17 + $0x390] sm:$0xff] }
  0x7f   : > { %v733_v3 = vmax.f32 %v605_v50, 0.0  ;;  %v672_v5 = vmax.f32 %v544_v51, 0.0  ;;  %v411_v51 = vmul.f32 %v2199_v58, %v271_v41 }
  0x80   : > { %925 = vmatmul.mubr.f32.gmra.mrb[26].mxu0 %v661_v57  ;;  %1085 = vmatmul.mubr.f32.gmra.mrb[26].mxu1 %v725_v59  ;;  %v406_v57 = vmul.f32 %v2116_v22, %v266_v43  ;;  %v470_v59 = vmul.f32 %v2116_v22, %v330_v44  ;;  %v736_v9 = vmax.f32 %v608_v56, 0.0  ;;  %v549_v50 = vadd.f32 %v2214_v2, %v409_v37  ;;  %v344_v37 = vld [vmem:[%s2084_s17 + $0x3a8] sm:$0xff] }
  0x81   : > { %929 = vmatprep.mubr.f32.mxu0 %v664_v62  ;;  %1089 = vmatprep.mubr.f32.mxu1 %v728_v6  ;;  %v669_v62 = vmax.f32 %v541_v47, 0.0  ;;  %v607_v6 = vadd.f32 %v2214_v2, %v467_v52  ;;  %v274_v47 = vld [vmem:[%s2084_s17 + $0x178] sm:$0xff]  ;;  %v475_v52 = vmul.f32 %v2199_v58, %v335_v42 }
  0x82   : > { %v546_v10 = vadd.f32 %v2119_v23, %v406_v57  ;;  %v610_v11 = vadd.f32 %v2119_v23, %v470_v59  ;;  %v414_v56 = vmul.f32 %v2116_v22, %v274_v47  ;;  %v273_v57 = vld [vmem:[%s2084_s17 + $0x170] sm:$0xff] }
  0x83   : > { %v735_v20 = vmax.f32 %v607_v6, 0.0  ;;  %v615_v6 = vadd.f32 %v2214_v2, %v475_v52  ;;  %v346_v52 = vld [vmem:[%s2084_s17 + $0x3b8] sm:$0xff] }
  0x84   : > { %930 = vmatmul.mubr.f32.gmra.mrb[28].mxu0 %v663_v12  ;;  %1090 = vmatmul.mubr.f32.gmra.mrb[28].mxu1 %v727_v16  ;;  %v472_v12 = vmul.f32 %v2116_v22, %v332_v61  ;;  %v671_v16 = vmax.f32 %v543_v63, 0.0  ;;  %v674_v27 = vmax.f32 %v546_v10, 0.0  ;;  %v738_v28 = vmax.f32 %v610_v11, 0.0  ;;  %v337_v63 = vld [vmem:[%s2084_s17 + $0x370] sm:$0xff] }
  0x85   : > { %934 = vmatprep.mubr.f32.mxu0 %v666_v17  ;;  %1094 = vmatprep.mubr.f32.mxu1 %v730_v21  ;;  %v545_v17 = vadd.f32 %v2214_v2, %v405_v0  ;;  %v548_v21 = vadd.f32 %v2119_v23, %v408_v7  ;;  %v276_v0 = vld [vmem:[%s2084_s17 + $0x188] sm:$0xff]  ;;  %v413_v7 = vmul.f32 %v2199_v58, %v273_v57 }
  0x86   : > { %v612_v29 = vadd.f32 %v2119_v23, %v472_v12  ;;  %v477_v10 = vmul.f32 %v2199_v58, %v337_v63  ;;  %v416_v11 = vmul.f32 %v2116_v22, %v276_v0  ;;  %v275_v12 = vld [vmem:[%s2084_s17 + $0x180] sm:$0xff] }
  0x87   : > { %v676_v38 = vmax.f32 %v548_v21, 0.0  ;;  %v743_v21 = vmax.f32 %v615_v6, 0.0  ;;  %v284_v6 = vld [vmem:[%s2084_s17 + $0x1c8] sm:$0xff] }
  0x88   : > { %935 = vmatmul.mubr.f32.gmra.mrb[30].mxu0 %v665_v30  ;;  %1095 = vmatmul.mubr.f32.gmra.mrb[30].mxu1 %v729_v34  ;;  %v474_v30 = vmul.f32 %v2116_v22, %v334_v15  ;;  %v673_v34 = vmax.f32 %v545_v17, 0.0  ;;  %v740_v43 = vmax.f32 %v612_v29, 0.0  ;;  %v339_v17 = vld [vmem:[%s2084_s17 + $0x380] sm:$0xff] }
  0x89   : > { %939 = vmatprep.mubr.f32.mxu0 %v668_v4  ;;  %1099 = vmatprep.mubr.f32.mxu1 %v732_v39  ;;  %v611_v4 = vadd.f32 %v2214_v2, %v471_v24  ;;  %v550_v39 = vadd.f32 %v2119_v23, %v410_v25  ;;  %v553_v24 = vadd.f32 %v2214_v2, %v413_v7  ;;  %v348_v7 = vld [vmem:[%s2084_s17 + $0x3c8] sm:$0xff] }
  0x8a   : > { %v614_v44 = vadd.f32 %v2119_v23, %v474_v30  ;;  %v415_v25 = vmul.f32 %v2199_v58, %v275_v12  ;;  %v479_v29 = vmul.f32 %v2199_v58, %v339_v17  ;;  %v277_v30 = vld [vmem:[%s2084_s17 + $0x190] sm:$0xff]  ;;  %v347_v17 = vld [vmem:[%s2084_s17 + $0x3c0] sm:$0xff] }
  0x8b   : > { %v739_v53 = vmax.f32 %v611_v4, 0.0  ;;  %v678_v54 = vmax.f32 %v550_v39, 0.0  ;;  %v417_v39 = vmul.f32 %v2199_v58, %v277_v30 }
  0x8c   : > { %940 = vmatmul.mubr.f32.gmra.mrb[32].mxu0 %v667_v45  ;;  %1100 = vmatmul.mubr.f32.gmra.mrb[32].mxu1 %v731_v46  ;;  %v412_v45 = vmul.f32 %v2116_v22, %v272_v32  ;;  %v476_v46 = vmul.f32 %v2116_v22, %v336_v33  ;;  %v742_v59 = vmax.f32 %v614_v44, 0.0  ;;  %v555_v4 = vadd.f32 %v2214_v2, %v415_v25  ;;  %v350_v25 = vld [vmem:[%s2084_s17 + $0x3d8] sm:$0xff] }
  0x8d   : > { %944 = vmatprep.mubr.f32.mxu0 %v670_v49  ;;  %1104 = vmatprep.mubr.f32.mxu1 %v734_v55  ;;  %v675_v49 = vmax.f32 %v547_v36, 0.0  ;;  %v613_v55 = vadd.f32 %v2214_v2, %v473_v40  ;;  %v280_v36 = vld [vmem:[%s2084_s17 + $0x1a8] sm:$0xff]  ;;  %v481_v40 = vmul.f32 %v2199_v58, %v341_v31 }
  0x8e   : > { %v552_v60 = vadd.f32 %v2119_v23, %v412_v45  ;;  %v616_v61 = vadd.f32 %v2119_v23, %v476_v46  ;;  %v420_v44 = vmul.f32 %v2116_v22, %v280_v36  ;;  %v279_v45 = vld [vmem:[%s2084_s17 + $0x1a0] sm:$0xff] }
  0x8f   : > { %v741_v8 = vmax.f32 %v613_v55, 0.0  ;;  %v621_v55 = vadd.f32 %v2214_v2, %v481_v40  ;;  %v352_v40 = vld [vmem:[%s2084_s17 + $0x3e8] sm:$0xff] }
  0x90   : > { %945 = vmatmul.mubr.f32.gmra.mrb[34].mxu0 %v669_v62  ;;  %1105 = vmatmul.mubr.f32.gmra.mrb[34].mxu1 %v733_v3  ;;  %v478_v62 = vmul.f32 %v2116_v22, %v338_v48  ;;  %v677_v3 = vmax.f32 %v549_v50, 0.0  ;;  %v680_v13 = vmax.f32 %v552_v60, 0.0  ;;  %v744_v14 = vmax.f32 %v616_v61, 0.0  ;;  %v343_v50 = vld [vmem:[%s2084_s17 + $0x3a0] sm:$0xff] }
  0x91   : > { %949 = vmatprep.mubr.f32.mxu0 %v672_v5  ;;  %1109 = vmatprep.mubr.f32.mxu1 %v736_v9  ;;  %v551_v5 = vadd.f32 %v2214_v2, %v411_v51  ;;  %v554_v9 = vadd.f32 %v2119_v23, %v414_v56  ;;  %v282_v51 = vld [vmem:[%s2084_s17 + $0x1b8] sm:$0xff]  ;;  %v419_v56 = vmul.f32 %v2199_v58, %v279_v45 }
  0x92   : > { %v618_v15 = vadd.f32 %v2119_v23, %v478_v62  ;;  %v483_v60 = vmul.f32 %v2199_v58, %v343_v50  ;;  %v422_v61 = vmul.f32 %v2116_v22, %v282_v51  ;;  %v281_v62 = vld [vmem:[%s2084_s17 + $0x1b0] sm:$0xff] }
  0x93   : > { %v682_v26 = vmax.f32 %v554_v9, 0.0  ;;  %v749_v9 = vmax.f32 %v621_v55, 0.0  ;;  %v290_v55 = vld [vmem:[%s2084_s17 + $0x1f8] sm:$0xff] }
  0x94   : > { %950 = vmatmul.mubr.f32.gmra.mrb[36].mxu0 %v671_v16  ;;  %1110 = vmatmul.mubr.f32.gmra.mrb[36].mxu1 %v735_v20  ;;  %v480_v16 = vmul.f32 %v2116_v22, %v340_v1  ;;  %v679_v20 = vmax.f32 %v551_v5, 0.0  ;;  %v746_v32 = vmax.f32 %v618_v15, 0.0  ;;  %v345_v5 = vld [vmem:[%s2084_s17 + $0x3b0] sm:$0xff] }
  0x95   : > { %954 = vmatprep.mubr.f32.mxu0 %v674_v27  ;;  %1114 = vmatprep.mubr.f32.mxu1 %v738_v28  ;;  %v617_v27 = vadd.f32 %v2214_v2, %v477_v10  ;;  %v556_v28 = vadd.f32 %v2119_v23, %v416_v11  ;;  %v559_v10 = vadd.f32 %v2214_v2, %v419_v56  ;;  %v354_v56 = vld [vmem:[%s2084_s17 + $0x3f8] sm:$0xff] }
  0x96   : > { %v620_v33 = vadd.f32 %v2119_v23, %v480_v16  ;;  %v421_v11 = vmul.f32 %v2199_v58, %v281_v62  ;;  %v485_v15 = vmul.f32 %v2199_v58, %v345_v5  ;;  %v283_v16 = vld [vmem:[%s2084_s17 + $0x1c0] sm:$0xff] }
  0x97   : > { %v745_v41 = vmax.f32 %v617_v27, 0.0  ;;  %v684_v42 = vmax.f32 %v556_v28, 0.0  ;;  %v423_v28 = vmul.f32 %v2199_v58, %v283_v16 }
  0x98   : > { %955 = vmatmul.mubr.f32.gmra.mrb[38].mxu0 %v673_v34  ;;  %1115 = vmatmul.mubr.f32.gmra.mrb[38].mxu1 %v737_v35  ;;  %v418_v34 = vmul.f32 %v2116_v22, %v278_v18  ;;  %v482_v35 = vmul.f32 %v2116_v22, %v342_v19  ;;  %v748_v46 = vmax.f32 %v620_v33, 0.0  ;;  %v561_v27 = vadd.f32 %v2214_v2, %v421_v11 }
  0x99   : > { %959 = vmatprep.mubr.f32.mxu0 %v676_v38  ;;  %1119 = vmatprep.mubr.f32.mxu1 %v740_v43  ;;  %v681_v38 = vmax.f32 %v553_v24, 0.0  ;;  %v619_v43 = vadd.f32 %v2214_v2, %v479_v29  ;;  %v286_v24 = vld [vmem:[%s2084_s17 + $0x1d8] sm:$0xff]  ;;  %v487_v29 = vmul.f32 %v2199_v58, %v347_v17 }
  0x9a   : > { %v558_v47 = vadd.f32 %v2119_v23, %v418_v34  ;;  %v622_v48 = vadd.f32 %v2119_v23, %v482_v35  ;;  %v426_v33 = vmul.f32 %v2116_v22, %v286_v24  ;;  %v285_v34 = vld [vmem:[%s2084_s17 + $0x1d0] sm:$0xff] }
  0x9b   : > { %v747_v57 = vmax.f32 %v619_v43, 0.0  ;;  %v627_v43 = vadd.f32 %v2214_v2, %v487_v29 }
  0x9c   : > { %960 = vmatmul.mubr.f32.gmra.mrb[40].mxu0 %v675_v49  ;;  %1120 = vmatmul.mubr.f32.gmra.mrb[40].mxu1 %v739_v53  ;;  %v484_v49 = vmul.f32 %v2116_v22, %v344_v37  ;;  %v683_v53 = vmax.f32 %v555_v4, 0.0  ;;  %v686_v63 = vmax.f32 %v558_v47, 0.0  ;;  %v750_v0 = vmax.f32 %v622_v48, 0.0  ;;  %v349_v4 = vld [vmem:[%s2084_s17 + $0x3d0] sm:$0xff] }
  0x9d   : > { %964 = vmatprep.mubr.f32.mxu0 %v678_v54  ;;  %1124 = vmatprep.mubr.f32.mxu1 %v742_v59  ;;  %v557_v54 = vadd.f32 %v2214_v2, %v417_v39  ;;  %v560_v59 = vadd.f32 %v2119_v23, %v420_v44  ;;  %v288_v39 = vld [vmem:[%s2084_s17 + $0x1e8] sm:$0xff]  ;;  %v425_v44 = vmul.f32 %v2199_v58, %v285_v34 }
  0x9e   : > { %v624_v1 = vadd.f32 %v2119_v23, %v484_v49  ;;  %v489_v47 = vmul.f32 %v2199_v58, %v349_v4  ;;  %v428_v48 = vmul.f32 %v2116_v22, %v288_v39  ;;  %v287_v49 = vld [vmem:[%s2084_s17 + $0x1e0] sm:$0xff] }
  0x9f   : > { %v688_v12 = vmax.f32 %v560_v59, 0.0  ;;  %v755_v59 = vmax.f32 %v627_v43, 0.0 }
  0xa0   : > { %965 = vmatmul.mubr.f32.gmra.mrb[42].mxu0 %v677_v3  ;;  %1125 = vmatmul.mubr.f32.gmra.mrb[42].mxu1 %v741_v8  ;;  %v486_v3 = vmul.f32 %v2116_v22, %v346_v52  ;;  %v685_v8 = vmax.f32 %v557_v54, 0.0  ;;  %v752_v18 = vmax.f32 %v624_v1, 0.0  ;;  %v351_v54 = vld [vmem:[%s2084_s17 + $0x3e0] sm:$0xff] }
  0xa1   : > { %969 = vmatprep.mubr.f32.mxu0 %v680_v13  ;;  %1129 = vmatprep.mubr.f32.mxu1 %v744_v14  ;;  %v623_v13 = vadd.f32 %v2214_v2, %v483_v60  ;;  %v562_v14 = vadd.f32 %v2119_v23, %v422_v61  ;;  %v565_v60 = vadd.f32 %v2214_v2, %v425_v44 }
  0xa2   : > { %v626_v19 = vadd.f32 %v2119_v23, %v486_v3  ;;  %v427_v61 = vmul.f32 %v2199_v58, %v287_v49  ;;  %v491_v1 = vmul.f32 %v2199_v58, %v351_v54 }
  0xa3   : > { %v751_v30 = vmax.f32 %v623_v13, 0.0  ;;  %v690_v31 = vmax.f32 %v562_v14, 0.0 }
  0xa4   : > { %970 = vmatmul.mubr.f32.gmra.mrb[44].mxu0 %v679_v20  ;;  %1130 = vmatmul.mubr.f32.gmra.mrb[44].mxu1 %v743_v21  ;;  %v424_v20 = vmul.f32 %v2116_v22, %v284_v6  ;;  %v488_v21 = vmul.f32 %v2116_v22, %v348_v7  ;;  %v754_v35 = vmax.f32 %v626_v19, 0.0  ;;  %v430_v6 = vmul.f32 %v2116_v22, %v290_v55 }
  0xa5   : > { %974 = vmatprep.mubr.f32.mxu0 %v682_v26  ;;  %1134 = vmatprep.mubr.f32.mxu1 %v746_v32  ;;  %v687_v26 = vmax.f32 %v559_v10, 0.0  ;;  %v625_v32 = vadd.f32 %v2214_v2, %v485_v15  ;;  %v494_v7 = vmul.f32 %v2116_v22, %v354_v56  ;;  %v693_v10 = vmax.f32 %v565_v60, 0.0 }
  0xa6   : > { %v564_v36 = vadd.f32 %v2119_v23, %v424_v20  ;;  %v628_v37 = vadd.f32 %v2119_v23, %v488_v21  ;;  %v567_v11 = vadd.f32 %v2214_v2, %v427_v61  ;;  %v631_v13 = vadd.f32 %v2214_v2, %v491_v1 }
  0xa7   : > { %v753_v45 = vmax.f32 %v625_v32, 0.0 }
  0xa8   : > { %975 = vmatmul.mubr.f32.gmra.mrb[46].mxu0 %v681_v38  ;;  %1135 = vmatmul.mubr.f32.gmra.mrb[46].mxu1 %v745_v41  ;;  %v490_v38 = vmul.f32 %v2116_v22, %v350_v25  ;;  %v689_v41 = vmax.f32 %v561_v27, 0.0  ;;  %v692_v50 = vmax.f32 %v564_v36, 0.0  ;;  %v756_v51 = vmax.f32 %v628_v37, 0.0 }
  0xa9   : > { %979 = vmatprep.mubr.f32.mxu0 %v684_v42  ;;  %1139 = vmatprep.mubr.f32.mxu1 %v748_v46  ;;  %v563_v42 = vadd.f32 %v2214_v2, %v423_v28  ;;  %v566_v46 = vadd.f32 %v2119_v23, %v426_v33  ;;  %v695_v19 = vmax.f32 %v567_v11, 0.0  ;;  %v759_v20 = vmax.f32 %v631_v13, 0.0 }
  0xaa   : > { %v630_v52 = vadd.f32 %v2119_v23, %v490_v38 }
  0xab   : > { %v694_v62 = vmax.f32 %v566_v46, 0.0 }
  0xac   : > { %980 = vmatmul.mubr.f32.gmra.mrb[48].mxu0 %v683_v53  ;;  %1140 = vmatmul.mubr.f32.gmra.mrb[48].mxu1 %v747_v57  ;;  %v492_v53 = vmul.f32 %v2116_v22, %v352_v40  ;;  %v691_v57 = vmax.f32 %v563_v42, 0.0  ;;  %v758_v3 = vmax.f32 %v630_v52, 0.0  ;;  %v570_v22 = vadd.f32 %v2119_v23, %v430_v6 }
  0xad   : > { %984 = vmatprep.mubr.f32.mxu0 %v686_v63  ;;  %1144 = vmatprep.mubr.f32.mxu1 %v750_v0  ;;  %v629_v63 = vadd.f32 %v2214_v2, %v489_v47  ;;  %v568_v0 = vadd.f32 %v2119_v23, %v428_v48 }
  0xae   : > { %v632_v5 = vadd.f32 %v2119_v23, %v492_v53 }
  0xaf   : > { %v696_v16 = vmax.f32 %v568_v0, 0.0 }
  0xb0   : > { %985 = vmatmul.mubr.f32.gmra.mrb[50].mxu0 %v685_v8  ;;  %1145 = vmatmul.mubr.f32.gmra.mrb[50].mxu1 %v749_v9  ;;  %v289_v8 = vld [vmem:[%s2084_s17 + $0x1f0] sm:$0xff]  ;;  %v760_v17 = vmax.f32 %v632_v5, 0.0 }
  0xb1   : > { %989 = vmatprep.mubr.f32.mxu0 %v688_v12  ;;  %1149 = vmatprep.mubr.f32.mxu1 %v752_v18  ;;  %v353_v9 = vld [vmem:[%s2084_s17 + $0x3f0] sm:$0xff]  ;;  %v757_v12 = vmax.f32 %v629_v63, 0.0  ;;  %v429_v14 = vmul.f32 %v2199_v58, %v289_v8  ;;  %v634_v18 = vadd.f32 %v2119_v23, %v494_v7  ;;  %s202_s17 = sand.u32 1, %s1955_s15   ;;  %s1252_s15 = ssub.s32 (%p2048_p4), 432, %s2062_s30 }
  0xb2   : > { %v493_v15 = vmul.f32 %v2199_v58, %v353_v9  ;;  %v698_v58 = vmax.f32 %v570_v22, 0.0  ;;  %s1715_s24 = sshll.u32 %s202_s17, 9  ;;  %p1253_p8 = scmp.lt.s32.totalorder (%p2048_p4), %s1252_s15, 64 }
  0xb3   : > { %v569_v21 = vadd.f32 %v2214_v2, %v429_v14  ;;  %v762_v25 = vmax.f32 %v634_v18, 0.0  ;;  %s2601_s25 = scalar_lea.vmem [#allocation2], %s1715_s24  }
  0xb4   : > { %990 = vmatmul.mubr.f32.gmra.mrb[52].mxu0 %v687_v26  ;;  %1150 = vmatmul.mubr.f32.gmra.mrb[52].mxu1 %v751_v30  ;;  %v633_v24 = vadd.f32 %v2214_v2, %v493_v15 }
  0xb5   : > { %994 = vmatprep.mubr.f32.mxu0 %v690_v31  ;;  %1154 = vmatprep.mubr.f32.mxu1 %v754_v35  ;;  %v697_v26 = vmax.f32 %v569_v21, 0.0 }
  0xb6   : > { %v761_v27 = vmax.f32 %v633_v24, 0.0 }
  0xb8   : > { %995 = vmatmul.mubr.f32.gmra.mrb[54].mxu0 %v689_v41  ;;  %1155 = vmatmul.mubr.f32.gmra.mrb[54].mxu1 %v753_v45 }
  0xb9   : > { %999 = vmatprep.mubr.f32.mxu0 %v692_v50  ;;  %1159 = vmatprep.mubr.f32.mxu1 %v756_v51 }
  0xbc   : > { %1000 = vmatmul.mubr.f32.gmra.mrb[56].mxu0 %v691_v57  ;;  %1160 = vmatmul.mubr.f32.gmra.mrb[56].mxu1 %v755_v59 }
  0xbd   : > { %1004 = vmatprep.mubr.f32.mxu0 %v694_v62  ;;  %1164 = vmatprep.mubr.f32.mxu1 %v758_v3 }
  0xc0   : > { %1005 = vmatmul.mubr.f32.gmra.mrb[58].mxu0 %v693_v10  ;;  %1165 = vmatmul.mubr.f32.gmra.mrb[58].mxu1 %v757_v12 }
  0xc1   : > { %1009 = vmatprep.mubr.f32.mxu0 %v696_v16  ;;  %1169 = vmatprep.mubr.f32.mxu1 %v760_v17 }
  0xc4   : > { %1010 = vmatmul.mubr.f32.gmra.mrb[60].mxu0 %v695_v19  ;;  %1170 = vmatmul.mubr.f32.gmra.mrb[60].mxu1 %v759_v20 }
  0xc5   : > { %1014 = vmatprep.mubr.f32.mxu0 %v698_v58  ;;  %1174 = vmatprep.mubr.f32.mxu1 %v762_v25 }
  0xc8   : > { %1015 = vmatmul.mubr.f32.gmra.mrb[62].mxu0 %v697_v26  ;;  %1175 = vmatmul.mubr.f32.gmra.mrb[62].mxu1 %v761_v27 }
 0x11f   : > { %v861_v23 = vpop.f32.mrb[0].mxu0  ;;  %v1021_v28 = vpop.f32.mrb[0].mxu1 }
 0x120   : > { %1180 = vst [vmem:[%s2601_s25] sm:$0xff] %v861_v23  ;;  %1212 = vst [vmem:[%s2601_s25 + $0x100] sm:$0xff] %v1021_v28  ;;  %v863_v2 = vpop.f32.mrb[1].mxu0  ;;  %v1023_v29 = vpop.f32.mrb[1].mxu1 }
 0x123   : > { %v866_v30 = vpop.f32.mrb[2].mxu0  ;;  %v1026_v31 = vpop.f32.mrb[2].mxu1 }
 0x124   : > { %1181 = vst [vmem:[%s2601_s25 + $0x8] sm:$0xff] %v866_v30  ;;  %1213 = vst [vmem:[%s2601_s25 + $0x108] sm:$0xff] %v1026_v31  ;;  %v868_v32 = vpop.f32.mrb[3].mxu0  ;;  %v1028_v33 = vpop.f32.mrb[3].mxu1 }
 0x127   : > { %v871_v34 = vpop.f32.mrb[4].mxu0  ;;  %v1031_v35 = vpop.f32.mrb[4].mxu1 }
 0x128   : > { %1182 = vst [vmem:[%s2601_s25 + $0x10] sm:$0xff] %v871_v34  ;;  %1214 = vst [vmem:[%s2601_s25 + $0x110] sm:$0xff] %v1031_v35  ;;  %v873_v36 = vpop.f32.mrb[5].mxu0  ;;  %v1033_v37 = vpop.f32.mrb[5].mxu1 }
 0x12b   : > { %v876_v38 = vpop.f32.mrb[6].mxu0  ;;  %v1036_v4 = vpop.f32.mrb[6].mxu1 }
 0x12c   : > { %1183 = vst [vmem:[%s2601_s25 + $0x18] sm:$0xff] %v876_v38  ;;  %1215 = vst [vmem:[%s2601_s25 + $0x118] sm:$0xff] %v1036_v4  ;;  %v878_v39 = vpop.f32.mrb[7].mxu0  ;;  %v1038_v40 = vpop.f32.mrb[7].mxu1 }
 0x12f   : > { %v881_v41 = vpop.f32.mrb[8].mxu0  ;;  %v1041_v42 = vpop.f32.mrb[8].mxu1 }
 0x130   : > { %1184 = vst [vmem:[%s2601_s25 + $0x20] sm:$0xff] %v881_v41  ;;  %1216 = vst [vmem:[%s2601_s25 + $0x120] sm:$0xff] %v1041_v42  ;;  %v883_v43 = vpop.f32.mrb[9].mxu0  ;;  %v1043_v44 = vpop.f32.mrb[9].mxu1 }
 0x133   : > { %v886_v45 = vpop.f32.mrb[10].mxu0  ;;  %v1046_v46 = vpop.f32.mrb[10].mxu1 }
 0x134   : > { %1185 = vst [vmem:[%s2601_s25 + $0x28] sm:$0xff] %v886_v45  ;;  %1217 = vst [vmem:[%s2601_s25 + $0x128] sm:$0xff] %v1046_v46  ;;  %v888_v47 = vpop.f32.mrb[11].mxu0  ;;  %v1048_v48 = vpop.f32.mrb[11].mxu1 }
 0x137   : > { %v891_v49 = vpop.f32.mrb[12].mxu0  ;;  %v1051_v50 = vpop.f32.mrb[12].mxu1 }
 0x138   : > { %1186 = vst [vmem:[%s2601_s25 + $0x30] sm:$0xff] %v891_v49  ;;  %1218 = vst [vmem:[%s2601_s25 + $0x130] sm:$0xff] %v1051_v50  ;;  %v893_v51 = vpop.f32.mrb[13].mxu0  ;;  %v1053_v52 = vpop.f32.mrb[13].mxu1 }
 0x13b   : > { %v896_v53 = vpop.f32.mrb[14].mxu0  ;;  %v1056_v54 = vpop.f32.mrb[14].mxu1 }
 0x13c   : > { %1187 = vst [vmem:[%s2601_s25 + $0x38] sm:$0xff] %v896_v53  ;;  %1219 = vst [vmem:[%s2601_s25 + $0x138] sm:$0xff] %v1056_v54  ;;  %v898_v55 = vpop.f32.mrb[15].mxu0  ;;  %v1058_v56 = vpop.f32.mrb[15].mxu1 }
 0x13f   : > { %v901_v57 = vpop.f32.mrb[16].mxu0  ;;  %v1061_v59 = vpop.f32.mrb[16].mxu1 }
 0x140   : > { %1188 = vst [vmem:[%s2601_s25 + $0x40] sm:$0xff] %v901_v57  ;;  %1220 = vst [vmem:[%s2601_s25 + $0x140] sm:$0xff] %v1061_v59  ;;  %v903_v60 = vpop.f32.mrb[17].mxu0  ;;  %v1063_v61 = vpop.f32.mrb[17].mxu1 }
 0x143   : > { %v906_v62 = vpop.f32.mrb[18].mxu0  ;;  %v1066_v63 = vpop.f32.mrb[18].mxu1 }
 0x144   : > { %1189 = vst [vmem:[%s2601_s25 + $0x48] sm:$0xff] %v906_v62  ;;  %1221 = vst [vmem:[%s2601_s25 + $0x148] sm:$0xff] %v1066_v63  ;;  %v908_v0 = vpop.f32.mrb[19].mxu0  ;;  %v1068_v1 = vpop.f32.mrb[19].mxu1 }
 0x147   : > { %v911_v3 = vpop.f32.mrb[20].mxu0  ;;  %v1071_v5 = vpop.f32.mrb[20].mxu1 }
 0x148   : > { %1190 = vst [vmem:[%s2601_s25 + $0x50] sm:$0xff] %v911_v3  ;;  %1222 = vst [vmem:[%s2601_s25 + $0x150] sm:$0xff] %v1071_v5  ;;  %v913_v6 = vpop.f32.mrb[21].mxu0  ;;  %v1073_v7 = vpop.f32.mrb[21].mxu1 }
 0x14b   : > { %v916_v8 = vpop.f32.mrb[22].mxu0  ;;  %v1076_v9 = vpop.f32.mrb[22].mxu1 }
 0x14c   : > { %1191 = vst [vmem:[%s2601_s25 + $0x58] sm:$0xff] %v916_v8  ;;  %1223 = vst [vmem:[%s2601_s25 + $0x158] sm:$0xff] %v1076_v9  ;;  %v918_v10 = vpop.f32.mrb[23].mxu0  ;;  %v1078_v11 = vpop.f32.mrb[23].mxu1 }
 0x14f   : > { %v921_v12 = vpop.f32.mrb[24].mxu0  ;;  %v1081_v13 = vpop.f32.mrb[24].mxu1 }
 0x150   : > { %1192 = vst [vmem:[%s2601_s25 + $0x60] sm:$0xff] %v921_v12  ;;  %1224 = vst [vmem:[%s2601_s25 + $0x160] sm:$0xff] %v1081_v13  ;;  %v923_v14 = vpop.f32.mrb[25].mxu0  ;;  %v1083_v15 = vpop.f32.mrb[25].mxu1 }
 0x153   : > { %v926_v16 = vpop.f32.mrb[26].mxu0  ;;  %v1086_v17 = vpop.f32.mrb[26].mxu1 }
 0x154   : > { %1193 = vst [vmem:[%s2601_s25 + $0x68] sm:$0xff] %v926_v16  ;;  %1225 = vst [vmem:[%s2601_s25 + $0x168] sm:$0xff] %v1086_v17  ;;  %v928_v22 = vpop.f32.mrb[27].mxu0  ;;  %v1088_v18 = vpop.f32.mrb[27].mxu1 }
 0x157   : > { %v931_v19 = vpop.f32.mrb[28].mxu0  ;;  %v1091_v20 = vpop.f32.mrb[28].mxu1 }
 0x158   : > { %1194 = vst [vmem:[%s2601_s25 + $0x70] sm:$0xff] %v931_v19  ;;  %1226 = vst [vmem:[%s2601_s25 + $0x170] sm:$0xff] %v1091_v20  ;;  %v933_v21 = vpop.f32.mrb[29].mxu0  ;;  %v1093_v24 = vpop.f32.mrb[29].mxu1 }
 0x15b   : > { %v936_v58 = vpop.f32.mrb[30].mxu0  ;;  %v1096_v25 = vpop.f32.mrb[30].mxu1 }
 0x15c   : > { %1195 = vst [vmem:[%s2601_s25 + $0x78] sm:$0xff] %v936_v58  ;;  %1227 = vst [vmem:[%s2601_s25 + $0x178] sm:$0xff] %v1096_v25  ;;  %v938_v26 = vpop.f32.mrb[31].mxu0  ;;  %v1098_v27 = vpop.f32.mrb[31].mxu1 }
 0x15f   : > { %v941_v23 = vpop.f32.mrb[32].mxu0  ;;  %v1101_v28 = vpop.f32.mrb[32].mxu1 }
 0x160   : > { %1196 = vst [vmem:[%s2601_s25 + $0x80] sm:$0xff] %v941_v23  ;;  %1228 = vst [vmem:[%s2601_s25 + $0x180] sm:$0xff] %v1101_v28  ;;  %v943_v2 = vpop.f32.mrb[33].mxu0  ;;  %v1103_v29 = vpop.f32.mrb[33].mxu1 }
 0x163   : > { %v946_v30 = vpop.f32.mrb[34].mxu0  ;;  %v1106_v31 = vpop.f32.mrb[34].mxu1 }
 0x164   : > { %1197 = vst [vmem:[%s2601_s25 + $0x88] sm:$0xff] %v946_v30  ;;  %1229 = vst [vmem:[%s2601_s25 + $0x188] sm:$0xff] %v1106_v31  ;;  %v948_v32 = vpop.f32.mrb[35].mxu0  ;;  %v1108_v33 = vpop.f32.mrb[35].mxu1 }
 0x167   : > { %v951_v34 = vpop.f32.mrb[36].mxu0  ;;  %v1111_v35 = vpop.f32.mrb[36].mxu1 }
 0x168   : > { %1198 = vst [vmem:[%s2601_s25 + $0x90] sm:$0xff] %v951_v34  ;;  %1230 = vst [vmem:[%s2601_s25 + $0x190] sm:$0xff] %v1111_v35  ;;  %v953_v36 = vpop.f32.mrb[37].mxu0  ;;  %v1113_v37 = vpop.f32.mrb[37].mxu1 }
 0x16b   : > { %v956_v38 = vpop.f32.mrb[38].mxu0  ;;  %v1116_v4 = vpop.f32.mrb[38].mxu1 }
 0x16c   : > { %1199 = vst [vmem:[%s2601_s25 + $0x98] sm:$0xff] %v956_v38  ;;  %1231 = vst [vmem:[%s2601_s25 + $0x198] sm:$0xff] %v1116_v4  ;;  %v958_v39 = vpop.f32.mrb[39].mxu0  ;;  %v1118_v40 = vpop.f32.mrb[39].mxu1 }
 0x16f   : > { %v961_v41 = vpop.f32.mrb[40].mxu0  ;;  %v1121_v42 = vpop.f32.mrb[40].mxu1 }
 0x170   : > { %1200 = vst [vmem:[%s2601_s25 + $0xa0] sm:$0xff] %v961_v41  ;;  %1232 = vst [vmem:[%s2601_s25 + $0x1a0] sm:$0xff] %v1121_v42  ;;  %v963_v43 = vpop.f32.mrb[41].mxu0  ;;  %v1123_v44 = vpop.f32.mrb[41].mxu1 }
 0x173   : > { %v966_v45 = vpop.f32.mrb[42].mxu0  ;;  %v1126_v46 = vpop.f32.mrb[42].mxu1 }
 0x174   : > { %1201 = vst [vmem:[%s2601_s25 + $0xa8] sm:$0xff] %v966_v45  ;;  %1233 = vst [vmem:[%s2601_s25 + $0x1a8] sm:$0xff] %v1126_v46  ;;  %v968_v47 = vpop.f32.mrb[43].mxu0  ;;  %v1128_v48 = vpop.f32.mrb[43].mxu1 }
 0x177   : > { %v971_v49 = vpop.f32.mrb[44].mxu0  ;;  %v1131_v50 = vpop.f32.mrb[44].mxu1 }
 0x178   : > { %1202 = vst [vmem:[%s2601_s25 + $0xb0] sm:$0xff] %v971_v49  ;;  %1234 = vst [vmem:[%s2601_s25 + $0x1b0] sm:$0xff] %v1131_v50  ;;  %v973_v51 = vpop.f32.mrb[45].mxu0  ;;  %v1133_v52 = vpop.f32.mrb[45].mxu1 }
 0x17b   : > { %v976_v53 = vpop.f32.mrb[46].mxu0  ;;  %v1136_v54 = vpop.f32.mrb[46].mxu1 }
 0x17c   : > { %1203 = vst [vmem:[%s2601_s25 + $0xb8] sm:$0xff] %v976_v53  ;;  %1235 = vst [vmem:[%s2601_s25 + $0x1b8] sm:$0xff] %v1136_v54  ;;  %v978_v55 = vpop.f32.mrb[47].mxu0  ;;  %v1138_v56 = vpop.f32.mrb[47].mxu1 }
 0x17f   : > { %v981_v57 = vpop.f32.mrb[48].mxu0  ;;  %v1141_v59 = vpop.f32.mrb[48].mxu1 }
 0x180   : > { %1204 = vst [vmem:[%s2601_s25 + $0xc0] sm:$0xff] %v981_v57  ;;  %1236 = vst [vmem:[%s2601_s25 + $0x1c0] sm:$0xff] %v1141_v59  ;;  %v983_v60 = vpop.f32.mrb[49].mxu0  ;;  %v1143_v61 = vpop.f32.mrb[49].mxu1 }
 0x183   : > { %v986_v62 = vpop.f32.mrb[50].mxu0  ;;  %v1146_v63 = vpop.f32.mrb[50].mxu1 }
 0x184   : > { %1205 = vst [vmem:[%s2601_s25 + $0xc8] sm:$0xff] %v986_v62  ;;  %1237 = vst [vmem:[%s2601_s25 + $0x1c8] sm:$0xff] %v1146_v63  ;;  %v988_v0 = vpop.f32.mrb[51].mxu0  ;;  %v1148_v1 = vpop.f32.mrb[51].mxu1 }
 0x187   : > { %v991_v3 = vpop.f32.mrb[52].mxu0  ;;  %v1151_v5 = vpop.f32.mrb[52].mxu1 }
 0x188   : > { %1206 = vst [vmem:[%s2601_s25 + $0xd0] sm:$0xff] %v991_v3  ;;  %1238 = vst [vmem:[%s2601_s25 + $0x1d0] sm:$0xff] %v1151_v5  ;;  %v993_v6 = vpop.f32.mrb[53].mxu0  ;;  %v1153_v7 = vpop.f32.mrb[53].mxu1 }
 0x18b   : > { %v996_v8 = vpop.f32.mrb[54].mxu0  ;;  %v1156_v9 = vpop.f32.mrb[54].mxu1 }
 0x18c   : > { %1207 = vst [vmem:[%s2601_s25 + $0xd8] sm:$0xff] %v996_v8  ;;  %1239 = vst [vmem:[%s2601_s25 + $0x1d8] sm:$0xff] %v1156_v9  ;;  %v998_v10 = vpop.f32.mrb[55].mxu0  ;;  %v1158_v11 = vpop.f32.mrb[55].mxu1 }
 0x18f   : > { %v1001_v12 = vpop.f32.mrb[56].mxu0  ;;  %v1161_v13 = vpop.f32.mrb[56].mxu1 }
 0x190   : > { %1208 = vst [vmem:[%s2601_s25 + $0xe0] sm:$0xff] %v1001_v12  ;;  %1240 = vst [vmem:[%s2601_s25 + $0x1e0] sm:$0xff] %v1161_v13  ;;  %v1003_v14 = vpop.f32.mrb[57].mxu0  ;;  %v1163_v15 = vpop.f32.mrb[57].mxu1 }
 0x193   : > { %v1006_v16 = vpop.f32.mrb[58].mxu0  ;;  %v1166_v17 = vpop.f32.mrb[58].mxu1 }
 0x194   : > { %1209 = vst [vmem:[%s2601_s25 + $0xe8] sm:$0xff] %v1006_v16  ;;  %1241 = vst [vmem:[%s2601_s25 + $0x1e8] sm:$0xff] %v1166_v17  ;;  %v1008_v22 = vpop.f32.mrb[59].mxu0  ;;  %v1168_v18 = vpop.f32.mrb[59].mxu1 }
 0x196   : > { %1250 = sbr.rel (!%p2048_p4) target bundleno = 485 (0x1e5), region = 40 }
 0x197   : > { %v1011_v19 = vpop.f32.mrb[60].mxu0  ;;  %v1171_v20 = vpop.f32.mrb[60].mxu1 }
 0x198   : > { %1210 = vst [vmem:[%s2601_s25 + $0xf0] sm:$0xff] %v1011_v19  ;;  %1242 = vst [vmem:[%s2601_s25 + $0x1f0] sm:$0xff] %v1171_v20  ;;  %v1013_v21 = vpop.f32.mrb[61].mxu0  ;;  %v1173_v24 = vpop.f32.mrb[61].mxu1 }
 0x19b   : > { %v1016_v58 = vpop.f32.mrb[62].mxu0  ;;  %v1176_v25 = vpop.f32.mrb[62].mxu1 }
 0x19c   : > { %1211 = vst [vmem:[%s2601_s25 + $0xf8] sm:$0xff] %v1016_v58  ;;  %1243 = vst [vmem:[%s2601_s25 + $0x1f8] sm:$0xff] %v1176_v25  ;;  %v1018_v26 = vpop.f32.mrb[63].mxu0  ;;  %v1178_v27 = vpop.f32.mrb[63].mxu1 }
 0x19d   : > { %s2888_s15 = smov (!%p1253_p8, %s1252_s15), 64 }
 0x19e   : > { %s1721_s5 = sshll.u32 %s2888_s15, 7 }
 0x19f   : > { %p1724_p9 = scmp.eq.s32.totalorder %s1721_s5, 0 }
 0x1a0   : > { %s2680_s6 = sshrl.u32 (!%p1724_p9), %s2888_s15, 6 }
 0x1a1   : > { %1261 = sbr.rel (%p1724_p9) target bundleno = 485 (0x1e5), region = 44  ;;  %p1725_p10 = scmp.le.s32.totalorder (!%p1724_p9), %s2680_s6, 0 }
 0x1a8   : > { %1667 = sbr.rel (%p1725_p10) target bundleno = 464 (0x1d0), region = 120  ;;  %s2879_s18 = smov (!%p1725_p10), %s2674_s29 }
 0x1a9   : > { %s2880_s23 = smov (!%p1725_p10), %s2601_s25  ;;  %s2689_s30 = smov (!%p1725_p10), 0  }
 0x1aa   : > { %s2691_s7 = smov (!%p1725_p10), 0  }
 0x1af LB: >> { %v1449_v23 = vld [vmem:[%s1971_s23] sm:$0xff]  ;;  %v1451_v28 = vld [vmem:[%s1971_s23 + $0x8] sm:$0xff]  ;;  %v1453_v2 = vld [vmem:[%s1971_s23 + $0x10] sm:$0xff]  ;;  %s1577_s8 = sadd.s32 1, %s1975_s30  ;;  %s1443_s7 = sadd.s32 1, %s1979_s7   ;;  %s1979_s7 = sphi %s2691_s7, %s1443_s7   ;;  %s1975_s30 = sphi %s2689_s30, %s2883_s30   ;;  %s1971_s23 = sphi %s2880_s23, %s2882_s23   ;;  %s1967_s18 = sphi %s2879_s18, %s2881_s18  }
 0x1b0   : >> { %1450 = vst [vmem:[%s1967_s18] sm:$0xff] %v1449_v23  ;;  %1452 = vst [vmem:[%s1967_s18 + $0x8] sm:$0xff] %v1451_v28  ;;  %v1455_v29 = vld [vmem:[%s1971_s23 + $0x18] sm:$0xff]  ;;  %v1457_v30 = vld [vmem:[%s1971_s23 + $0x20] sm:$0xff]  ;;  %p1578_p11 = scmp.ge.s32.totalorder %s1577_s8, %s2680_s6  ;;  %p1442_p12 = scmp.ge.s32.totalorder %s1443_s7, %s2680_s6 }
 0x1b1   : >> { %1454 = vst [vmem:[%s1967_s18 + $0x10] sm:$0xff] %v1453_v2  ;;  %v1459_v31 = vld [vmem:[%s1971_s23 + $0x28] sm:$0xff]  ;;  %1456 = vst [vmem:[%s1967_s18 + $0x18] sm:$0xff] %v1455_v29  ;;  %v1461_v32 = vld [vmem:[%s1971_s23 + $0x30] sm:$0xff] }
 0x1b2   : >> { %1458 = vst [vmem:[%s1967_s18 + $0x20] sm:$0xff] %v1457_v30  ;;  %1460 = vst [vmem:[%s1967_s18 + $0x28] sm:$0xff] %v1459_v31  ;;  %v1463_v33 = vld [vmem:[%s1971_s23 + $0x38] sm:$0xff]  ;;  %v1465_v34 = vld [vmem:[%s1971_s23 + $0x40] sm:$0xff]  ;;  %s2890_s8 = smov (%p1578_p11, %s1577_s8), 0 }
 0x1b3   : >> { %1462 = vst [vmem:[%s1967_s18 + $0x30] sm:$0xff] %v1461_v32  ;;  %1464 = vst [vmem:[%s1967_s18 + $0x38] sm:$0xff] %v1463_v33  ;;  %v1467_v35 = vld [vmem:[%s1971_s23 + $0x48] sm:$0xff]  ;;  %v1469_v36 = vld [vmem:[%s1971_s23 + $0x50] sm:$0xff]  ;;  %s1726_s9 = sshll.u32 %s2890_s8, 9  ;;  %s2883_s30 = smov %s2890_s8 }
 0x1b4   : >> { %1466 = vst [vmem:[%s1967_s18 + $0x40] sm:$0xff] %v1465_v34  ;;  %v1471_v37 = vld [vmem:[%s1971_s23 + $0x58] sm:$0xff]  ;;  %1468 = vst [vmem:[%s1967_s18 + $0x48] sm:$0xff] %v1467_v35  ;;  %v1473_v38 = vld [vmem:[%s1971_s23 + $0x60] sm:$0xff]  ;;  %s2747_s10 = scalar_lea.vmem %s2601_s25, %s1726_s9 [#allocation2]   ;;  %s2750_s11 = scalar_lea.vmem %s2674_s29, %s1726_s9  }
 0x1b5   : >> { %1470 = vst [vmem:[%s1967_s18 + $0x50] sm:$0xff] %v1469_v36  ;;  %1472 = vst [vmem:[%s1967_s18 + $0x58] sm:$0xff] %v1471_v37  ;;  %v1475_v4 = vld [vmem:[%s1971_s23 + $0x68] sm:$0xff]  ;;  %v1477_v39 = vld [vmem:[%s1971_s23 + $0x70] sm:$0xff] }
 0x1b6   : >> { %1474 = vst [vmem:[%s1967_s18 + $0x60] sm:$0xff] %v1473_v38  ;;  %1476 = vst [vmem:[%s1967_s18 + $0x68] sm:$0xff] %v1475_v4  ;;  %v1479_v40 = vld [vmem:[%s1971_s23 + $0x78] sm:$0xff]  ;;  %v1481_v41 = vld [vmem:[%s1971_s23 + $0x80] sm:$0xff] }
 0x1b7   : >> { %1478 = vst [vmem:[%s1967_s18 + $0x70] sm:$0xff] %v1477_v39  ;;  %v1483_v42 = vld [vmem:[%s1971_s23 + $0x88] sm:$0xff]  ;;  %1480 = vst [vmem:[%s1967_s18 + $0x78] sm:$0xff] %v1479_v40  ;;  %v1485_v43 = vld [vmem:[%s1971_s23 + $0x90] sm:$0xff] }
 0x1b8   : >> { %1482 = vst [vmem:[%s1967_s18 + $0x80] sm:$0xff] %v1481_v41  ;;  %1484 = vst [vmem:[%s1967_s18 + $0x88] sm:$0xff] %v1483_v42  ;;  %v1487_v44 = vld [vmem:[%s1971_s23 + $0x98] sm:$0xff]  ;;  %v1489_v45 = vld [vmem:[%s1971_s23 + $0xa0] sm:$0xff] }
 0x1b9   : >> { %1486 = vst [vmem:[%s1967_s18 + $0x90] sm:$0xff] %v1485_v43  ;;  %1488 = vst [vmem:[%s1967_s18 + $0x98] sm:$0xff] %v1487_v44  ;;  %v1491_v46 = vld [vmem:[%s1971_s23 + $0xa8] sm:$0xff]  ;;  %v1493_v47 = vld [vmem:[%s1971_s23 + $0xb0] sm:$0xff] }
 0x1ba   : >> { %1490 = vst [vmem:[%s1967_s18 + $0xa0] sm:$0xff] %v1489_v45  ;;  %v1495_v48 = vld [vmem:[%s1971_s23 + $0xb8] sm:$0xff]  ;;  %1492 = vst [vmem:[%s1967_s18 + $0xa8] sm:$0xff] %v1491_v46  ;;  %v1497_v49 = vld [vmem:[%s1971_s23 + $0xc0] sm:$0xff] }
 0x1bb   : >> { %1494 = vst [vmem:[%s1967_s18 + $0xb0] sm:$0xff] %v1493_v47  ;;  %1496 = vst [vmem:[%s1967_s18 + $0xb8] sm:$0xff] %v1495_v48  ;;  %v1499_v50 = vld [vmem:[%s1971_s23 + $0xc8] sm:$0xff]  ;;  %v1501_v51 = vld [vmem:[%s1971_s23 + $0xd0] sm:$0xff] }
 0x1bc   : >> { %1498 = vst [vmem:[%s1967_s18 + $0xc0] sm:$0xff] %v1497_v49  ;;  %1500 = vst [vmem:[%s1967_s18 + $0xc8] sm:$0xff] %v1499_v50  ;;  %v1503_v52 = vld [vmem:[%s1971_s23 + $0xd8] sm:$0xff]  ;;  %v1505_v53 = vld [vmem:[%s1971_s23 + $0xe0] sm:$0xff] }
 0x1bd   : >> { %1502 = vst [vmem:[%s1967_s18 + $0xd0] sm:$0xff] %v1501_v51  ;;  %v1507_v54 = vld [vmem:[%s1971_s23 + $0xe8] sm:$0xff]  ;;  %1504 = vst [vmem:[%s1967_s18 + $0xd8] sm:$0xff] %v1503_v52  ;;  %v1509_v55 = vld [vmem:[%s1971_s23 + $0xf0] sm:$0xff] }
 0x1be   : >> { %1506 = vst [vmem:[%s1967_s18 + $0xe0] sm:$0xff] %v1505_v53  ;;  %1508 = vst [vmem:[%s1967_s18 + $0xe8] sm:$0xff] %v1507_v54  ;;  %v1511_v56 = vld [vmem:[%s1971_s23 + $0xf8] sm:$0xff]  ;;  %v1513_v57 = vld [vmem:[%s1971_s23 + $0x100] sm:$0xff] }
 0x1bf   : >> { %1510 = vst [vmem:[%s1967_s18 + $0xf0] sm:$0xff] %v1509_v55  ;;  %1512 = vst [vmem:[%s1967_s18 + $0xf8] sm:$0xff] %v1511_v56  ;;  %v1515_v59 = vld [vmem:[%s1971_s23 + $0x108] sm:$0xff]  ;;  %v1517_v60 = vld [vmem:[%s1971_s23 + $0x110] sm:$0xff] }
 0x1c0   : >> { %1514 = vst [vmem:[%s1967_s18 + $0x100] sm:$0xff] %v1513_v57  ;;  %v1519_v61 = vld [vmem:[%s1971_s23 + $0x118] sm:$0xff]  ;;  %1516 = vst [vmem:[%s1967_s18 + $0x108] sm:$0xff] %v1515_v59  ;;  %v1521_v62 = vld [vmem:[%s1971_s23 + $0x120] sm:$0xff] }
 0x1c1   : >> { %1518 = vst [vmem:[%s1967_s18 + $0x110] sm:$0xff] %v1517_v60  ;;  %1520 = vst [vmem:[%s1967_s18 + $0x118] sm:$0xff] %v1519_v61  ;;  %v1523_v63 = vld [vmem:[%s1971_s23 + $0x128] sm:$0xff]  ;;  %v1525_v0 = vld [vmem:[%s1971_s23 + $0x130] sm:$0xff] }
 0x1c2   : >> { %1522 = vst [vmem:[%s1967_s18 + $0x120] sm:$0xff] %v1521_v62  ;;  %1524 = vst [vmem:[%s1967_s18 + $0x128] sm:$0xff] %v1523_v63  ;;  %v1527_v1 = vld [vmem:[%s1971_s23 + $0x138] sm:$0xff]  ;;  %v1529_v3 = vld [vmem:[%s1971_s23 + $0x140] sm:$0xff] }
 0x1c3   : >> { %1526 = vst [vmem:[%s1967_s18 + $0x130] sm:$0xff] %v1525_v0  ;;  %v1531_v5 = vld [vmem:[%s1971_s23 + $0x148] sm:$0xff]  ;;  %1528 = vst [vmem:[%s1967_s18 + $0x138] sm:$0xff] %v1527_v1  ;;  %v1533_v6 = vld [vmem:[%s1971_s23 + $0x150] sm:$0xff] }
 0x1c4   : >> { %1530 = vst [vmem:[%s1967_s18 + $0x140] sm:$0xff] %v1529_v3  ;;  %1532 = vst [vmem:[%s1967_s18 + $0x148] sm:$0xff] %v1531_v5  ;;  %v1535_v7 = vld [vmem:[%s1971_s23 + $0x158] sm:$0xff]  ;;  %v1537_v8 = vld [vmem:[%s1971_s23 + $0x160] sm:$0xff] }
 0x1c5   : >> { %1534 = vst [vmem:[%s1967_s18 + $0x150] sm:$0xff] %v1533_v6  ;;  %1536 = vst [vmem:[%s1967_s18 + $0x158] sm:$0xff] %v1535_v7  ;;  %v1539_v9 = vld [vmem:[%s1971_s23 + $0x168] sm:$0xff]  ;;  %v1541_v10 = vld [vmem:[%s1971_s23 + $0x170] sm:$0xff] }
 0x1c6   : >> { %1538 = vst [vmem:[%s1967_s18 + $0x160] sm:$0xff] %v1537_v8  ;;  %v1543_v11 = vld [vmem:[%s1971_s23 + $0x178] sm:$0xff]  ;;  %1540 = vst [vmem:[%s1967_s18 + $0x168] sm:$0xff] %v1539_v9  ;;  %v1545_v12 = vld [vmem:[%s1971_s23 + $0x180] sm:$0xff] }
 0x1c7   : >> { %1542 = vst [vmem:[%s1967_s18 + $0x170] sm:$0xff] %v1541_v10  ;;  %1544 = vst [vmem:[%s1967_s18 + $0x178] sm:$0xff] %v1543_v11  ;;  %v1547_v13 = vld [vmem:[%s1971_s23 + $0x188] sm:$0xff]  ;;  %v1549_v14 = vld [vmem:[%s1971_s23 + $0x190] sm:$0xff] }
 0x1c8   : >> { %1546 = vst [vmem:[%s1967_s18 + $0x180] sm:$0xff] %v1545_v12  ;;  %1548 = vst [vmem:[%s1967_s18 + $0x188] sm:$0xff] %v1547_v13  ;;  %v1551_v15 = vld [vmem:[%s1971_s23 + $0x198] sm:$0xff]  ;;  %v1553_v16 = vld [vmem:[%s1971_s23 + $0x1a0] sm:$0xff] }
 0x1c9   : >> { %1550 = vst [vmem:[%s1967_s18 + $0x190] sm:$0xff] %v1549_v14  ;;  %v1555_v17 = vld [vmem:[%s1971_s23 + $0x1a8] sm:$0xff]  ;;  %1552 = vst [vmem:[%s1967_s18 + $0x198] sm:$0xff] %v1551_v15  ;;  %v1557_v22 = vld [vmem:[%s1971_s23 + $0x1b0] sm:$0xff]  ;;  %1445 = sbr.rel (!%p1442_p12) target bundleno = 431 (0x1af), region = 126 }
 0x1ca   : >> { %1554 = vst [vmem:[%s1967_s18 + $0x1a0] sm:$0xff] %v1553_v16  ;;  %1556 = vst [vmem:[%s1967_s18 + $0x1a8] sm:$0xff] %v1555_v17  ;;  %v1559_v18 = vld [vmem:[%s1971_s23 + $0x1b8] sm:$0xff]  ;;  %v1561_v19 = vld [vmem:[%s1971_s23 + $0x1c0] sm:$0xff] }
 0x1cb   : >> { %1558 = vst [vmem:[%s1967_s18 + $0x1b0] sm:$0xff] %v1557_v22  ;;  %1560 = vst [vmem:[%s1967_s18 + $0x1b8] sm:$0xff] %v1559_v18  ;;  %v1563_v20 = vld [vmem:[%s1971_s23 + $0x1c8] sm:$0xff]  ;;  %v1565_v21 = vld [vmem:[%s1971_s23 + $0x1d0] sm:$0xff] }
 0x1cc   : >> { %1562 = vst [vmem:[%s1967_s18 + $0x1c0] sm:$0xff] %v1561_v19  ;;  %v1567_v24 = vld [vmem:[%s1971_s23 + $0x1d8] sm:$0xff]  ;;  %1564 = vst [vmem:[%s1967_s18 + $0x1c8] sm:$0xff] %v1563_v20  ;;  %v1569_v58 = vld [vmem:[%s1971_s23 + $0x1e0] sm:$0xff] }
 0x1cd   : >> { %1566 = vst [vmem:[%s1967_s18 + $0x1d0] sm:$0xff] %v1565_v21  ;;  %1568 = vst [vmem:[%s1967_s18 + $0x1d8] sm:$0xff] %v1567_v24  ;;  %v1571_v25 = vld [vmem:[%s1971_s23 + $0x1e8] sm:$0xff]  ;;  %v1573_v26 = vld [vmem:[%s1971_s23 + $0x1f0] sm:$0xff] }
 0x1ce   : >> { %1570 = vst [vmem:[%s1967_s18 + $0x1e0] sm:$0xff] %v1569_v58  ;;  %1572 = vst [vmem:[%s1967_s18 + $0x1e8] sm:$0xff] %v1571_v25  ;;  %v1575_v27 = vld [vmem:[%s1971_s23 + $0x1f8] sm:$0xff]  ;;  %s2882_s23 = smov %s2747_s10 }
 0x1cf   : >> { %1574 = vst [vmem:[%s1967_s18 + $0x1f0] sm:$0xff] %v1573_v26  ;;  %1576 = vst [vmem:[%s1967_s18 + $0x1f8] sm:$0xff] %v1575_v27  ;;  %s2881_s18 = smov %s2750_s11 }
 0x1d0 PF: > { %s2855_s12 = sand.u32 63, %s2888_s15   ;;  %s1738_s13 = sshll.u32 %s2680_s6, 9 }
 0x1d1   : > { %s1588_s14 = scalar_lea.vmem %s2601_s25, %s1738_s13 [#allocation2]   ;;  %s1590_s20 = scalar_lea.vmem %s2674_s29, %s1738_s13  }
 0x1d2   : > { %p1731_p13 = scmp.le.s32.totalorder %s2855_s12, 0 }
 0x1d3   : > { %s1981_s21 = smov (!%p1731_p13), %s1590_s20   ;;  %s1985_s17 = smov (!%p1731_p13), %s1588_s14  }
 0x1d4   : > { %1681 = sbr.rel (%p1731_p13) target bundleno = 485 (0x1e5), region = 131  ;;  %s1989_s24 = smov (!%p1731_p13), 0  }
 0x1d5   : > { %s1993_s26 = smov (!%p1731_p13), 0  }
 0x1db LB: >> { %v1600_v23 = vld [vmem:[%s1987_s17] sm:$0xff]  ;;  %s1602_s15 = sadd.s32 1, %s1991_s24  ;;  %s1594_s26 = sadd.s32 1, %s1995_s26   ;;  %s1995_s26 = sphi %s1993_s26, %s1594_s26   ;;  %s1991_s24 = sphi %s1989_s24, %s1990_s24   ;;  %s1987_s17 = sphi %s1985_s17, %s1607_s17   ;;  %s1983_s21 = sphi %s1981_s21, %s1608_s21  }
 0x1dc   : >> { %1601 = vst [vmem:[%s1983_s21] sm:$0xff] %v1600_v23  ;;  %p1603_p0 = scmp.ge.s32.totalorder %s1602_s15, %s2855_s12  ;;  %p1593_p1 = scmp.ge.s32.totalorder %s1594_s26, %s2855_s12 }
 0x1de   : >> { %s2892_s15 = smov (%p1603_p0, %s1602_s15), 0  ;;  %1596 = sbr.rel (!%p1593_p1) target bundleno = 475 (0x1db), region = 137 }
 0x1df   : >> { %s1732_s25 = sshll.u32 %s2892_s15, 3  ;;  %s1990_s24 = smov %s2892_s15  }
 0x1e0   : >> { %s1607_s17 = scalar_lea.vmem %s1588_s14, %s1732_s25 [#allocation2]   ;;  %s1608_s21 = scalar_lea.vmem %s1590_s20, %s1732_s25  }
 0x1e5 PF: > { %p11_p2 = scmp.ge.s32.totalorder %s2038_s19, 9   ;;  %s2884_s15 = smov %s1959_s16 }
 0x1e6   : > { %s2885_s16 = smov %s2046_s22  ;;  %s2886_s17 = smov %s2038_s19 }
 0x1e7   :  { %13 = sbr.rel (!%p11_p2) target bundleno = 2 (0x2), region = 148 }

</bundles_post_ra>
